<compile_context>
chip_gen: v6e
topology: v6e:2x2x1
jax: 0.10.0
libtpu: 0.0.40
codegen_flags: <defaults>
</compile_context>

<pallas_src>
import functools

import jax
import jax.numpy as jnp
from jax.experimental import pallas as pl
from jax.experimental.pallas import tpu as pltpu


# ---------------------------------------------------------------------------
# Fused kernel:  multi-head GAT  ->  ELU  ->  Dense       (one graph "stage")
# ---------------------------------------------------------------------------

def _gat_dense_stage_kernel(nf_full_ref, nf_blk_ref, adj_blk_ref,
                            w_ref, b_ref, v_ref, w2_ref, b2_ref,
                            out_ref, *, n_heads, inv_temp, use_bf16_mxu):
    """For a row block R of the graph:

       per head h:
         hfull   = nf @ W_h + b_h                      (N, c_head)
         hblk    = nf[R] @ W_h + b_h                   (bm, c_head)
         [f1 f2] = hfull @ [v0_h v1_h]                 (N, 2)   (merged matmul)
         logits  = adj[R] * (f1[R] + f2^T)             (bm, N)
         u       = sigmoid(logits) - 0.5               bounded in (-0.5, 0.5)
         e       = where(adj[R] != 0, exp(u/temp), 0)  sparse-softmax numerator
         attn    = e * rcp(sum_row e)                  (rows with no edges -> 0)
         head_h  = attn @ hfull                        (bm, c_head)

       out[R] = sum_h elu(head_h) @ W2[h*c:(h+1)*c, :] + b2
              == elu(concat_h head_h) @ W2 + b2
    """
    nf_full = nf_full_ref[...]                       # (N, c_in)
    nf_blk = nf_blk_ref[...]                         # (bm, c_in)
    adj_blk = adj_blk_ref[...]                       # (bm, N)
    mask = adj_blk != 0.0                            # stored-edge mask (shared by heads)

    c_head = w_ref.shape[2]

    def mm(a, b):
        if use_bf16_mxu:                             # optional MXU bf16 path (v6e/v7x)
            a = a.astype(jnp.bfloat16)
            b = b.astype(jnp.bfloat16)
        return jnp.dot(a, b, preferred_element_type=jnp.float32)

    acc = None
    for h in range(n_heads):                         # static unroll over heads
        w = w_ref[h]                                 # (c_in, c_head)
        b = b_ref[h]                                 # (1, c_head)
        v = v_ref[h]                                 # (c_head, 2)  == [v0 | v1]

        h_full = mm(nf_full, w) + b                  # (N, c_head)
        h_blk = mm(nf_blk, w) + b                    # (bm, c_head)

        f_full = mm(h_full, v)                       # (N, 2)     merged v0/v1 matmul
        f1_blk = mm(h_blk, v)[:, 0:1]                # (bm, 1)
        f2_row = f_full[:, 1:2].T                    # (1, N)

        logits = adj_blk * (f1_blk + f2_row)         # keep adj weighting (general adj)
        u = jax.nn.sigmoid(logits) - 0.5             # in (-0.5, 0.5) -> no row-max needed
        e = jnp.where(mask, jnp.exp(u * inv_temp), 0.0)
        denom = jnp.sum(e, axis=1, keepdims=True)
        attn = jnp.where(denom > 0.0,
                         e * pl.reciprocal(denom, approx=True), 0.0)

        head_out = mm(attn, h_full)                  # (bm, c_head)
        # ELU (alpha=1); clamp before exp so no inf is generated on the EUP.
        head_out = jnp.where(head_out > 0.0, head_out,
                             jnp.exp(jnp.minimum(head_out, 0.0)) - 1.0)

        w2_h = w2_ref[h * c_head:(h + 1) * c_head, :]   # static row slab of W2
        contrib = mm(head_out, w2_h)                 # (bm, c_out)
        acc = contrib if acc is None else acc + contrib

    out_ref[...] = acc + b2_ref[...]


def _full_spec(shape):
    zeros = (0,) * len(shape)
    return pl.BlockSpec(shape, lambda i, _z=zeros: _z)


def gat_dense_stage(nf, adj, w_stack, b_stack, v_stack, w2, b2,
                    *, temp=1.0, block_rows=None, use_bf16_mxu=False):
    """One fused stage: multi-head GAT (concat heads) -> ELU -> Dense."""
    n, c_in = nf.shape
    n_heads = w_stack.shape[0]
    out_dim = w2.shape[1]

    if block_rows is None:
        # Largest convenient row block that divides N; whole graph if N is small
        # or has no multiple-of-8 divisor.  Keeps per-step adj VMEM to bm*N*4 B.
        block_rows = n
        for cand in (512, 256, 128, 64, 32, 16, 8):
            if n % cand == 0:
                block_rows = cand
                break
    bm = block_rows
    grid = (n // bm,)

    kernel = functools.partial(
        _gat_dense_stage_kernel,
        n_heads=n_heads,
        inv_temp=float(1.0 / temp),
        use_bf16_mxu=use_bf16_mxu,
    )

    return pl.pallas_call(
        kernel,
        out_shape=jax.ShapeDtypeStruct((n, out_dim), jnp.float32),
        grid_spec=pltpu.PrefetchScalarGridSpec(
            num_scalar_prefetch=0,
            grid=grid,
            in_specs=[
                pl.BlockSpec((n, c_in), lambda i: (0, 0)),    # nf (full, for columns)
                pl.BlockSpec((bm, c_in), lambda i: (i, 0)),   # nf row block (for f1)
                pl.BlockSpec((bm, n), lambda i: (i, 0)),      # adjacency row block
                _full_spec(w_stack.shape),                    # (H, c_in, c_head)
                _full_spec(b_stack.shape),                    # (H, 1, c_head)
                _full_spec(v_stack.shape),                    # (H, c_head, 2)
                _full_spec(w2.shape),                         # (H*c_head, c_out)
                _full_spec(b2.shape),                         # (1, c_out)
            ],
            out_specs=pl.BlockSpec((bm, out_dim), lambda i: (i, 0)),
        ),
        # Row blocks are independent -> "parallel" (sharded across the 2 TCs on v7x).
        # For very large N also raise vmem_limit_bytes here.
        compiler_params=pltpu.CompilerParams(
            dimension_semantics=("parallel",)),
    )(nf, nf, adj, w_stack, b_stack, v_stack, w2, b2)


# ---------------------------------------------------------------------------
# DeconvNet1 parameters + forward
# ---------------------------------------------------------------------------

def _uniform(key, shape, c_in, c_out):
    lim = jnp.sqrt(6.0 / (c_in + c_out))
    return jax.random.uniform(key, shape, jnp.float32, -lim, lim)


def init_gat_stack(key, c_in, c_head, n_heads):
    keys = jax.random.split(key, n_heads)
    ws, vs = [], []
    for k in keys:
        kw, kv0, kv1 = jax.random.split(k, 3)
        ws.append(_uniform(kw, (c_in, c_head), c_in, c_head))
        v0 = _uniform(kv0, (c_head, 1), c_head, 1)
        v1 = _uniform(kv1, (c_head, 1), c_head, 1)
        vs.append(jnp.concatenate([v0, v1], axis=1))           # (c_head, 2)
    w_stack = jnp.stack(ws, axis=0)                            # (H, c_in, c_head)
    b_stack = jnp.zeros((n_heads, 1, c_head), jnp.float32)     # (H, 1, c_head)
    v_stack = jnp.stack(vs, axis=0)                            # (H, c_head, 2)
    return w_stack, b_stack, v_stack


def init_dense_params(key, c_in, c_out):
    w = _uniform(key, (c_in, c_out), c_in, c_out)
    b = jnp.zeros((1, c_out), jnp.float32)
    return w, b


def init_deconvnet1(key, hidden_dims, n_slices, n_heads, slice_emb_dim):
    k1, k2, k3, k4, k5 = jax.random.split(key, 5)
    h0, h1, h2 = hidden_dims
    c_head = h1 // n_heads
    return dict(
        enc1=init_gat_stack(k1, h0, c_head, n_heads),
        enc2=init_dense_params(k2, h1, h2),
        dec1=init_gat_stack(k3, h2 + slice_emb_dim, c_head, n_heads),
        dec2=init_dense_params(k4, h1, h0),
        slice_emb=jax.random.normal(k5, (n_slices, slice_emb_dim), jnp.float32),
    )


def deconvnet1_forward(params, adj_matrix, node_feats, count_matrix,
                       library_size, slice_label, basis, *, temp=1.0,
                       use_bf16_mxu=False):
    # count_matrix, library_size, basis are unused by the PyTorch forward().
    enc_w, enc_b, enc_v = params["enc1"]
    Z = gat_dense_stage(node_feats, adj_matrix, enc_w, enc_b, enc_v,
                        *params["enc2"], temp=temp, use_bf16_mxu=use_bf16_mxu)
    # TODO(synk): embedding gather + [Z, emb] concat stay in plain JAX glue
    # (tiny; could be folded into the decoder kernel via scalar prefetch).
    slice_label_emb = jnp.take(params["slice_emb"], slice_label, axis=0)
    dec_in = jnp.concatenate([Z, slice_label_emb], axis=1)
    dec_w, dec_b, dec_v = params["dec1"]
    X_recon = gat_dense_stage(dec_in, adj_matrix, dec_w, dec_b, dec_v,
                              *params["dec2"], temp=temp, use_bf16_mxu=use_bf16_mxu)
    return X_recon, Z


# ---------------------------------------------------------------------------
# Pure-JAX reference (same math, no Pallas) for a silent numeric sanity check
# ---------------------------------------------------------------------------

def _ref_gat_stage(nf, adj, w_stack, b_stack, v_stack, w2, b2, temp=1.0):
    heads = []
    mask = adj != 0.0
    for h in range(w_stack.shape[0]):
        w, b, v = w_stack[h], b_stack[h], v_stack[h]
        hfull = nf @ w + b
        f = hfull @ v
        logits = adj * (f[:, 0:1] + f[:, 1:2].T)
        e = jnp.where(mask, jnp.exp((jax.nn.sigmoid(logits) - 0.5) / temp), 0.0)
        d = jnp.sum(e, axis=1, keepdims=True)
        attn = jnp.where(d > 0.0, e / d, 0.0)
        heads.append(attn @ hfull)
    H = jnp.concatenate(heads, axis=1)
    H = jnp.where(H > 0.0, H, jnp.exp(jnp.minimum(H, 0.0)) - 1.0)   # ELU
    return H @ w2 + b2


def _ref_forward(params, adj, nf, slice_label, temp=1.0):
    Z = _ref_gat_stage(nf, adj, *params["enc1"], *params["enc2"], temp=temp)
    emb = jnp.take(params["slice_emb"], slice_label, axis=0)
    dec_in = jnp.concatenate([Z, emb], axis=1)
    Xr = _ref_gat_stage(dec_in, adj, *params["dec1"], *params["dec2"], temp=temp)
    return Xr, Z


# ---------------------------------------------------------------------------

if __name__ == "__main__":
    key = jax.random.PRNGKey(0)
    k_param, k_feat, k_adj, k_lab, k_cnt, k_lib, k_bas = jax.random.split(key, 7)

    # Small, module-consistent shapes
    N = 64                       # number of spots / graph nodes
    hidden_dims = [32, 16, 8]    # [input_dim, hidden, latent]
    n_heads = 2
    n_slices = 3
    slice_emb_dim = 8
    n_celltypes = 5              # only used by `basis` (unused in forward)

    params = init_deconvnet1(k_param, hidden_dims, n_slices, n_heads, slice_emb_dim)

    node_feats = jax.random.normal(k_feat, (N, hidden_dims[0]), jnp.float32)
    # symmetric 0/1 adjacency with self-loops
    a = (jax.random.uniform(k_adj, (N, N)) < 0.1).astype(jnp.float32)
    adj_matrix = jnp.clip(a + a.T + jnp.eye(N, dtype=jnp.float32), 0.0, 1.0)
    slice_label = jax.random.randint(k_lab, (N,), 0, n_slices)
    count_matrix = jax.random.uniform(k_cnt, (N, hidden_dims[0]))     # unused in forward
    library_size = jax.random.uniform(k_lib, (N, 1))                  # unused in forward
    basis = jax.random.uniform(k_bas, (n_celltypes, hidden_dims[0]))  # unused in forward

    fwd = jax.jit(functools.partial(deconvnet1_forward, temp=1.0, use_bf16_mxu=False))
    x_recon, z = fwd(params, adj_matrix, node_feats, count_matrix,
                     library_size, slice_label, basis)
    jax.block_until_ready((x_recon, z))

    # silent sanity check against pure-JAX reference
    xr_ref, z_ref = _ref_forward(params, adj_matrix, node_feats, slice_label)
    assert x_recon.shape == (N, hidden_dims[0]) and z.shape == (N, hidden_dims[2])
    assert jnp.allclose(z, z_ref, atol=1e-3, rtol=1e-2)
    assert jnp.allclose(x_recon, xr_ref, atol=1e-3, rtol=1e-2)

    print("KERNEL_OK")
</pallas_src>

<mosaic_0001>
module attributes {stable_mosaic.version = 11 : i64} {
  func.func @_gat_dense_stage_kernel(%arg0: i32, %arg1: memref<64x32xf32, #tpu.memory_space<vmem>>, %arg2: memref<64x32xf32, #tpu.memory_space<vmem>>, %arg3: memref<64x64xf32, #tpu.memory_space<vmem>>, %arg4: memref<2x32x8xf32, #tpu.memory_space<vmem>>, %arg5: memref<2x1x8xf32, #tpu.memory_space<vmem>>, %arg6: memref<2x8x2xf32, #tpu.memory_space<vmem>>, %arg7: memref<16x8xf32, #tpu.memory_space<vmem>>, %arg8: memref<1x8xf32, #tpu.memory_space<vmem>>, %arg9: memref<64x8xf32, #tpu.memory_space<vmem>>) attributes {dimension_semantics = [#tpu.dimension_semantics<parallel>], iteration_bounds = array<i64: 1>, scalar_prefetch = 0 : i64, scratch_operands = 0 : i64, tpu.core_type = #tpu.core_type<tc>, window_params = [{pipeline_mode = #tpu.pipeline_mode<synchronous>, transform_indices = @transform_0, window_bounds = array<i64: 64, 32>}, {transform_indices = @transform_1, window_bounds = array<i64: 64, 32>}, {transform_indices = @transform_2, window_bounds = array<i64: 64, 64>}, {pipeline_mode = #tpu.pipeline_mode<synchronous>, transform_indices = @transform_3, window_bounds = array<i64: 2, 32, 8>}, {pipeline_mode = #tpu.pipeline_mode<synchronous>, transform_indices = @transform_4, window_bounds = array<i64: 2, 1, 8>}, {pipeline_mode = #tpu.pipeline_mode<synchronous>, transform_indices = @transform_5, window_bounds = array<i64: 2, 8, 2>}, {pipeline_mode = #tpu.pipeline_mode<synchronous>, transform_indices = @transform_6, window_bounds = array<i64: 16, 8>}, {pipeline_mode = #tpu.pipeline_mode<synchronous>, transform_indices = @transform_7, window_bounds = array<i64: 1, 8>}, {transform_indices = @transform_8, window_bounds = array<i64: 64, 8>}]} {
    %c0 = arith.constant 0 : index
    %c0_0 = arith.constant 0 : index
    %0 = vector.load %arg1[%c0, %c0_0] : memref<64x32xf32, #tpu.memory_space<vmem>>, vector<64x32xf32>
    %c0_1 = arith.constant 0 : index
    %c0_2 = arith.constant 0 : index
    %1 = vector.load %arg2[%c0_1, %c0_2] : memref<64x32xf32, #tpu.memory_space<vmem>>, vector<64x32xf32>
    %c0_3 = arith.constant 0 : index
    %c0_4 = arith.constant 0 : index
    %2 = vector.load %arg3[%c0_3, %c0_4] : memref<64x64xf32, #tpu.memory_space<vmem>>, vector<64x64xf32>
    %cst = arith.constant 0.000000e+00 : f32
    %3 = vector.broadcast %cst : f32 to vector<64x64xf32>
    %4 = arith.cmpf one, %2, %3 : vector<64x64xf32>
    %c0_5 = arith.constant 0 : index
    %c0_6 = arith.constant 0 : index
    %c0_7 = arith.constant 0 : index
    %5 = vector.load %arg4[%c0_5, %c0_6, %c0_7] : memref<2x32x8xf32, #tpu.memory_space<vmem>>, vector<1x32x8xf32>
    %6 = vector.shape_cast %5 : vector<1x32x8xf32> to vector<32x8xf32>
    %c0_8 = arith.constant 0 : index
    %c0_9 = arith.constant 0 : index
    %c0_10 = arith.constant 0 : index
    %7 = vector.load %arg5[%c0_8, %c0_9, %c0_10] : memref<2x1x8xf32, #tpu.memory_space<vmem>>, vector<1x1x8xf32>
    %8 = vector.shape_cast %7 : vector<1x1x8xf32> to vector<1x8xf32>
    %c0_11 = arith.constant 0 : index
    %c0_12 = arith.constant 0 : index
    %c0_13 = arith.constant 0 : index
    %9 = vector.load %arg6[%c0_11, %c0_12, %c0_13] : memref<2x8x2xf32, #tpu.memory_space<vmem>>, vector<1x8x2xf32>
    %10 = vector.shape_cast %9 : vector<1x8x2xf32> to vector<8x2xf32>
    %cst_14 = arith.constant dense<0.000000e+00> : vector<64x8xf32>
    %11 = tpu.matmul %0, %6, %cst_14 {dimension_numbers = #tpu.dot_dimension_numbers<[1], [0], [0], [1], [0, 0, 1, 1], [], []>} : vector<64x32xf32>, vector<32x8xf32>, vector<64x8xf32> -> vector<64x8xf32>
    %12 = vector.broadcast %8 : vector<1x8xf32> to vector<64x8xf32>
    %13 = arith.addf %11, %12 : vector<64x8xf32>
    %cst_15 = arith.constant dense<0.000000e+00> : vector<64x8xf32>
    %14 = tpu.matmul %1, %6, %cst_15 {dimension_numbers = #tpu.dot_dimension_numbers<[1], [0], [0], [1], [0, 0, 1, 1], [], []>} : vector<64x32xf32>, vector<32x8xf32>, vector<64x8xf32> -> vector<64x8xf32>
    %15 = vector.broadcast %8 : vector<1x8xf32> to vector<64x8xf32>
    %16 = arith.addf %14, %15 : vector<64x8xf32>
    %cst_16 = arith.constant dense<0.000000e+00> : vector<64x2xf32>
    %17 = tpu.matmul %13, %10, %cst_16 {dimension_numbers = #tpu.dot_dimension_numbers<[1], [0], [0], [1], [0, 0, 1, 1], [], []>} : vector<64x8xf32>, vector<8x2xf32>, vector<64x2xf32> -> vector<64x2xf32>
    %cst_17 = arith.constant dense<0.000000e+00> : vector<64x2xf32>
    %18 = tpu.matmul %16, %10, %cst_17 {dimension_numbers = #tpu.dot_dimension_numbers<[1], [0], [0], [1], [0, 0, 1, 1], [], []>} : vector<64x8xf32>, vector<8x2xf32>, vector<64x2xf32> -> vector<64x2xf32>
    %19 = vector.extract_strided_slice %18 {offsets = [0, 0], sizes = [64, 1], strides = [1, 1]} : vector<64x2xf32> to vector<64x1xf32>
    %20 = vector.extract_strided_slice %17 {offsets = [0, 1], sizes = [64, 1], strides = [1, 1]} : vector<64x2xf32> to vector<64x1xf32>
    %21 = tpu.transpose %20, [1, 0] : vector<64x1xf32> -> vector<1x64xf32>
    %22 = vector.broadcast %19 : vector<64x1xf32> to vector<64x64xf32>
    %23 = vector.broadcast %21 : vector<1x64xf32> to vector<64x64xf32>
    %24 = arith.addf %22, %23 : vector<64x64xf32>
    %25 = arith.mulf %2, %24 : vector<64x64xf32>
    %26 = arith.negf %25 : vector<64x64xf32>
    %27 = math.exp %26 : vector<64x64xf32>
    %cst_18 = arith.constant 1.000000e+00 : f32
    %28 = vector.broadcast %cst_18 : f32 to vector<64x64xf32>
    %29 = arith.addf %28, %27 : vector<64x64xf32>
    %30 = arith.divf %28, %29 : vector<64x64xf32>
    %cst_19 = arith.constant 5.000000e-01 : f32
    %31 = vector.broadcast %cst_19 : f32 to vector<64x64xf32>
    %32 = arith.subf %30, %31 : vector<64x64xf32>
    %cst_20 = arith.constant 1.000000e+00 : f32
    %33 = vector.broadcast %cst_20 : f32 to vector<64x64xf32>
    %34 = arith.mulf %32, %33 : vector<64x64xf32>
    %35 = math.exp %34 : vector<64x64xf32>
    %cst_21 = arith.constant 0.000000e+00 : f32
    %36 = vector.broadcast %cst_21 : f32 to vector<64x64xf32>
    %37 = arith.select %4, %35, %36 : vector<64x64xi1>, vector<64x64xf32>
    %cst_22 = arith.constant dense<0.000000e+00> : vector<64xf32>
    %38 = vector.multi_reduction <add>, %37, %cst_22 [1] : vector<64x64xf32> to vector<64xf32>
    %39 = vector.shape_cast %38 : vector<64xf32> to vector<64x1xf32>
    %cst_23 = arith.constant 0.000000e+00 : f32
    %40 = vector.broadcast %cst_23 : f32 to vector<64x1xf32>
    %41 = arith.cmpf ogt, %39, %40 : vector<64x1xf32>
    %42 = tpu.reciprocal %39 {approx = true} : vector<64x1xf32> -> vector<64x1xf32>
    %43 = vector.broadcast %42 : vector<64x1xf32> to vector<64x64xf32>
    %44 = arith.mulf %37, %43 : vector<64x64xf32>
    %cst_24 = arith.constant 0.000000e+00 : f32
    %45 = vector.shape_cast %41 : vector<64x1xi1> to vector<64x1xi1>
    %46 = vector.broadcast %45 : vector<64x1xi1> to vector<64x64xi1>
    %47 = vector.broadcast %cst_24 : f32 to vector<64x64xf32>
    %48 = arith.select %46, %44, %47 : vector<64x64xi1>, vector<64x64xf32>
    %cst_25 = arith.constant dense<0.000000e+00> : vector<64x8xf32>
    %49 = tpu.matmul %48, %13, %cst_25 {dimension_numbers = #tpu.dot_dimension_numbers<[1], [0], [0], [1], [0, 0, 1, 1], [], []>} : vector<64x64xf32>, vector<64x8xf32>, vector<64x8xf32> -> vector<64x8xf32>
    %cst_26 = arith.constant 0.000000e+00 : f32
    %50 = vector.broadcast %cst_26 : f32 to vector<64x8xf32>
    %51 = arith.cmpf ogt, %49, %50 : vector<64x8xf32>
    %cst_27 = arith.constant 0.000000e+00 : f32
    %52 = vector.broadcast %cst_27 : f32 to vector<64x8xf32>
    %53 = arith.minimumf %49, %52 : vector<64x8xf32>
    %54 = math.exp %53 : vector<64x8xf32>
    %cst_28 = arith.constant 1.000000e+00 : f32
    %55 = vector.broadcast %cst_28 : f32 to vector<64x8xf32>
    %56 = arith.subf %54, %55 : vector<64x8xf32>
    %57 = arith.select %51, %49, %56 : vector<64x8xi1>, vector<64x8xf32>
    %c0_29 = arith.constant 0 : index
    %c0_30 = arith.constant 0 : index
    %58 = vector.load %arg7[%c0_29, %c0_30] : memref<16x8xf32, #tpu.memory_space<vmem>>, vector<8x8xf32>
    %cst_31 = arith.constant dense<0.000000e+00> : vector<64x8xf32>
    %59 = tpu.matmul %57, %58, %cst_31 {dimension_numbers = #tpu.dot_dimension_numbers<[1], [0], [0], [1], [0, 0, 1, 1], [], []>} : vector<64x8xf32>, vector<8x8xf32>, vector<64x8xf32> -> vector<64x8xf32>
    %c1 = arith.constant 1 : index
    %c0_32 = arith.constant 0 : index
    %c0_33 = arith.constant 0 : index
    %60 = vector.load %arg4[%c1, %c0_32, %c0_33] : memref<2x32x8xf32, #tpu.memory_space<vmem>>, vector<1x32x8xf32>
    %61 = vector.shape_cast %60 : vector<1x32x8xf32> to vector<32x8xf32>
    %c1_34 = arith.constant 1 : index
    %c0_35 = arith.constant 0 : index
    %c0_36 = arith.constant 0 : index
    %62 = vector.load %arg5[%c1_34, %c0_35, %c0_36] : memref<2x1x8xf32, #tpu.memory_space<vmem>>, vector<1x1x8xf32>
    %63 = vector.shape_cast %62 : vector<1x1x8xf32> to vector<1x8xf32>
    %c1_37 = arith.constant 1 : index
    %c0_38 = arith.constant 0 : index
    %c0_39 = arith.constant 0 : index
    %64 = vector.load %arg6[%c1_37, %c0_38, %c0_39] : memref<2x8x2xf32, #tpu.memory_space<vmem>>, vector<1x8x2xf32>
    %65 = vector.shape_cast %64 : vector<1x8x2xf32> to vector<8x2xf32>
    %cst_40 = arith.constant dense<0.000000e+00> : vector<64x8xf32>
    %66 = tpu.matmul %0, %61, %cst_40 {dimension_numbers = #tpu.dot_dimension_numbers<[1], [0], [0], [1], [0, 0, 1, 1], [], []>} : vector<64x32xf32>, vector<32x8xf32>, vector<64x8xf32> -> vector<64x8xf32>
    %67 = vector.broadcast %63 : vector<1x8xf32> to vector<64x8xf32>
    %68 = arith.addf %66, %67 : vector<64x8xf32>
    %cst_41 = arith.constant dense<0.000000e+00> : vector<64x8xf32>
    %69 = tpu.matmul %1, %61, %cst_41 {dimension_numbers = #tpu.dot_dimension_numbers<[1], [0], [0], [1], [0, 0, 1, 1], [], []>} : vector<64x32xf32>, vector<32x8xf32>, vector<64x8xf32> -> vector<64x8xf32>
    %70 = vector.broadcast %63 : vector<1x8xf32> to vector<64x8xf32>
    %71 = arith.addf %69, %70 : vector<64x8xf32>
    %cst_42 = arith.constant dense<0.000000e+00> : vector<64x2xf32>
    %72 = tpu.matmul %68, %65, %cst_42 {dimension_numbers = #tpu.dot_dimension_numbers<[1], [0], [0], [1], [0, 0, 1, 1], [], []>} : vector<64x8xf32>, vector<8x2xf32>, vector<64x2xf32> -> vector<64x2xf32>
    %cst_43 = arith.constant dense<0.000000e+00> : vector<64x2xf32>
    %73 = tpu.matmul %71, %65, %cst_43 {dimension_numbers = #tpu.dot_dimension_numbers<[1], [0], [0], [1], [0, 0, 1, 1], [], []>} : vector<64x8xf32>, vector<8x2xf32>, vector<64x2xf32> -> vector<64x2xf32>
    %74 = vector.extract_strided_slice %73 {offsets = [0, 0], sizes = [64, 1], strides = [1, 1]} : vector<64x2xf32> to vector<64x1xf32>
    %75 = vector.extract_strided_slice %72 {offsets = [0, 1], sizes = [64, 1], strides = [1, 1]} : vector<64x2xf32> to vector<64x1xf32>
    %76 = tpu.transpose %75, [1, 0] : vector<64x1xf32> -> vector<1x64xf32>
    %77 = vector.broadcast %74 : vector<64x1xf32> to vector<64x64xf32>
    %78 = vector.broadcast %76 : vector<1x64xf32> to vector<64x64xf32>
    %79 = arith.addf %77, %78 : vector<64x64xf32>
    %80 = arith.mulf %2, %79 : vector<64x64xf32>
    %81 = arith.negf %80 : vector<64x64xf32>
    %82 = math.exp %81 : vector<64x64xf32>
    %cst_44 = arith.constant 1.000000e+00 : f32
    %83 = vector.broadcast %cst_44 : f32 to vector<64x64xf32>
    %84 = arith.addf %83, %82 : vector<64x64xf32>
    %85 = arith.divf %83, %84 : vector<64x64xf32>
    %cst_45 = arith.constant 5.000000e-01 : f32
    %86 = vector.broadcast %cst_45 : f32 to vector<64x64xf32>
    %87 = arith.subf %85, %86 : vector<64x64xf32>
    %cst_46 = arith.constant 1.000000e+00 : f32
    %88 = vector.broadcast %cst_46 : f32 to vector<64x64xf32>
    %89 = arith.mulf %87, %88 : vector<64x64xf32>
    %90 = math.exp %89 : vector<64x64xf32>
    %cst_47 = arith.constant 0.000000e+00 : f32
    %91 = vector.broadcast %cst_47 : f32 to vector<64x64xf32>
    %92 = arith.select %4, %90, %91 : vector<64x64xi1>, vector<64x64xf32>
    %cst_48 = arith.constant dense<0.000000e+00> : vector<64xf32>
    %93 = vector.multi_reduction <add>, %92, %cst_48 [1] : vector<64x64xf32> to vector<64xf32>
    %94 = vector.shape_cast %93 : vector<64xf32> to vector<64x1xf32>
    %cst_49 = arith.constant 0.000000e+00 : f32
    %95 = vector.broadcast %cst_49 : f32 to vector<64x1xf32>
    %96 = arith.cmpf ogt, %94, %95 : vector<64x1xf32>
    %97 = tpu.reciprocal %94 {approx = true} : vector<64x1xf32> -> vector<64x1xf32>
    %98 = vector.broadcast %97 : vector<64x1xf32> to vector<64x64xf32>
    %99 = arith.mulf %92, %98 : vector<64x64xf32>
    %cst_50 = arith.constant 0.000000e+00 : f32
    %100 = vector.shape_cast %96 : vector<64x1xi1> to vector<64x1xi1>
    %101 = vector.broadcast %100 : vector<64x1xi1> to vector<64x64xi1>
    %102 = vector.broadcast %cst_50 : f32 to vector<64x64xf32>
    %103 = arith.select %101, %99, %102 : vector<64x64xi1>, vector<64x64xf32>
    %cst_51 = arith.constant dense<0.000000e+00> : vector<64x8xf32>
    %104 = tpu.matmul %103, %68, %cst_51 {dimension_numbers = #tpu.dot_dimension_numbers<[1], [0], [0], [1], [0, 0, 1, 1], [], []>} : vector<64x64xf32>, vector<64x8xf32>, vector<64x8xf32> -> vector<64x8xf32>
    %cst_52 = arith.constant 0.000000e+00 : f32
    %105 = vector.broadcast %cst_52 : f32 to vector<64x8xf32>
    %106 = arith.cmpf ogt, %104, %105 : vector<64x8xf32>
    %cst_53 = arith.constant 0.000000e+00 : f32
    %107 = vector.broadcast %cst_53 : f32 to vector<64x8xf32>
    %108 = arith.minimumf %104, %107 : vector<64x8xf32>
    %109 = math.exp %108 : vector<64x8xf32>
    %cst_54 = arith.constant 1.000000e+00 : f32
    %110 = vector.broadcast %cst_54 : f32 to vector<64x8xf32>
    %111 = arith.subf %109, %110 : vector<64x8xf32>
    %112 = arith.select %106, %104, %111 : vector<64x8xi1>, vector<64x8xf32>
    %c8 = arith.constant 8 : index
    %c0_55 = arith.constant 0 : index
    %113 = vector.load %arg7[%c8, %c0_55] : memref<16x8xf32, #tpu.memory_space<vmem>>, vector<8x8xf32>
    %cst_56 = arith.constant dense<0.000000e+00> : vector<64x8xf32>
    %114 = tpu.matmul %112, %113, %cst_56 {dimension_numbers = #tpu.dot_dimension_numbers<[1], [0], [0], [1], [0, 0, 1, 1], [], []>} : vector<64x8xf32>, vector<8x8xf32>, vector<64x8xf32> -> vector<64x8xf32>
    %115 = arith.addf %59, %114 : vector<64x8xf32>
    %c0_57 = arith.constant 0 : index
    %c0_58 = arith.constant 0 : index
    %116 = vector.load %arg8[%c0_57, %c0_58] : memref<1x8xf32, #tpu.memory_space<vmem>>, vector<1x8xf32>
    %117 = vector.broadcast %116 : vector<1x8xf32> to vector<64x8xf32>
    %118 = arith.addf %115, %117 : vector<64x8xf32>
    %c0_59 = arith.constant 0 : index
    %c0_60 = arith.constant 0 : index
    %119 = vector.load %arg9[%c0_59, %c0_60] : memref<64x8xf32, #tpu.memory_space<vmem>>, vector<64x8xf32>
    tpu.vector_store %arg9[%c0_59, %c0_60], %118 {strides = array<i32>} : memref<64x8xf32, #tpu.memory_space<vmem>>, vector<64x8xf32>,
    return
  }
  func.func @transform_0(%arg0: i32) -> (i32, i32) {
    %c0_i32 = arith.constant 0 : i32
    %c0_i32_0 = arith.constant 0 : i32
    %c0_i32_1 = arith.constant 0 : i32
    return %c0_i32, %c0_i32_0 : i32, i32
  }
  func.func @transform_1(%arg0: i32) -> (i32, i32) {
    %c0_i32 = arith.constant 0 : i32
    %c0_i32_0 = arith.constant 0 : i32
    return %arg0, %c0_i32 : i32, i32
  }
  func.func @transform_2(%arg0: i32) -> (i32, i32) {
    %c0_i32 = arith.constant 0 : i32
    %c0_i32_0 = arith.constant 0 : i32
    return %arg0, %c0_i32 : i32, i32
  }
  func.func @transform_3(%arg0: i32) -> (i32, i32, i32) {
    %c0_i32 = arith.constant 0 : i32
    %c0_i32_0 = arith.constant 0 : i32
    %c0_i32_1 = arith.constant 0 : i32
    %c0_i32_2 = arith.constant 0 : i32
    return %c0_i32, %c0_i32_0, %c0_i32_1 : i32, i32, i32
  }
  func.func @transform_4(%arg0: i32) -> (i32, i32, i32) {
    %c0_i32 = arith.constant 0 : i32
    %c0_i32_0 = arith.constant 0 : i32
    %c0_i32_1 = arith.constant 0 : i32
    %c0_i32_2 = arith.constant 0 : i32
    return %c0_i32, %c0_i32_0, %c0_i32_1 : i32, i32, i32
  }
  func.func @transform_5(%arg0: i32) -> (i32, i32, i32) {
    %c0_i32 = arith.constant 0 : i32
    %c0_i32_0 = arith.constant 0 : i32
    %c0_i32_1 = arith.constant 0 : i32
    %c0_i32_2 = arith.constant 0 : i32
    return %c0_i32, %c0_i32_0, %c0_i32_1 : i32, i32, i32
  }
  func.func @transform_6(%arg0: i32) -> (i32, i32) {
    %c0_i32 = arith.constant 0 : i32
    %c0_i32_0 = arith.constant 0 : i32
    %c0_i32_1 = arith.constant 0 : i32
    return %c0_i32, %c0_i32_0 : i32, i32
  }
  func.func @transform_7(%arg0: i32) -> (i32, i32) {
    %c0_i32 = arith.constant 0 : i32
    %c0_i32_0 = arith.constant 0 : i32
    %c0_i32_1 = arith.constant 0 : i32
    return %c0_i32, %c0_i32_0 : i32, i32
  }
  func.func @transform_8(%arg0: i32) -> (i32, i32) {
    %c0_i32 = arith.constant 0 : i32
    %c0_i32_0 = arith.constant 0 : i32
    return %arg0, %c0_i32 : i32, i32
  }
}

module attributes {stable_mosaic.version = 11 : i64} {
  func.func @_gat_dense_stage_kernel(%arg0: i32, %arg1: memref<64x16xf32, #tpu.memory_space<vmem>>, %arg2: memref<64x16xf32, #tpu.memory_space<vmem>>, %arg3: memref<64x64xf32, #tpu.memory_space<vmem>>, %arg4: memref<2x16x8xf32, #tpu.memory_space<vmem>>, %arg5: memref<2x1x8xf32, #tpu.memory_space<vmem>>, %arg6: memref<2x8x2xf32, #tpu.memory_space<vmem>>, %arg7: memref<16x32xf32, #tpu.memory_space<vmem>>, %arg8: memref<1x32xf32, #tpu.memory_space<vmem>>, %arg9: memref<64x32xf32, #tpu.memory_space<vmem>>) attributes {dimension_semantics = [#tpu.dimension_semantics<parallel>], iteration_bounds = array<i64: 1>, scalar_prefetch = 0 : i64, scratch_operands = 0 : i64, tpu.core_type = #tpu.core_type<tc>, window_params = [{pipeline_mode = #tpu.pipeline_mode<synchronous>, transform_indices = @transform_0, window_bounds = array<i64: 64, 16>}, {transform_indices = @transform_1, window_bounds = array<i64: 64, 16>}, {transform_indices = @transform_2, window_bounds = array<i64: 64, 64>}, {pipeline_mode = #tpu.pipeline_mode<synchronous>, transform_indices = @transform_3, window_bounds = array<i64: 2, 16, 8>}, {pipeline_mode = #tpu.pipeline_mode<synchronous>, transform_indices = @transform_4, window_bounds = array<i64: 2, 1, 8>}, {pipeline_mode = #tpu.pipeline_mode<synchronous>, transform_indices = @transform_5, window_bounds = array<i64: 2, 8, 2>}, {pipeline_mode = #tpu.pipeline_mode<synchronous>, transform_indices = @transform_6, window_bounds = array<i64: 16, 32>}, {pipeline_mode = #tpu.pipeline_mode<synchronous>, transform_indices = @transform_7, window_bounds = array<i64: 1, 32>}, {transform_indices = @transform_8, window_bounds = array<i64: 64, 32>}]} {
    %c0 = arith.constant 0 : index
    %c0_0 = arith.constant 0 : index
    %0 = vector.load %arg1[%c0, %c0_0] : memref<64x16xf32, #tpu.memory_space<vmem>>, vector<64x16xf32>
    %c0_1 = arith.constant 0 : index
    %c0_2 = arith.constant 0 : index
    %1 = vector.load %arg2[%c0_1, %c0_2] : memref<64x16xf32, #tpu.memory_space<vmem>>, vector<64x16xf32>
    %c0_3 = arith.constant 0 : index
    %c0_4 = arith.constant 0 : index
    %2 = vector.load %arg3[%c0_3, %c0_4] : memref<64x64xf32, #tpu.memory_space<vmem>>, vector<64x64xf32>
    %cst = arith.constant 0.000000e+00 : f32
    %3 = vector.broadcast %cst : f32 to vector<64x64xf32>
    %4 = arith.cmpf one, %2, %3 : vector<64x64xf32>
    %c0_5 = arith.constant 0 : index
    %c0_6 = arith.constant 0 : index
    %c0_7 = arith.constant 0 : index
    %5 = vector.load %arg4[%c0_5, %c0_6, %c0_7] : memref<2x16x8xf32, #tpu.memory_space<vmem>>, vector<1x16x8xf32>
    %6 = vector.shape_cast %5 : vector<1x16x8xf32> to vector<16x8xf32>
    %c0_8 = arith.constant 0 : index
    %c0_9 = arith.constant 0 : index
    %c0_10 = arith.constant 0 : index
    %7 = vector.load %arg5[%c0_8, %c0_9, %c0_10] : memref<2x1x8xf32, #tpu.memory_space<vmem>>, vector<1x1x8xf32>
    %8 = vector.shape_cast %7 : vector<1x1x8xf32> to vector<1x8xf32>
    %c0_11 = arith.constant 0 : index
    %c0_12 = arith.constant 0 : index
    %c0_13 = arith.constant 0 : index
    %9 = vector.load %arg6[%c0_11, %c0_12, %c0_13] : memref<2x8x2xf32, #tpu.memory_space<vmem>>, vector<1x8x2xf32>
    %10 = vector.shape_cast %9 : vector<1x8x2xf32> to vector<8x2xf32>
    %cst_14 = arith.constant dense<0.000000e+00> : vector<64x8xf32>
    %11 = tpu.matmul %0, %6, %cst_14 {dimension_numbers = #tpu.dot_dimension_numbers<[1], [0], [0], [1], [0, 0, 1, 1], [], []>} : vector<64x16xf32>, vector<16x8xf32>, vector<64x8xf32> -> vector<64x8xf32>
    %12 = vector.broadcast %8 : vector<1x8xf32> to vector<64x8xf32>
    %13 = arith.addf %11, %12 : vector<64x8xf32>
    %cst_15 = arith.constant dense<0.000000e+00> : vector<64x8xf32>
    %14 = tpu.matmul %1, %6, %cst_15 {dimension_numbers = #tpu.dot_dimension_numbers<[1], [0], [0], [1], [0, 0, 1, 1], [], []>} : vector<64x16xf32>, vector<16x8xf32>, vector<64x8xf32> -> vector<64x8xf32>
    %15 = vector.broadcast %8 : vector<1x8xf32> to vector<64x8xf32>
    %16 = arith.addf %14, %15 : vector<64x8xf32>
    %cst_16 = arith.constant dense<0.000000e+00> : vector<64x2xf32>
    %17 = tpu.matmul %13, %10, %cst_16 {dimension_numbers = #tpu.dot_dimension_numbers<[1], [0], [0], [1], [0, 0, 1, 1], [], []>} : vector<64x8xf32>, vector<8x2xf32>, vector<64x2xf32> -> vector<64x2xf32>
    %cst_17 = arith.constant dense<0.000000e+00> : vector<64x2xf32>
    %18 = tpu.matmul %16, %10, %cst_17 {dimension_numbers = #tpu.dot_dimension_numbers<[1], [0], [0], [1], [0, 0, 1, 1], [], []>} : vector<64x8xf32>, vector<8x2xf32>, vector<64x2xf32> -> vector<64x2xf32>
    %19 = vector.extract_strided_slice %18 {offsets = [0, 0], sizes = [64, 1], strides = [1, 1]} : vector<64x2xf32> to vector<64x1xf32>
    %20 = vector.extract_strided_slice %17 {offsets = [0, 1], sizes = [64, 1], strides = [1, 1]} : vector<64x2xf32> to vector<64x1xf32>
    %21 = tpu.transpose %20, [1, 0] : vector<64x1xf32> -> vector<1x64xf32>
    %22 = vector.broadcast %19 : vector<64x1xf32> to vector<64x64xf32>
    %23 = vector.broadcast %21 : vector<1x64xf32> to vector<64x64xf32>
    %24 = arith.addf %22, %23 : vector<64x64xf32>
    %25 = arith.mulf %2, %24 : vector<64x64xf32>
    %26 = arith.negf %25 : vector<64x64xf32>
    %27 = math.exp %26 : vector<64x64xf32>
    %cst_18 = arith.constant 1.000000e+00 : f32
    %28 = vector.broadcast %cst_18 : f32 to vector<64x64xf32>
    %29 = arith.addf %28, %27 : vector<64x64xf32>
    %30 = arith.divf %28, %29 : vector<64x64xf32>
    %cst_19 = arith.constant 5.000000e-01 : f32
    %31 = vector.broadcast %cst_19 : f32 to vector<64x64xf32>
    %32 = arith.subf %30, %31 : vector<64x64xf32>
    %cst_20 = arith.constant 1.000000e+00 : f32
    %33 = vector.broadcast %cst_20 : f32 to vector<64x64xf32>
    %34 = arith.mulf %32, %33 : vector<64x64xf32>
    %35 = math.exp %34 : vector<64x64xf32>
    %cst_21 = arith.constant 0.000000e+00 : f32
    %36 = vector.broadcast %cst_21 : f32 to vector<64x64xf32>
    %37 = arith.select %4, %35, %36 : vector<64x64xi1>, vector<64x64xf32>
    %cst_22 = arith.constant dense<0.000000e+00> : vector<64xf32>
    %38 = vector.multi_reduction <add>, %37, %cst_22 [1] : vector<64x64xf32> to vector<64xf32>
    %39 = vector.shape_cast %38 : vector<64xf32> to vector<64x1xf32>
    %cst_23 = arith.constant 0.000000e+00 : f32
    %40 = vector.broadcast %cst_23 : f32 to vector<64x1xf32>
    %41 = arith.cmpf ogt, %39, %40 : vector<64x1xf32>
    %42 = tpu.reciprocal %39 {approx = true} : vector<64x1xf32> -> vector<64x1xf32>
    %43 = vector.broadcast %42 : vector<64x1xf32> to vector<64x64xf32>
    %44 = arith.mulf %37, %43 : vector<64x64xf32>
    %cst_24 = arith.constant 0.000000e+00 : f32
    %45 = vector.shape_cast %41 : vector<64x1xi1> to vector<64x1xi1>
    %46 = vector.broadcast %45 : vector<64x1xi1> to vector<64x64xi1>
    %47 = vector.broadcast %cst_24 : f32 to vector<64x64xf32>
    %48 = arith.select %46, %44, %47 : vector<64x64xi1>, vector<64x64xf32>
    %cst_25 = arith.constant dense<0.000000e+00> : vector<64x8xf32>
    %49 = tpu.matmul %48, %13, %cst_25 {dimension_numbers = #tpu.dot_dimension_numbers<[1], [0], [0], [1], [0, 0, 1, 1], [], []>} : vector<64x64xf32>, vector<64x8xf32>, vector<64x8xf32> -> vector<64x8xf32>
    %cst_26 = arith.constant 0.000000e+00 : f32
    %50 = vector.broadcast %cst_26 : f32 to vector<64x8xf32>
    %51 = arith.cmpf ogt, %49, %50 : vector<64x8xf32>
    %cst_27 = arith.constant 0.000000e+00 : f32
    %52 = vector.broadcast %cst_27 : f32 to vector<64x8xf32>
    %53 = arith.minimumf %49, %52 : vector<64x8xf32>
    %54 = math.exp %53 : vector<64x8xf32>
    %cst_28 = arith.constant 1.000000e+00 : f32
    %55 = vector.broadcast %cst_28 : f32 to vector<64x8xf32>
    %56 = arith.subf %54, %55 : vector<64x8xf32>
    %57 = arith.select %51, %49, %56 : vector<64x8xi1>, vector<64x8xf32>
    %c0_29 = arith.constant 0 : index
    %c0_30 = arith.constant 0 : index
    %58 = vector.load %arg7[%c0_29, %c0_30] : memref<16x32xf32, #tpu.memory_space<vmem>>, vector<8x32xf32>
    %cst_31 = arith.constant dense<0.000000e+00> : vector<64x32xf32>
    %59 = tpu.matmul %57, %58, %cst_31 {dimension_numbers = #tpu.dot_dimension_numbers<[1], [0], [0], [1], [0, 0, 1, 1], [], []>} : vector<64x8xf32>, vector<8x32xf32>, vector<64x32xf32> -> vector<64x32xf32>
    %c1 = arith.constant 1 : index
    %c0_32 = arith.constant 0 : index
    %c0_33 = arith.constant 0 : index
    %60 = vector.load %arg4[%c1, %c0_32, %c0_33] : memref<2x16x8xf32, #tpu.memory_space<vmem>>, vector<1x16x8xf32>
    %61 = vector.shape_cast %60 : vector<1x16x8xf32> to vector<16x8xf32>
    %c1_34 = arith.constant 1 : index
    %c0_35 = arith.constant 0 : index
    %c0_36 = arith.constant 0 : index
    %62 = vector.load %arg5[%c1_34, %c0_35, %c0_36] : memref<2x1x8xf32, #tpu.memory_space<vmem>>, vector<1x1x8xf32>
    %63 = vector.shape_cast %62 : vector<1x1x8xf32> to vector<1x8xf32>
    %c1_37 = arith.constant 1 : index
    %c0_38 = arith.constant 0 : index
    %c0_39 = arith.constant 0 : index
    %64 = vector.load %arg6[%c1_37, %c0_38, %c0_39] : memref<2x8x2xf32, #tpu.memory_space<vmem>>, vector<1x8x2xf32>
    %65 = vector.shape_cast %64 : vector<1x8x2xf32> to vector<8x2xf32>
    %cst_40 = arith.constant dense<0.000000e+00> : vector<64x8xf32>
    %66 = tpu.matmul %0, %61, %cst_40 {dimension_numbers = #tpu.dot_dimension_numbers<[1], [0], [0], [1], [0, 0, 1, 1], [], []>} : vector<64x16xf32>, vector<16x8xf32>, vector<64x8xf32> -> vector<64x8xf32>
    %67 = vector.broadcast %63 : vector<1x8xf32> to vector<64x8xf32>
    %68 = arith.addf %66, %67 : vector<64x8xf32>
    %cst_41 = arith.constant dense<0.000000e+00> : vector<64x8xf32>
    %69 = tpu.matmul %1, %61, %cst_41 {dimension_numbers = #tpu.dot_dimension_numbers<[1], [0], [0], [1], [0, 0, 1, 1], [], []>} : vector<64x16xf32>, vector<16x8xf32>, vector<64x8xf32> -> vector<64x8xf32>
    %70 = vector.broadcast %63 : vector<1x8xf32> to vector<64x8xf32>
    %71 = arith.addf %69, %70 : vector<64x8xf32>
    %cst_42 = arith.constant dense<0.000000e+00> : vector<64x2xf32>
    %72 = tpu.matmul %68, %65, %cst_42 {dimension_numbers = #tpu.dot_dimension_numbers<[1], [0], [0], [1], [0, 0, 1, 1], [], []>} : vector<64x8xf32>, vector<8x2xf32>, vector<64x2xf32> -> vector<64x2xf32>
    %cst_43 = arith.constant dense<0.000000e+00> : vector<64x2xf32>
    %73 = tpu.matmul %71, %65, %cst_43 {dimension_numbers = #tpu.dot_dimension_numbers<[1], [0], [0], [1], [0, 0, 1, 1], [], []>} : vector<64x8xf32>, vector<8x2xf32>, vector<64x2xf32> -> vector<64x2xf32>
    %74 = vector.extract_strided_slice %73 {offsets = [0, 0], sizes = [64, 1], strides = [1, 1]} : vector<64x2xf32> to vector<64x1xf32>
    %75 = vector.extract_strided_slice %72 {offsets = [0, 1], sizes = [64, 1], strides = [1, 1]} : vector<64x2xf32> to vector<64x1xf32>
    %76 = tpu.transpose %75, [1, 0] : vector<64x1xf32> -> vector<1x64xf32>
    %77 = vector.broadcast %74 : vector<64x1xf32> to vector<64x64xf32>
    %78 = vector.broadcast %76 : vector<1x64xf32> to vector<64x64xf32>
    %79 = arith.addf %77, %78 : vector<64x64xf32>
    %80 = arith.mulf %2, %79 : vector<64x64xf32>
    %81 = arith.negf %80 : vector<64x64xf32>
    %82 = math.exp %81 : vector<64x64xf32>
    %cst_44 = arith.constant 1.000000e+00 : f32
    %83 = vector.broadcast %cst_44 : f32 to vector<64x64xf32>
    %84 = arith.addf %83, %82 : vector<64x64xf32>
    %85 = arith.divf %83, %84 : vector<64x64xf32>
    %cst_45 = arith.constant 5.000000e-01 : f32
    %86 = vector.broadcast %cst_45 : f32 to vector<64x64xf32>
    %87 = arith.subf %85, %86 : vector<64x64xf32>
    %cst_46 = arith.constant 1.000000e+00 : f32
    %88 = vector.broadcast %cst_46 : f32 to vector<64x64xf32>
    %89 = arith.mulf %87, %88 : vector<64x64xf32>
    %90 = math.exp %89 : vector<64x64xf32>
    %cst_47 = arith.constant 0.000000e+00 : f32
    %91 = vector.broadcast %cst_47 : f32 to vector<64x64xf32>
    %92 = arith.select %4, %90, %91 : vector<64x64xi1>, vector<64x64xf32>
    %cst_48 = arith.constant dense<0.000000e+00> : vector<64xf32>
    %93 = vector.multi_reduction <add>, %92, %cst_48 [1] : vector<64x64xf32> to vector<64xf32>
    %94 = vector.shape_cast %93 : vector<64xf32> to vector<64x1xf32>
    %cst_49 = arith.constant 0.000000e+00 : f32
    %95 = vector.broadcast %cst_49 : f32 to vector<64x1xf32>
    %96 = arith.cmpf ogt, %94, %95 : vector<64x1xf32>
    %97 = tpu.reciprocal %94 {approx = true} : vector<64x1xf32> -> vector<64x1xf32>
    %98 = vector.broadcast %97 : vector<64x1xf32> to vector<64x64xf32>
    %99 = arith.mulf %92, %98 : vector<64x64xf32>
    %cst_50 = arith.constant 0.000000e+00 : f32
    %100 = vector.shape_cast %96 : vector<64x1xi1> to vector<64x1xi1>
    %101 = vector.broadcast %100 : vector<64x1xi1> to vector<64x64xi1>
    %102 = vector.broadcast %cst_50 : f32 to vector<64x64xf32>
    %103 = arith.select %101, %99, %102 : vector<64x64xi1>, vector<64x64xf32>
    %cst_51 = arith.constant dense<0.000000e+00> : vector<64x8xf32>
    %104 = tpu.matmul %103, %68, %cst_51 {dimension_numbers = #tpu.dot_dimension_numbers<[1], [0], [0], [1], [0, 0, 1, 1], [], []>} : vector<64x64xf32>, vector<64x8xf32>, vector<64x8xf32> -> vector<64x8xf32>
    %cst_52 = arith.constant 0.000000e+00 : f32
    %105 = vector.broadcast %cst_52 : f32 to vector<64x8xf32>
    %106 = arith.cmpf ogt, %104, %105 : vector<64x8xf32>
    %cst_53 = arith.constant 0.000000e+00 : f32
    %107 = vector.broadcast %cst_53 : f32 to vector<64x8xf32>
    %108 = arith.minimumf %104, %107 : vector<64x8xf32>
    %109 = math.exp %108 : vector<64x8xf32>
    %cst_54 = arith.constant 1.000000e+00 : f32
    %110 = vector.broadcast %cst_54 : f32 to vector<64x8xf32>
    %111 = arith.subf %109, %110 : vector<64x8xf32>
    %112 = arith.select %106, %104, %111 : vector<64x8xi1>, vector<64x8xf32>
    %c8 = arith.constant 8 : index
    %c0_55 = arith.constant 0 : index
    %113 = vector.load %arg7[%c8, %c0_55] : memref<16x32xf32, #tpu.memory_space<vmem>>, vector<8x32xf32>
    %cst_56 = arith.constant dense<0.000000e+00> : vector<64x32xf32>
    %114 = tpu.matmul %112, %113, %cst_56 {dimension_numbers = #tpu.dot_dimension_numbers<[1], [0], [0], [1], [0, 0, 1, 1], [], []>} : vector<64x8xf32>, vector<8x32xf32>, vector<64x32xf32> -> vector<64x32xf32>
    %115 = arith.addf %59, %114 : vector<64x32xf32>
    %c0_57 = arith.constant 0 : index
    %c0_58 = arith.constant 0 : index
    %116 = vector.load %arg8[%c0_57, %c0_58] : memref<1x32xf32, #tpu.memory_space<vmem>>, vector<1x32xf32>
    %117 = vector.broadcast %116 : vector<1x32xf32> to vector<64x32xf32>
    %118 = arith.addf %115, %117 : vector<64x32xf32>
    %c0_59 = arith.constant 0 : index
    %c0_60 = arith.constant 0 : index
    %119 = vector.load %arg9[%c0_59, %c0_60] : memref<64x32xf32, #tpu.memory_space<vmem>>, vector<64x32xf32>
    tpu.vector_store %arg9[%c0_59, %c0_60], %118 {strides = array<i32>} : memref<64x32xf32, #tpu.memory_space<vmem>>, vector<64x32xf32>,
    return
  }
  func.func @transform_0(%arg0: i32) -> (i32, i32) {
    %c0_i32 = arith.constant 0 : i32
    %c0_i32_0 = arith.constant 0 : i32
    %c0_i32_1 = arith.constant 0 : i32
    return %c0_i32, %c0_i32_0 : i32, i32
  }
  func.func @transform_1(%arg0: i32) -> (i32, i32) {
    %c0_i32 = arith.constant 0 : i32
    %c0_i32_0 = arith.constant 0 : i32
    return %arg0, %c0_i32 : i32, i32
  }
  func.func @transform_2(%arg0: i32) -> (i32, i32) {
    %c0_i32 = arith.constant 0 : i32
    %c0_i32_0 = arith.constant 0 : i32
    return %arg0, %c0_i32 : i32, i32
  }
  func.func @transform_3(%arg0: i32) -> (i32, i32, i32) {
    %c0_i32 = arith.constant 0 : i32
    %c0_i32_0 = arith.constant 0 : i32
    %c0_i32_1 = arith.constant 0 : i32
    %c0_i32_2 = arith.constant 0 : i32
    return %c0_i32, %c0_i32_0, %c0_i32_1 : i32, i32, i32
  }
  func.func @transform_4(%arg0: i32) -> (i32, i32, i32) {
    %c0_i32 = arith.constant 0 : i32
    %c0_i32_0 = arith.constant 0 : i32
    %c0_i32_1 = arith.constant 0 : i32
    %c0_i32_2 = arith.constant 0 : i32
    return %c0_i32, %c0_i32_0, %c0_i32_1 : i32, i32, i32
  }
  func.func @transform_5(%arg0: i32) -> (i32, i32, i32) {
    %c0_i32 = arith.constant 0 : i32
    %c0_i32_0 = arith.constant 0 : i32
    %c0_i32_1 = arith.constant 0 : i32
    %c0_i32_2 = arith.constant 0 : i32
    return %c0_i32, %c0_i32_0, %c0_i32_1 : i32, i32, i32
  }
  func.func @transform_6(%arg0: i32) -> (i32, i32) {
    %c0_i32 = arith.constant 0 : i32
    %c0_i32_0 = arith.constant 0 : i32
    %c0_i32_1 = arith.constant 0 : i32
    return %c0_i32, %c0_i32_0 : i32, i32
  }
  func.func @transform_7(%arg0: i32) -> (i32, i32) {
    %c0_i32 = arith.constant 0 : i32
    %c0_i32_0 = arith.constant 0 : i32
    %c0_i32_1 = arith.constant 0 : i32
    return %c0_i32, %c0_i32_0 : i32, i32
  }
  func.func @transform_8(%arg0: i32) -> (i32, i32) {
    %c0_i32 = arith.constant 0 : i32
    %c0_i32_0 = arith.constant 0 : i32
    return %arg0, %c0_i32 : i32, i32
  }
}

</mosaic_0001>

<bundles_post_ra>
// kernel: deconvnet1_forward.3
= control target key start
LH: loop header
LB: loop body
LE: loop exit
PB: predicated region body
PF: predicated region fallthrough
CT: control target
= control target key end

     0   :  { %vm71_vm0 = vcmask 130048   ;;  %vm330_vm1 = vcmask 64512   ;;  %v2911_v52 = vmov 0   ;;  %vm793_vm3 = vcmask 523264   ;;  %s3494_s3 = inlined_call_operand.vmem [shape: f32[2,16,8], index: 3, kind: input, shape index: {}]   ;;  %s3495_s0 = inlined_call_operand.vmem [shape: f32[64,16], index: 0, kind: input, shape index: {}, may-alias: {0,1}]   ;;  %s3496_s1 = inlined_call_operand.vmem [shape: f32[64,16], index: 1, kind: input, shape index: {}, may-alias: {0,1}]   ;;  %s3497_s5 = inlined_call_operand.vmem [shape: f32[2,8,2], index: 5, kind: input, shape index: {}]   ;;  %s3498_s4 = inlined_call_operand.vmem [shape: f32[2,1,8], index: 4, kind: input, shape index: {}]   ;;  %s3499_s2 = inlined_call_operand.vmem [shape: f32[64,64], index: 2, kind: input, shape index: {}]   ;;  %s3500_s6 = inlined_call_operand.vmem [shape: f32[16,32], index: 6, kind: input, shape index: {}]   ;;  %s3501_s7 = inlined_call_operand.vmem [shape: f32[1,32], index: 7, kind: input, shape index: {}]   ;;  %s3502_s8 = inlined_call_operand.vmem [shape: f32[64,32], index: 8, kind: output, shape index: {}]  }
   0x1   :  { %v62_v0 = vld [vmem:[%s3494_s3 + $0x8] sm:$0xff]  ;;  %v61_v1 = vld [vmem:[%s3494_s3] sm:$0xff]  ;;  %v2979_v4 = vld [vmem:[%s3495_s0 + $0x10] sm:$0xff]  ;;  %2750 = vset.pattern.permute.xlu1 %v2911_v52  ;;  %2749 = vset.pattern.permute.xlu0 %v2911_v52 }
   0x2   :  { %v2967_v2 = vld [vmem:[%s3495_s0] sm:$0xff]  ;;  %2542 = vmatprep.subr.mxu0 %v62_v0  ;;  %v2974_v3 = vld [vmem:[%s3495_s0 + $0x8] sm:$0xff]  ;;  %2558 = vmatprep.subr.mxu1 %v62_v0  ;;  %v2996_v7 = vld [vmem:[%s3496_s1 + $0x10] sm:$0xff] }
   0x3   :  { %2546 = vmatprep.mubr.msk.f32.mxu0 %vm71_vm0, %v2967_v2  ;;  %2543 = vmatpush3.msra.mxu0 %v62_v0  ;;  %v2984_v5 = vld [vmem:[%s3496_s1] sm:$0xff]  ;;  %v2989_v6 = vld [vmem:[%s3496_s1 + $0x8] sm:$0xff]  ;;  %v3003_v8 = vld [vmem:[%s3495_s0 + $0x18] sm:$0xff] }
   0x4   :  { %2544 = vmatprep.subr.mxu0 %v61_v1  ;;  %2559 = vmatpush3.msra.mxu1 %v62_v0  ;;  %v64_v9 = vld [vmem:[%s3497_s5] sm:$0xff]  ;;  %v3022_v11 = vld [vmem:[%s3496_s1 + $0x18] sm:$0xff]  ;;  %v3036_v13 = vld [vmem:[%s3495_s0 + $0x28] sm:$0xff] }
   0x5   :  { %2545 = vmatpush3.msra.mxu0 %v61_v1  ;;  %2560 = vmatprep.subr.mxu1 %v61_v1  ;;  %v3013_v10 = vld [vmem:[%s3495_s0 + $0x20] sm:$0xff]  ;;  %v3041_v14 = vld [vmem:[%s3495_s0 + $0x30] sm:$0xff]  ;;  %v3050_v15 = vld [vmem:[%s3496_s1 + $0x28] sm:$0xff] }
   0x6   :  { %2547 = vmatmul.mubr.msk.f32.vlgmr.msra.gmra.mxu0 %vm71_vm0, %v2974_v3  ;;  %2561 = vmatpush3.msra.mxu1 %v61_v1  ;;  %v3029_v12 = vld [vmem:[%s3496_s1 + $0x20] sm:$0xff]  ;;  %v3057_v16 = vld [vmem:[%s3496_s1 + $0x30] sm:$0xff]  ;;  %v3064_v17 = vld [vmem:[%s3495_s0 + $0x38] sm:$0xff] }
   0x7   :  { %2549 = vmatprep.mubr.msk.f32.mxu0 %vm71_vm0, %v2979_v4  ;;  %2562 = vmatprep.mubr.msk.f32.mxu1 %vm71_vm0, %v2984_v5  ;;  %v3073_v18 = vld [vmem:[%s3496_s1 + $0x38] sm:$0xff]  ;;  %v2265_v20 = vld [vmem:[%s3498_s4] ss:$0 sm:$0xff]  ;;  %s2912_s1 = smov 127  }
   0x8   :  { %2563 = vmatmul.mubr.msk.f32.vlgmr.msra.gmra.mxu1 %vm71_vm0, %v2989_v6  ;;  %2574 = vmatprep.subr.mxu0 %v64_v9 }
   0x9   :  { %2565 = vmatprep.mubr.msk.f32.mxu1 %vm71_vm0, %v2996_v7  ;;  %2575 = vmatpush3.msra.mxu0 %v64_v9 }
   0xa   :  { %2550 = vmatmul.mubr.msk.f32.gmra.mxu0 %vm71_vm0, %v3003_v8  ;;  %2588 = vmatprep.subr.mxu1 %v64_v9 }
   0xb   :  { %2552 = vmatprep.mubr.msk.f32.mxu0 %vm71_vm0, %v3013_v10  ;;  %2589 = vmatpush3.msra.mxu1 %v64_v9 }
   0xc   :  { %2566 = vmatmul.mubr.msk.f32.gmra.mxu1 %vm71_vm0, %v3022_v11 }
   0xd   :  { %2568 = vmatprep.mubr.msk.f32.mxu1 %vm71_vm0, %v3029_v12 }
   0xe   :  { %2553 = vmatmul.mubr.msk.f32.gmra.mxu0 %vm71_vm0, %v3036_v13 }
   0xf   :  { %2555 = vmatprep.mubr.msk.f32.mxu0 %vm71_vm0, %v3041_v14 }
  0x10   :  { %2569 = vmatmul.mubr.msk.f32.gmra.mxu1 %vm71_vm0, %v3050_v15 }
  0x11   :  { %2571 = vmatprep.mubr.msk.f32.mxu1 %vm71_vm0, %v3057_v16 }
  0x12   :  { %2556 = vmatmul.mubr.msk.f32.gmra.mxu0 %vm71_vm0, %v3064_v17 }
  0x14   :  { %2572 = vmatmul.mubr.msk.f32.gmra.mxu1 %vm71_vm0, %v3073_v18 }
  0xc6   :  { %v2548_v19 = vpop.f32.mrf.mxu0 }
  0xc7   :  { %v168_v24 = vadd.f32 %v2548_v19, %v2265_v20 }
  0xc8   :  { %v162_v21 = vpop.f32.mrf.mxu0  ;;  %v2564_v22 = vpop.f32.mrf.mxu1 }
  0xc9   :  { %v163_v23 = vadd.f32 %v2265_v20, %v162_v21  ;;  %v297_v26 = vadd.f32 %v2564_v22, %v2265_v20 }
  0xca   :  { %v2551_v25 = vpop.f32.mrf.mxu0  ;;  %v291_v27 = vpop.f32.mrf.mxu1 }
  0xcb   :  { %2576 = vmatprep.mubr.msk.f32.mxu0 %vm330_vm1, %v163_v23  ;;  %v292_v28 = vadd.f32 %v2265_v20, %v291_v27  ;;  %v178_v29 = vadd.f32 %v2551_v25, %v2265_v20 }
  0xcc   :  { %v172_v30 = vpop.f32.mrf.mxu0  ;;  %2577 = vmatmul.mubr.msk.f32.vlgmr.msra.gmra.mxu0 %vm330_vm1, %v168_v24  ;;  %v2567_v31 = vpop.f32.mrf.mxu1 }
  0xcd   :  { %v173_v32 = vadd.f32 %v2265_v20, %v172_v30  ;;  %2590 = vmatprep.mubr.msk.f32.mxu1 %vm330_vm1, %v292_v28  ;;  %v307_v34 = vadd.f32 %v2567_v31, %v2265_v20  ;;  %v3111_v28 = vld [vmem:[%s3494_s3 + $0x18] sm:$0xff]  ;;  %v693_v31 = vlaneseq }
  0xce   :  { %v2554_v33 = vpop.f32.mrf.mxu0  ;;  %v301_v35 = vpop.f32.mrf.mxu1  ;;  %2591 = vmatmul.mubr.msk.f32.vlgmr.msra.gmra.mxu1 %vm330_vm1, %v297_v26  ;;  %2630 = vmatprep.subr.mxu1 %v3111_v28 }
  0xcf   :  { %2579 = vmatprep.mubr.msk.f32.mxu0 %vm330_vm1, %v173_v32  ;;  %v302_v36 = vadd.f32 %v2265_v20, %v301_v35  ;;  %v188_v37 = vadd.f32 %v2554_v33, %v2265_v20  ;;  %2631 = vmatpush3.msra.mxu1 %v3111_v28  ;;  %v3137_v33 = vshrl.u32 %v693_v31, 7 }
  0xd0   :  { %v182_v38 = vpop.f32.mrf.mxu0  ;;  %2580 = vmatmul.mubr.msk.f32.gmra.mxu0 %vm330_vm1, %v178_v29  ;;  %v2570_v39 = vpop.f32.mrf.mxu1 }
  0xd1   :  { %v183_v40 = vadd.f32 %v2265_v20, %v182_v38  ;;  %2593 = vmatprep.mubr.msk.f32.mxu1 %vm330_vm1, %v302_v36  ;;  %v317_v42 = vadd.f32 %v2570_v39, %v2265_v20  ;;  %v3155_v36 = vld [vmem:[%s3499_s2 + $0x10] sm:$0xff] }
  0xd2   :  { %v2557_v41 = vpop.f32.mrf.mxu0  ;;  %v311_v43 = vpop.f32.mrf.mxu1  ;;  %2594 = vmatmul.mubr.msk.f32.gmra.mxu1 %vm330_vm1, %v307_v34  ;;  %vm55_vm5 = vcmp.ne.f32.partialorder %v3155_v36, 0.0 }
  0xd3   :  { %v198_v44 = vadd.f32 %v2557_v41, %v2265_v20  ;;  %2582 = vmatprep.mubr.msk.f32.mxu0 %vm330_vm1, %v183_v40  ;;  %v312_v45 = vadd.f32 %v2265_v20, %v311_v43  ;;  %v3165_v43 = vld [vmem:[%s3499_s2 + $0x20] sm:$0xff] }
  0xd4   :  { %v192_v46 = vpop.f32.mrf.mxu0  ;;  %2583 = vmatmul.mubr.msk.f32.gmra.mxu0 %vm330_vm1, %v188_v37  ;;  %v2573_v47 = vpop.f32.mrf.mxu1  ;;  %vm57_vm7 = vcmp.ne.f32.partialorder %v3165_v43, 0.0 }
  0xd5   :  { %v193_v48 = vadd.f32 %v2265_v20, %v192_v46  ;;  %2602 = vmatprep.subr.mxu0 %v198_v44  ;;  %2596 = vmatprep.mubr.msk.f32.mxu1 %vm330_vm1, %v312_v45  ;;  %v327_v50 = vadd.f32 %v2573_v47, %v2265_v20  ;;  %v3170_v45 = vld [vmem:[%s3499_s2 + $0x28] sm:$0xff] }
  0xd6   :  { %2603 = vmatpush3.msra.mxu0 %v198_v44  ;;  %v321_v49 = vpop.f32.mrf.mxu1  ;;  %2597 = vmatmul.mubr.msk.f32.gmra.mxu1 %vm330_vm1, %v317_v42  ;;  %vm58_vm8 = vcmp.ne.f32.partialorder %v3170_v45, 0.0 }
  0xd7   :  { %2604 = vmatprep.subr.mxu0 %v193_v48  ;;  %2585 = vmatprep.mubr.msk.f32.mxu0 %vm330_vm1, %v193_v48  ;;  %v322_v51 = vadd.f32 %v2265_v20, %v321_v49 }
  0xd8   :  { %2605 = vmatpush3.msra.mxu0 %v193_v48 }
  0xd9   :  { %2606 = vmatprep.subr.mxu0 %v188_v37  ;;  %2586 = vmatmul.mubr.msk.f32.gmra.mxu0 %vm330_vm1, %v198_v44 }
  0xda   :  { %2607 = vmatpush3.msra.mxu0 %v188_v37  ;;  %2599 = vmatprep.mubr.msk.f32.mxu1 %vm330_vm1, %v322_v51  ;;  %v3160_v37 = vld [vmem:[%s3499_s2 + $0x18] sm:$0xff] }
  0xdb   :  { %2608 = vmatprep.subr.mxu0 %v183_v40  ;;  %2600 = vmatmul.mubr.msk.f32.gmra.mxu1 %vm330_vm1, %v327_v50  ;;  %vm56_vm6 = vcmp.ne.f32.partialorder %v3160_v37, 0.0 }
  0xdc   :  { %2609 = vmatpush3.msra.mxu0 %v183_v40  ;;  %2634 = vmatprep.mubr.msk.f32.mxu1 %vm71_vm0, %v2967_v2 }
  0xdd   :  { %2610 = vmatprep.subr.mxu0 %v178_v29 }
  0xde   :  { %2611 = vmatpush3.msra.mxu0 %v178_v29  ;;  %v3116_v29 = vld [vmem:[%s3494_s3 + $0x10] sm:$0xff] }
  0xdf   :  { %2612 = vmatprep.subr.mxu0 %v173_v32  ;;  %2632 = vmatprep.subr.mxu1 %v3116_v29 }
  0xe0   :  { %2613 = vmatpush3.msra.mxu0 %v173_v32  ;;  %2633 = vmatpush3.msra.mxu1 %v3116_v29 }
  0xe1   :  { %2614 = vmatprep.subr.mxu0 %v168_v24  ;;  %2635 = vmatmul.mubr.msk.f32.vlgmr.msra.gmra.mxu1 %vm71_vm0, %v2974_v3 }
  0xe2   :  { %2615 = vmatpush3.msra.mxu0 %v168_v24  ;;  %2637 = vmatprep.mubr.msk.f32.mxu1 %vm71_vm0, %v2979_v4 }
  0xe3   :  { %2616 = vmatprep.subr.mxu0 %v163_v23 }
  0xe4   :  { %2617 = vmatpush3.msra.mxu0 %v163_v23 }
  0xe5   :  { %2646 = vmatprep.subr.mxu0 %v3111_v28  ;;  %2638 = vmatmul.mubr.msk.f32.gmra.mxu1 %vm71_vm0, %v3003_v8 }
  0xe6   :  { %2640 = vmatprep.mubr.msk.f32.mxu1 %vm71_vm0, %v3013_v10  ;;  %v695_v10 = vsub.s32 0, %v3137_v33 }
  0xe9   :  { %2641 = vmatmul.mubr.msk.f32.gmra.mxu1 %vm71_vm0, %v3036_v13 }
  0xea   :  { %2643 = vmatprep.mubr.msk.f32.mxu1 %vm71_vm0, %v3041_v14  ;;  %v3145_v14 = vld [vmem:[%s3499_s2] sm:$0xff] }
  0xeb   :  { %vm53_vm2 = vcmp.ne.f32.partialorder %v3145_v14, 0.0 }
  0xed   :  { %2644 = vmatmul.mubr.msk.f32.gmra.mxu1 %vm71_vm0, %v3064_v17  ;;  %v3150_v17 = vld [vmem:[%s3499_s2 + $0x8] sm:$0xff] }
  0xee   :  { %vm54_vm4 = vcmp.ne.f32.partialorder %v3150_v17, 0.0 }
 0x18c   :  { %v2578_v53 = vpop.f32.mrf.mxu0 }
 0x18e   :  { %v421_v54 = vpop.f32.mrf.mxu0  ;;  %v2592_v55 = vpop.f32.mrf.mxu1 }
 0x18f   :  { %597 = vrot.lane.b32.xlu0 %v421_v54, %s2912_s1 }
 0x190   :  { %v2581_v56 = vpop.f32.mrf.mxu0  ;;  %v550_v58 = vpop.f32.mrf.mxu1 }
 0x191   :  { %603 = vrot.lane.b32.xlu1 %v2581_v56, %s2912_s1 }
 0x192   :  { %v431_v57 = vpop.f32.mrf.mxu0  ;;  %v2595_v61 = vpop.f32.mrf.mxu1 }
 0x193   :  { %599 = vrot.lane.b32.xlu0 %v2578_v53, %s2912_s1 }
 0x194   :  { %v2584_v59 = vpop.f32.mrf.mxu0  ;;  %v560_v63 = vpop.f32.mrf.mxu1 }
 0x195   :  { %601 = vrot.lane.b32.xlu1 %v431_v57, %s2912_s1 }
 0x196   :  { %v441_v60 = vpop.f32.mrf.mxu0  ;;  %v2598_v1 = vpop.f32.mrf.mxu1 }
 0x197   :  { %605 = vrot.lane.b32.xlu0 %v441_v60, %s2912_s1 }
 0x198   :  { %v570_v2 = vpop.f32.mrf.mxu1 }
 0x199   :  { %607 = vrot.lane.b32.xlu1 %v2584_v59, %s2912_s1  ;;  %v2587_v62 = vpop.f32.mrf.mxu0 }
 0x19b   :  { %v451_v0 = vpop.f32.mrf.mxu0  ;;  %v2601_v9 = vpop.f32.mrf.mxu1 }
 0x19c   :  { %609 = vrot.lane.b32.xlu0 %v451_v0, %s2912_s1  ;;  %v3187_v0 = vld [vmem:[%s3499_s2 + $0x38] sm:$0xff] }
 0x19d   :  { %611 = vrot.lane.b32.xlu1 %v2587_v62, %s2912_s1  ;;  %v580_v19 = vpop.f32.mrf.mxu1  ;;  %vm60_vm10 = vcmp.ne.f32.partialorder %v3187_v0, 0.0 }
 0x1a0   :  { %655 = vperm.xlu0 %2749, %v550_v58   ;;  %v3181_v58 = vld [vmem:[%s3499_s2 + $0x30] sm:$0xff] }
 0x1a1   :  { %660 = vperm.xlu1 %2750, %v2592_v55   ;;  %vm59_vm9 = vcmp.ne.f32.partialorder %v3181_v58, 0.0 }
 0x1a4   :  { %670 = vperm.xlu0 %2749, %v2595_v61  }
 0x1a5   :  { %665 = vperm.xlu1 %2750, %v560_v63  }
 0x1a8   :  { %680 = vperm.xlu0 %2749, %v2598_v1  }
 0x1a9   :  { %675 = vperm.xlu1 %2750, %v570_v2  }
 0x1ac   :  { %690 = vperm.xlu0 %2749, %v2601_v9  }
 0x1ad   :  { %685 = vperm.xlu1 %2750, %v580_v19  }
 0x201   :  { %v598_v20 = vpop.permute.xlu0 %597 }
 0x202   :  { %621 = vxpose.xlu1.b32.start [1/8] (short) (narrow) %v598_v20, 8 }
 0x203   :  { %v604_v21 = vpop.permute.xlu1 %603 }
 0x205   :  { %v600_v22 = vpop.permute.xlu0 %599 }
 0x206   :  { %622 = vxpose.xlu1.b32.cont [2/8] (short) (narrow) %v600_v22, 8 }
 0x207   :  { %v602_v23 = vpop.permute.xlu1 %601 }
 0x209   :  { %v606_v24 = vpop.permute.xlu0 %605 }
 0x20a   :  { %623 = vxpose.xlu1.b32.cont [3/8] (short) (narrow) %v602_v23, 8 }
 0x20b   :  { %v608_v25 = vpop.permute.xlu1 %607 }
 0x20e   :  { %624 = vxpose.xlu1.b32.cont [4/8] (short) (narrow) %v604_v21, 8  ;;  %v610_v26 = vpop.permute.xlu0 %609 }
 0x20f   :  { %v612_v27 = vpop.permute.xlu1 %611 }
 0x212   :  { %625 = vxpose.xlu1.b32.cont [5/8] (short) (narrow) %v606_v24, 8 }
 0x216   :  { %626 = vxpose.xlu1.b32.cont [6/8] (short) (narrow) %v608_v25, 8 }
 0x21a   :  { %627 = vxpose.xlu1.b32.cont [7/8] (short) (narrow) %v610_v26, 8 }
 0x21b   :  { %v656_v4 = vpop.permute.xlu0 %655 }
 0x21c   :  { %v661_v30 = vpop.permute.xlu1 %660 }
 0x21e   :  { %628 = vxpose.xlu1.b32.end [8/8] (short) (narrow) %v612_v27, 8 }
 0x21f   :  { %v671_v34 = vpop.permute.xlu0 %670 }
 0x220   :  { %v666_v3 = vpop.permute.xlu1 %665 }
 0x223   :  { %v681_v38 = vpop.permute.xlu0 %680 }
 0x224   :  { %v676_v32 = vpop.permute.xlu1 %675 }
 0x227   :  { %v691_v59 = vpop.permute.xlu0 %690 }
 0x228   :  { %v686_v8 = vpop.permute.xlu1 %685 }
 0x27e   :  { %v637_v35 = vpop.trf.xlu1 }
 0x27f   :  { %v696_v13 = vrot.slane %v637_v35, %v695_v10 }
 0x281   :  { %v697_v39 = vadd.f32 %v696_v13, %v656_v4  ;;  %v698_v40 = vadd.f32 %v696_v13, %v661_v30  ;;  %v699_v41 = vadd.f32 %v696_v13, %v666_v3  ;;  %v700_v42 = vadd.f32 %v696_v13, %v671_v34 }
 0x282   :  { %v701_v44 = vadd.f32 %v696_v13, %v676_v32  ;;  %v702_v46 = vadd.f32 %v696_v13, %v681_v38  ;;  %v703_v52 = vadd.f32 %v696_v13, %v686_v8  ;;  %v704_v61 = vadd.f32 %v696_v13, %v691_v59 }
 0x283   :  { %v705_v47 = vmul.f32 %v697_v39, %v3145_v14  ;;  %v706_v48 = vmul.f32 %v698_v40, %v3150_v17  ;;  %v707_v49 = vmul.f32 %v699_v41, %v3155_v36  ;;  %v708_v50 = vmul.f32 %v700_v42, %v3160_v37 }
 0x284   :  { %v709_v51 = vmul.f32 %v701_v44, %v3165_v43  ;;  %v710_v56 = vmul.f32 %v702_v46, %v3170_v45  ;;  %v711_v63 = vmul.f32 %v703_v52, %v3181_v58  ;;  %v712_v1 = vmul.f32 %v704_v61, %v3187_v0 }
 0x285   :  { %v2298_v53 = vmul.f32 -1.442695, %v705_v47  ;;  %v2299_v54 = vmul.f32 -1.442695, %v706_v48  ;;  %v2300_v55 = vmul.f32 -1.442695, %v707_v49 }
 0x286   :  { %v2301_v57 = vmul.f32 -1.442695, %v708_v50  ;;  %v2302_v60 = vmul.f32 -1.442695, %v709_v51  ;;  %v2303_v62 = vmul.f32 -1.442695, %v710_v56 }
 0x287   :  { %2751 = vpow2.f32 %v2298_v53  ;;  %v2304_v2 = vmul.f32 -1.442695, %v711_v63  ;;  %v2305_v9 = vmul.f32 -1.442695, %v712_v1 }
 0x288   :  { %2753 = vpow2.f32 %v2299_v54 }
 0x289   :  { %2755 = vpow2.f32 %v2300_v55 }
 0x28a   :  { %2757 = vpow2.f32 %v2301_v57 }
 0x28b   :  { %2759 = vpow2.f32 %v2302_v60 }
 0x28c   :  { %2761 = vpow2.f32 %v2303_v62 }
 0x28d   :  { %2763 = vpow2.f32 %v2304_v2 }
 0x28e   :  { %2765 = vpow2.f32 %v2305_v9 }
 0x294   :  { %v2752_v19 = vpop.eup %2751 }
 0x295   :  { %v2754_v20 = vpop.eup %2753  ;;  %v737_v21 = vadd.f32 1.0, %v2752_v19 }
 0x296   :  { %v2756_v22 = vpop.eup %2755  ;;  %v738_v23 = vadd.f32 1.0, %v2754_v20 }
 0x297   :  { %v2758_v24 = vpop.eup %2757  ;;  %2767 = vrcp.f32 %v737_v21  ;;  %v739_v25 = vadd.f32 1.0, %v2756_v22 }
 0x298   :  { %v2760_v26 = vpop.eup %2759  ;;  %2769 = vrcp.f32 %v738_v23  ;;  %v740_v27 = vadd.f32 1.0, %v2758_v24 }
 0x299   :  { %2771 = vrcp.f32 %v739_v25  ;;  %v741_v30 = vadd.f32 1.0, %v2760_v26  ;;  %v2762_v3 = vpop.eup %2761 }
 0x29a   :  { %2773 = vrcp.f32 %v740_v27  ;;  %v742_v31 = vadd.f32 1.0, %v2762_v3  ;;  %v2764_v32 = vpop.eup %2763 }
 0x29b   :  { %2775 = vrcp.f32 %v741_v30  ;;  %v2766_v4 = vpop.eup %2765  ;;  %v743_v8 = vadd.f32 1.0, %v2764_v32 }
 0x29c   :  { %2777 = vrcp.f32 %v742_v31  ;;  %v744_v35 = vadd.f32 1.0, %v2766_v4 }
 0x29d   :  { %2779 = vrcp.f32 %v743_v8 }
 0x29e   :  { %2781 = vrcp.f32 %v744_v35 }
 0x2a4   :  { %v2768_v34 = vpop.eup %2767 }
 0x2a5   :  { %v2770_v13 = vpop.eup %2769  ;;  %v2306_v38 = vadd.f32 -0.5, %v2768_v34 }
 0x2a6   :  { %v2772_v39 = vpop.eup %2771  ;;  %v2307_v40 = vadd.f32 -0.5, %v2770_v13 }
 0x2a7   :  { %v2774_v41 = vpop.eup %2773  ;;  %v769_v42 = vmul.f32 1.442695, %v2306_v38  ;;  %v2308_v44 = vadd.f32 -0.5, %v2772_v39 }
 0x2a8   :  { %v771_v46 = vmul.f32 1.442695, %v2307_v40  ;;  %v2309_v48 = vadd.f32 -0.5, %v2774_v41  ;;  %v2776_v49 = vpop.eup %2775  ;;  %v3249_v40 = vld [vmem:[%s3497_s5 + $0x8] sm:$0xff]  ;;  %v3256_v41 = vld [vmem:[%s3498_s4 + $0x1] ss:$0 sm:$0xff] }
 0x2a9   :  { %2783 = vpow2.f32 %v769_v42  ;;  %v773_v47 = vmul.f32 1.442695, %v2308_v44  ;;  %v2310_v51 = vadd.f32 -0.5, %v2776_v49  ;;  %v2778_v52 = vpop.eup %2777  ;;  %2662 = vmatprep.subr.mxu1 %v3249_v40  ;;  %v2636_v42 = vpop.f32.mrf.mxu1 }
 0x2aa   :  { %2785 = vpow2.f32 %v771_v46  ;;  %v775_v50 = vmul.f32 1.442695, %v2309_v48  ;;  %v2311_v54 = vadd.f32 -0.5, %v2778_v52  ;;  %v2780_v55 = vpop.eup %2779  ;;  %2663 = vmatpush3.msra.mxu1 %v3249_v40  ;;  %v1129_v44 = vadd.f32 %v2636_v42, %v3256_v41 }
 0x2ab   :  { %2787 = vpow2.f32 %v773_v47  ;;  %v777_v53 = vmul.f32 1.442695, %v2310_v51  ;;  %v2782_v56 = vpop.eup %2781  ;;  %v2312_v59 = vadd.f32 -0.5, %v2780_v55  ;;  %v1123_v46 = vpop.f32.mrf.mxu1 }
 0x2ac   :  { %2789 = vpow2.f32 %v775_v50  ;;  %v779_v57 = vmul.f32 1.442695, %v2311_v54  ;;  %v2313_v9 = vadd.f32 -0.5, %v2782_v56  ;;  %v1124_v47 = vadd.f32 %v3256_v41, %v1123_v46 }
 0x2ad   :  { %2791 = vpow2.f32 %v777_v53  ;;  %v781_v2 = vmul.f32 1.442695, %v2312_v59  ;;  %v2639_v48 = vpop.f32.mrf.mxu1 }
 0x2ae   :  { %2793 = vpow2.f32 %v779_v57  ;;  %v783_v22 = vmul.f32 1.442695, %v2313_v9  ;;  %2664 = vmatprep.mubr.msk.f32.mxu1 %vm330_vm1, %v1124_v47  ;;  %v1139_v51 = vadd.f32 %v2639_v48, %v3256_v41 }
 0x2af   :  { %2795 = vpow2.f32 %v781_v2  ;;  %v1133_v49 = vpop.f32.mrf.mxu1  ;;  %2665 = vmatmul.mubr.msk.f32.vlgmr.msra.gmra.mxu1 %vm330_vm1, %v1129_v44 }
 0x2b0   :  { %2797 = vpow2.f32 %v783_v22  ;;  %v1134_v50 = vadd.f32 %v3256_v41, %v1133_v49 }
 0x2b1   :  { %v2642_v52 = vpop.f32.mrf.mxu1 }
 0x2b2   :  { %2667 = vmatprep.mubr.msk.f32.mxu1 %vm330_vm1, %v1134_v50  ;;  %v1149_v55 = vadd.f32 %v2642_v52, %v3256_v41 }
 0x2b3   :  { %v1143_v53 = vpop.f32.mrf.mxu1  ;;  %2668 = vmatmul.mubr.msk.f32.gmra.mxu1 %vm330_vm1, %v1139_v51 }
 0x2b4   :  { %v1144_v54 = vadd.f32 %v3256_v41, %v1143_v53 }
 0x2b5   :  { %v2645_v56 = vpop.f32.mrf.mxu1 }
 0x2b6   :  { %v2784_v60 = vpop.eup %2783  ;;  %v1159_v57 = vadd.f32 %v2645_v56, %v3256_v41  ;;  %2670 = vmatprep.mubr.msk.f32.mxu1 %vm330_vm1, %v1144_v54 }
 0x2b7   :  { %v2786_v61 = vpop.eup %2785  ;;  %v3194_v62 = vsel %vm53_vm2, %v2784_v60, 0.0  ;;  %v1153_v59 = vpop.f32.mrf.mxu1  ;;  %2671 = vmatmul.mubr.msk.f32.gmra.mxu1 %vm330_vm1, %v1149_v55 }
 0x2b8   :  { %v794_v63 = vsel %vm793_vm3, %v3194_v62, 0.0  ;;  %v3200_v1 = vsel %vm54_vm4, %v2786_v61, 0.0  ;;  %v2788_v19 = vpop.eup %2787  ;;  %v1154_v60 = vadd.f32 %v3256_v41, %v1153_v59  ;;  %2690 = vmatprep.subr.mxu1 %v1159_v57 }
 0x2b9   :  { %795 = vadd.xlane.f32.xlu0 %v794_v63  ;;  %v797_v20 = vsel %vm793_vm3, %v3200_v1, 0.0  ;;  %v3207_v21 = vsel %vm55_vm5, %v2788_v19, 0.0  ;;  %v2790_v23 = vpop.eup %2789  ;;  %2691 = vmatpush3.msra.mxu1 %v1159_v57 }
 0x2ba   :  { %v800_v24 = vsel %vm793_vm3, %v3207_v21, 0.0  ;;  %v3214_v25 = vsel %vm56_vm6, %v2790_v23, 0.0  ;;  %v2792_v26 = vpop.eup %2791  ;;  %2692 = vmatprep.subr.mxu1 %v1154_v60  ;;  %2673 = vmatprep.mubr.msk.f32.mxu1 %vm330_vm1, %v1154_v60 }
 0x2bb   :  { %v803_v27 = vsel %vm793_vm3, %v3214_v25, 0.0  ;;  %v3221_v30 = vsel %vm57_vm7, %v2792_v26, 0.0  ;;  %v2794_v3 = vpop.eup %2793  ;;  %2693 = vmatpush3.msra.mxu1 %v1154_v60 }
 0x2bc   :  { %v806_v31 = vsel %vm793_vm3, %v3221_v30, 0.0  ;;  %v3228_v32 = vsel %vm58_vm8, %v2794_v3, 0.0  ;;  %v2796_v4 = vpop.eup %2795  ;;  %2694 = vmatprep.subr.mxu1 %v1149_v55  ;;  %2674 = vmatmul.mubr.msk.f32.gmra.mxu1 %vm330_vm1, %v1159_v57 }
 0x2bd   :  { %798 = vadd.xlane.f32.xlu0 %v797_v20  ;;  %v809_v8 = vsel %vm793_vm3, %v3228_v32, 0.0  ;;  %v3235_v34 = vsel %vm59_vm9, %v2796_v4, 0.0  ;;  %v2798_v35 = vpop.eup %2797  ;;  %2695 = vmatpush3.msra.mxu1 %v1149_v55 }
 0x2be   :  { %v812_v13 = vsel %vm793_vm3, %v3235_v34, 0.0  ;;  %v3242_v38 = vsel %vm60_vm10, %v2798_v35, 0.0  ;;  %2696 = vmatprep.subr.mxu1 %v1144_v54 }
 0x2bf   :  { %v815_v39 = vsel %vm793_vm3, %v3242_v38, 0.0  ;;  %2697 = vmatpush3.msra.mxu1 %v1144_v54 }
 0x2c0   :  { %2698 = vmatprep.subr.mxu1 %v1139_v51 }
 0x2c1   :  { %801 = vadd.xlane.f32.xlu0 %v800_v24  ;;  %2699 = vmatpush3.msra.mxu1 %v1139_v51 }
 0x2c2   :  { %2700 = vmatprep.subr.mxu1 %v1134_v50 }
 0x2c3   :  { %2701 = vmatpush3.msra.mxu1 %v1134_v50 }
 0x2c4   :  { %2702 = vmatprep.subr.mxu1 %v1129_v44 }
 0x2c5   :  { %804 = vadd.xlane.f32.xlu0 %v803_v27  ;;  %2703 = vmatpush3.msra.mxu1 %v1129_v44 }
 0x2c6   :  { %2704 = vmatprep.subr.mxu1 %v1124_v47 }
 0x2c7   :  { %2705 = vmatpush3.msra.mxu1 %v1124_v47 }
 0x2c9   :  { %807 = vadd.xlane.f32.xlu0 %v806_v31 }
 0x2cd   :  { %810 = vadd.xlane.f32.xlu0 %v809_v8 }
 0x2d1   :  { %813 = vadd.xlane.f32.xlu0 %v812_v13 }
 0x2d5   :  { %816 = vadd.xlane.f32.xlu0 %v815_v39 }
 0x342   :  { %v796_v61 = vpop.xlane.xlu0 %795 }
 0x343   :  { %2799 = vrcp.f32 %v796_v61  ;;  %vm818_vm11 = vcmp.gt.f32.partialorder %v796_v61, 0.0 }
 0x346   :  { %v799_v63 = vpop.xlane.xlu0 %798 }
 0x347   :  { %2801 = vrcp.f32 %v799_v63  ;;  %vm819_vm12 = vcmp.gt.f32.partialorder %v799_v63, 0.0 }
 0x34a   :  { %v802_v2 = vpop.xlane.xlu0 %801 }
 0x34b   :  { %2803 = vrcp.f32 %v802_v2  ;;  %vm820_vm13 = vcmp.gt.f32.partialorder %v802_v2, 0.0 }
 0x34e   :  { %v805_v9 = vpop.xlane.xlu0 %804 }
 0x34f   :  { %2805 = vrcp.f32 %v805_v9  ;;  %vm821_vm14 = vcmp.gt.f32.partialorder %v805_v9, 0.0 }
 0x350   :  { %v2800_v19 = vpop.eup %2799 }
 0x351   :  { %v834_v20 = vmul.f32 %v2800_v19, %v3194_v62 }
 0x352   :  { %v808_v22 = vpop.xlane.xlu0 %807 }
 0x353   :  { %v858_v23 = vsel %vm818_vm11, %v834_v20, 0.0  ;;  %2807 = vrcp.f32 %v808_v22  ;;  %vm822_vm15 = vcmp.gt.f32.partialorder %v808_v22, 0.0 }
 0x354   :  { %v2802_v24 = vpop.eup %2801  ;;  %2618 = vmatprep.mubr.msk.f32.mxu0 %vm793_vm3, %v858_v23 }
 0x355   :  { %v835_v26 = vmul.f32 %v2802_v24, %v3200_v1 }
 0x356   :  { %v811_v27 = vpop.xlane.xlu0 %810 }
 0x357   :  { %v859_v3 = vsel %vm819_vm12, %v835_v26, 0.0  ;;  %2809 = vrcp.f32 %v811_v27  ;;  %vm823_vm11 = vcmp.gt.f32.partialorder %v811_v27, 0.0 }
 0x358   :  { %v2804_v31 = vpop.eup %2803  ;;  %2619 = vmatmul.mubr.msk.f32.vlgmr.msra.gmra.mxu0 %vm793_vm3, %v859_v3 }
 0x359   :  { %v836_v4 = vmul.f32 %v2804_v31, %v3207_v21  ;;  %2647 = vmatpush3.msra.mxu0 %v3111_v28 }
 0x35a   :  { %v814_v62 = vpop.xlane.xlu0 %813  ;;  %2648 = vmatprep.subr.mxu0 %v3116_v29 }
 0x35b   :  { %v860_v8 = vsel %vm820_vm13, %v836_v4, 0.0  ;;  %2811 = vrcp.f32 %v814_v62  ;;  %2649 = vmatpush3.msra.mxu0 %v3116_v29  ;;  %vm824_vm12 = vcmp.gt.f32.partialorder %v814_v62, 0.0 }
 0x35c   :  { %v2806_v1 = vpop.eup %2805  ;;  %2621 = vmatprep.mubr.msk.f32.mxu0 %vm793_vm3, %v860_v8  ;;  %2676 = vmatprep.subr.mxu0 %v3249_v40 }
 0x35d   :  { %v837_v35 = vmul.f32 %v2806_v1, %v3214_v25 }
 0x35e   :  { %v817_v13 = vpop.xlane.xlu0 %816 }
 0x35f   :  { %v861_v21 = vsel %vm821_vm14, %v837_v35, 0.0  ;;  %2813 = vrcp.f32 %v817_v13  ;;  %vm825_vm13 = vcmp.gt.f32.partialorder %v817_v13, 0.0 }
 0x360   :  { %v2808_v28 = vpop.eup %2807  ;;  %2622 = vmatmul.mubr.msk.f32.gmra.mxu0 %vm793_vm3, %v861_v21 }
 0x361   :  { %v838_v39 = vmul.f32 %v2808_v28, %v3221_v30 }
 0x363   :  { %v862_v42 = vsel %vm822_vm15, %v838_v39, 0.0 }
 0x364   :  { %v2810_v44 = vpop.eup %2809  ;;  %2624 = vmatprep.mubr.msk.f32.mxu0 %vm793_vm3, %v862_v42 }
 0x365   :  { %v839_v29 = vmul.f32 %v2810_v44, %v3228_v32 }
 0x367   :  { %v863_v46 = vsel %vm823_vm11, %v839_v29, 0.0 }
 0x368   :  { %v2812_v47 = vpop.eup %2811  ;;  %2625 = vmatmul.mubr.msk.f32.gmra.mxu0 %vm793_vm3, %v863_v46 }
 0x369   :  { %v840_v25 = vmul.f32 %v2812_v47, %v3235_v34 }
 0x36b   :  { %v864_v48 = vsel %vm824_vm12, %v840_v25, 0.0 }
 0x36c   :  { %v2814_v49 = vpop.eup %2813  ;;  %2627 = vmatprep.mubr.msk.f32.mxu0 %vm793_vm3, %v864_v48 }
 0x36d   :  { %v841_v30 = vmul.f32 %v2814_v49, %v3242_v38 }
 0x36f   :  { %v865_v50 = vsel %vm825_vm13, %v841_v30, 0.0 }
 0x370   :  { %2628 = vmatmul.mubr.msk.f32.gmra.mxu0 %vm793_vm3, %v865_v50 }
 0x371   :  { %2650 = vmatprep.mubr.msk.f32.mxu0 %vm71_vm0, %v2984_v5  ;;  %v2666_v5 = vpop.f32.mrf.mxu1 }
 0x372   :  { %1535 = vrot.lane.b32.xlu1 %v2666_v5, %s2912_s1 }
 0x374   :  { %2651 = vmatmul.mubr.msk.f32.vlgmr.msra.gmra.mxu0 %vm71_vm0, %v2989_v6  ;;  %v1357_v6 = vpop.f32.mrf.mxu1 }
 0x375   :  { %2653 = vmatprep.mubr.msk.f32.mxu0 %vm71_vm0, %v2996_v7  ;;  %2677 = vmatpush3.msra.mxu0 %v3249_v40 }
 0x376   :  { %1533 = vrot.lane.b32.xlu0 %v1357_v6, %s2912_s1  ;;  %v2669_v7 = vpop.f32.mrf.mxu1 }
 0x378   :  { %2654 = vmatmul.mubr.msk.f32.gmra.mxu0 %vm71_vm0, %v3022_v11  ;;  %v1367_v11 = vpop.f32.mrf.mxu1 }
 0x379   :  { %2656 = vmatprep.mubr.msk.f32.mxu0 %vm71_vm0, %v3029_v12 }
 0x37a   :  { %1537 = vrot.lane.b32.xlu0 %v1367_v11, %s2912_s1  ;;  %v2672_v12 = vpop.f32.mrf.mxu1 }
 0x37c   :  { %2657 = vmatmul.mubr.msk.f32.gmra.mxu0 %vm71_vm0, %v3050_v15  ;;  %v1377_v15 = vpop.f32.mrf.mxu1 }
 0x37d   :  { %2659 = vmatprep.mubr.msk.f32.mxu0 %vm71_vm0, %v3057_v16 }
 0x37e   :  { %1539 = vrot.lane.b32.xlu0 %v2669_v7, %s2912_s1  ;;  %v2675_v32 = vpop.f32.mrf.mxu1 }
 0x380   :  { %2660 = vmatmul.mubr.msk.f32.gmra.mxu0 %vm71_vm0, %v3073_v18  ;;  %v1387_v16 = vpop.f32.mrf.mxu1 }
 0x381   :  { %1545 = vrot.lane.b32.xlu1 %v1387_v16, %s2912_s1 }
 0x382   :  { %1541 = vrot.lane.b32.xlu0 %v1377_v15, %s2912_s1 }
 0x386   :  { %1543 = vrot.lane.b32.xlu0 %v2672_v12, %s2912_s1 }
 0x38a   :  { %1547 = vrot.lane.b32.xlu0 %v2675_v32, %s2912_s1 }
 0x3e4   :  { %v1536_v28 = vpop.permute.xlu1 %1535 }
 0x3f3   :  { %v1546_v29 = vpop.permute.xlu1 %1545 }
 0x418   :  { %v3319_v18 = vpop.f32.mrf.mxu0 }
 0x419   :  { %vm996_vm14 = vcmp.gt.f32.partialorder %v3319_v18, 0.0 }
 0x41a   :  { %v3321_v34 = vpop.f32.mrf.mxu0 }
 0x420   :  { %v3323_v38 = vpop.f32.mrf.mxu0 }
 0x422   :  { %v3325_v40 = vpop.f32.mrf.mxu0 }
 0x423   :  { %vm997_vm15 = vcmp.gt.f32.partialorder %v3325_v40, 0.0 }
 0x428   :  { %v3327_v51 = vpop.f32.mrf.mxu0 }
 0x429   :  { %vm1000_vm12 = vcmp.gt.f32.partialorder %v3327_v51, 0.0 }
 0x42a   :  { %v3329_v52 = vpop.f32.mrf.mxu0 }
 0x42b   :  { %vm999_vm11 = vcmp.gt.f32.partialorder %v3329_v52, 0.0 }
 0x430   :  { %v3331_v53 = vpop.f32.mrf.mxu0 }
 0x432   :  { %v3333_v54 = vpop.f32.mrf.mxu0 }
 0x433   :  { %vm1001_vm13 = vcmp.gt.f32.partialorder %v3333_v54, 0.0 }
 0x434   :  { %v2652_v55 = vpop.f32.mrf.mxu0 }
 0x435   :  { %v1234_v59 = vadd.f32 %v2652_v55, %v3256_v41 }
 0x436   :  { %v1228_v56 = vpop.f32.mrf.mxu0 }
 0x437   :  { %v1229_v57 = vadd.f32 %v3256_v41, %v1228_v56 }
 0x438   :  { %v2655_v60 = vpop.f32.mrf.mxu0 }
 0x439   :  { %2678 = vmatprep.mubr.msk.f32.mxu0 %vm330_vm1, %v1229_v57  ;;  %v1244_v2 = vadd.f32 %v2655_v60, %v3256_v41 }
 0x43a   :  { %v1238_v61 = vpop.f32.mrf.mxu0  ;;  %2679 = vmatmul.mubr.msk.f32.vlgmr.msra.gmra.mxu0 %vm330_vm1, %v1234_v59 }
 0x43b   :  { %v1239_v63 = vadd.f32 %v3256_v41, %v1238_v61 }
 0x43c   :  { %v2658_v9 = vpop.f32.mrf.mxu0 }
 0x43d   :  { %2681 = vmatprep.mubr.msk.f32.mxu0 %vm330_vm1, %v1239_v63  ;;  %v1254_v22 = vadd.f32 %v2658_v9, %v3256_v41 }
 0x43e   :  { %v1248_v19 = vpop.f32.mrf.mxu0  ;;  %2682 = vmatmul.mubr.msk.f32.gmra.mxu0 %vm330_vm1, %v1244_v2 }
 0x43f   :  { %v1249_v20 = vadd.f32 %v3256_v41, %v1248_v19 }
 0x440   :  { %v2661_v23 = vpop.f32.mrf.mxu0 }
 0x441   :  { %2684 = vmatprep.mubr.msk.f32.mxu0 %vm330_vm1, %v1249_v20  ;;  %v1264_v27 = vadd.f32 %v2661_v23, %v3256_v41 }
 0x442   :  { %v1258_v24 = vpop.f32.mrf.mxu0  ;;  %2685 = vmatmul.mubr.msk.f32.gmra.mxu0 %vm330_vm1, %v1254_v22 }
 0x443   :  { %v1259_v26 = vadd.f32 %v3256_v41, %v1258_v24  ;;  %v1534_v41 = vpop.permute.xlu0 %1533 }
 0x445   :  { %2687 = vmatprep.mubr.msk.f32.mxu0 %vm330_vm1, %v1259_v26 }
 0x446   :  { %2688 = vmatmul.mubr.msk.f32.gmra.mxu0 %vm330_vm1, %v1264_v27 }
 0x447   :  { %v1538_v21 = vpop.permute.xlu0 %1537 }
 0x44b   :  { %v1540_v39 = vpop.permute.xlu0 %1539 }
 0x44f   :  { %v1542_v42 = vpop.permute.xlu0 %1541 }
 0x453   :  { %v1544_v44 = vpop.permute.xlu0 %1543 }
 0x457   :  { %v1548_v46 = vpop.permute.xlu0 %1547 }
 0x4fa   :  { %v2680_v3 = vpop.f32.mrf.mxu0 }
 0x4fb   :  { %1596 = vperm.xlu0 %2749, %v2680_v3  }
 0x4fc   :  { %v1486_v31 = vpop.f32.mrf.mxu0 }
 0x4fd   :  { %1591 = vperm.xlu1 %2750, %v1486_v31  }
 0x4fe   :  { %v2683_v4 = vpop.f32.mrf.mxu0 }
 0x4ff   :  { %1606 = vperm.xlu0 %2749, %v2683_v4  }
 0x500   :  { %v1496_v62 = vpop.f32.mrf.mxu0 }
 0x501   :  { %1601 = vperm.xlu1 %2750, %v1496_v62  }
 0x502   :  { %v2686_v8 = vpop.f32.mrf.mxu0 }
 0x503   :  { %1616 = vperm.xlu0 %2749, %v2686_v8  }
 0x504   :  { %v1506_v1 = vpop.f32.mrf.mxu0 }
 0x505   :  { %1611 = vperm.xlu1 %2750, %v1506_v1  }
 0x506   :  { %v2689_v35 = vpop.f32.mrf.mxu0 }
 0x507   :  { %1626 = vperm.xlu0 %2749, %v2689_v35  }
 0x508   :  { %v1516_v13 = vpop.f32.mrf.mxu0 }
 0x509   :  { %1621 = vperm.xlu1 %2750, %v1516_v13  }
 0x532   :  { %1557 = vxpose.xlu1.b32.start [1/8] (short) (narrow) %v1534_v41, 8 }
 0x536   :  { %1558 = vxpose.xlu1.b32.cont [2/8] (short) (narrow) %v1536_v28, 8 }
 0x53a   :  { %1559 = vxpose.xlu1.b32.cont [3/8] (short) (narrow) %v1538_v21, 8 }
 0x53e   :  { %1560 = vxpose.xlu1.b32.cont [4/8] (short) (narrow) %v1540_v39, 8 }
 0x542   :  { %1561 = vxpose.xlu1.b32.cont [5/8] (short) (narrow) %v1542_v42, 8 }
 0x546   :  { %1562 = vxpose.xlu1.b32.cont [6/8] (short) (narrow) %v1544_v44, 8 }
 0x54a   :  { %1563 = vxpose.xlu1.b32.cont [7/8] (short) (narrow) %v1546_v29, 8 }
 0x54e   :  { %1564 = vxpose.xlu1.b32.end [8/8] (short) (narrow) %v1548_v46, 8 }
 0x576   :  { %v1597_v49 = vpop.permute.xlu0 %1596 }
 0x578   :  { %v1592_v47 = vpop.permute.xlu1 %1591 }
 0x57a   :  { %v1607_v50 = vpop.permute.xlu0 %1606 }
 0x57c   :  { %v1602_v25 = vpop.permute.xlu1 %1601 }
 0x57e   :  { %v1617_v7 = vpop.permute.xlu0 %1616 }
 0x580   :  { %v1612_v48 = vpop.permute.xlu1 %1611 }
 0x582   :  { %v1627_v20 = vpop.permute.xlu0 %1626 }
 0x584   :  { %v1622_v30 = vpop.permute.xlu1 %1621 }
 0x5ae   :  { %v1573_v5 = vpop.trf.xlu1 }
 0x5af   :  { %v1632_v6 = vrot.slane %v1573_v5, %v695_v10 }
 0x5b1   :  { %v1634_v11 = vadd.f32 %v1632_v6, %v1597_v49  ;;  %v1633_v12 = vadd.f32 %v1632_v6, %v1592_v47  ;;  %v1636_v15 = vadd.f32 %v1632_v6, %v1607_v50  ;;  %v1635_v32 = vadd.f32 %v1632_v6, %v1602_v25 }
 0x5b2   :  { %v1638_v16 = vadd.f32 %v1632_v6, %v1617_v7  ;;  %v1637_v55 = vadd.f32 %v1632_v6, %v1612_v48  ;;  %v1639_v63 = vadd.f32 %v1632_v6, %v1622_v30  ;;  %v1640_v23 = vadd.f32 %v1632_v6, %v1627_v20 }
 0x5b3   :  { %v1642_v56 = vmul.f32 %v1634_v11, %v3150_v17  ;;  %v1641_v57 = vmul.f32 %v1633_v12, %v3145_v14  ;;  %v1644_v59 = vmul.f32 %v1636_v15, %v3160_v37  ;;  %v1643_v60 = vmul.f32 %v1635_v32, %v3155_v36 }
 0x5b4   :  { %v1646_v61 = vmul.f32 %v1638_v16, %v3170_v45  ;;  %v1645_v9 = vmul.f32 %v1637_v55, %v3165_v43  ;;  %v1647_v26 = vmul.f32 %v1639_v63, %v3181_v58  ;;  %v1648_v27 = vmul.f32 %v1640_v23, %v3187_v0 }
 0x5b5   :  { %v2368_v33 = vmul.f32 -1.442695, %v1642_v56  ;;  %v2367_v10 = vmul.f32 -1.442695, %v1641_v57  ;;  %v2370_v2 = vmul.f32 -1.442695, %v1644_v59 }
 0x5b6   :  { %v2369_v19 = vmul.f32 -1.442695, %v1643_v60  ;;  %v2372_v22 = vmul.f32 -1.442695, %v1646_v61  ;;  %v2371_v24 = vmul.f32 -1.442695, %v1645_v9 }
 0x5b7   :  { %2815 = vpow2.f32 %v2368_v33  ;;  %v2373_v3 = vmul.f32 -1.442695, %v1647_v26  ;;  %v2374_v31 = vmul.f32 -1.442695, %v1648_v27 }
 0x5b8   :  { %2817 = vpow2.f32 %v2367_v10 }
 0x5b9   :  { %2819 = vpow2.f32 %v2370_v2 }
 0x5ba   :  { %2821 = vpow2.f32 %v2369_v19 }
 0x5bb   :  { %2823 = vpow2.f32 %v2372_v22 }
 0x5bc   :  { %2825 = vpow2.f32 %v2371_v24 }
 0x5bd   :  { %2827 = vpow2.f32 %v2373_v3 }
 0x5be   :  { %2829 = vpow2.f32 %v2374_v31 }
 0x5c4   :  { %v2816_v4 = vpop.eup %2815 }
 0x5c5   :  { %v2818_v62 = vpop.eup %2817  ;;  %v1674_v8 = vadd.f32 1.0, %v2816_v4 }
 0x5c6   :  { %v2820_v1 = vpop.eup %2819  ;;  %v1673_v35 = vadd.f32 1.0, %v2818_v62 }
 0x5c7   :  { %v2822_v13 = vpop.eup %2821  ;;  %2831 = vrcp.f32 %v1674_v8  ;;  %v1676_v41 = vadd.f32 1.0, %v2820_v1 }
 0x5c8   :  { %v2824_v21 = vpop.eup %2823  ;;  %2833 = vrcp.f32 %v1673_v35  ;;  %v1675_v28 = vadd.f32 1.0, %v2822_v13 }
 0x5c9   :  { %2835 = vrcp.f32 %v1676_v41  ;;  %v1678_v39 = vadd.f32 1.0, %v2824_v21  ;;  %v2826_v42 = vpop.eup %2825 }
 0x5ca   :  { %2837 = vrcp.f32 %v1675_v28  ;;  %v1677_v44 = vadd.f32 1.0, %v2826_v42  ;;  %v2828_v29 = vpop.eup %2827  ;;  %v1043_v42 = vld [vmem:[%s3500_s6] sm:$0xff] }
 0x5cb   :  { %2839 = vrcp.f32 %v1678_v39  ;;  %v2830_v46 = vpop.eup %2829  ;;  %v1679_v47 = vadd.f32 1.0, %v2828_v29  ;;  %2732 = vmatprep.subr.mxu1 %v1043_v42 }
 0x5cc   :  { %2841 = vrcp.f32 %v1677_v44  ;;  %v1680_v48 = vadd.f32 1.0, %v2830_v46 }
 0x5cd   :  { %2843 = vrcp.f32 %v1679_v47 }
 0x5ce   :  { %2845 = vrcp.f32 %v1680_v48  ;;  %v1003_v48 = vmin.f32 %v3321_v34, 0.0 }
 0x5d4   :  { %v2832_v25 = vpop.eup %2831 }
 0x5d5   :  { %v2834_v49 = vpop.eup %2833  ;;  %v2376_v30 = vadd.f32 -0.5, %v2832_v25 }
 0x5d6   :  { %v2836_v50 = vpop.eup %2835  ;;  %v2375_v5 = vadd.f32 -0.5, %v2834_v49 }
 0x5d7   :  { %v2838_v6 = vpop.eup %2837  ;;  %v1707_v7 = vmul.f32 1.442695, %v2376_v30  ;;  %v2378_v11 = vadd.f32 -0.5, %v2836_v50  ;;  %v1004_v50 = vmin.f32 %v3319_v18, 0.0 }
 0x5d8   :  { %v1705_v12 = vmul.f32 1.442695, %v2375_v5  ;;  %v2377_v32 = vadd.f32 -0.5, %v2838_v6  ;;  %v2840_v16 = vpop.eup %2839 }
 0x5d9   :  { %2847 = vpow2.f32 %v1707_v7  ;;  %v1711_v15 = vmul.f32 1.442695, %v2378_v11  ;;  %v2380_v56 = vadd.f32 -0.5, %v2840_v16  ;;  %v2842_v57 = vpop.eup %2841  ;;  %v1011_v7 = vmul.f32 1.442695, %v1003_v48 }
 0x5da   :  { %2849 = vpow2.f32 %v1705_v12  ;;  %v1709_v55 = vmul.f32 1.442695, %v2377_v32  ;;  %v2379_v60 = vadd.f32 -0.5, %v2842_v57  ;;  %v2844_v61 = vpop.eup %2843  ;;  %v1005_v11 = vmin.f32 %v3325_v40, 0.0 }
 0x5db   :  { %2851 = vpow2.f32 %v1711_v15  ;;  %v1715_v59 = vmul.f32 1.442695, %v2380_v56  ;;  %v2846_v63 = vpop.eup %2845  ;;  %v2381_v10 = vadd.f32 -0.5, %v2844_v61  ;;  %v1013_v32 = vmul.f32 1.442695, %v1004_v50 }
 0x5dc   :  { %2853 = vpow2.f32 %v1709_v55  ;;  %v1713_v33 = vmul.f32 1.442695, %v2379_v60  ;;  %v2382_v24 = vadd.f32 -0.5, %v2846_v63  ;;  %v1006_v16 = vmin.f32 %v3323_v38, 0.0 }
 0x5dd   :  { %2855 = vpow2.f32 %v1715_v59  ;;  %v1717_v23 = vmul.f32 1.442695, %v2381_v10  ;;  %v1015_v57 = vmul.f32 1.442695, %v1005_v11  ;;  %v1007_v59 = vmin.f32 %v3329_v52, 0.0 }
 0x5de   :  { %2857 = vpow2.f32 %v1713_v33  ;;  %v1719_v17 = vmul.f32 1.442695, %v2382_v24  ;;  %v1017_v63 = vmul.f32 1.442695, %v1006_v16  ;;  %v1008_v10 = vmin.f32 %v3327_v51, 0.0 }
 0x5df   :  { %2859 = vpow2.f32 %v1717_v23  ;;  %v1010_v24 = vmin.f32 %v3331_v53, 0.0 }
 0x5e0   :  { %2861 = vpow2.f32 %v1719_v17  ;;  %v1021_v23 = vmul.f32 1.442695, %v1008_v10 }
 0x5e6   :  { %v2848_v2 = vpop.eup %2847 }
 0x5e7   :  { %v2850_v9 = vpop.eup %2849  ;;  %v1722_v19 = vsel %vm54_vm4, %v2848_v2, 0.0 }
 0x5e8   :  { %v1732_v20 = vsel %vm793_vm3, %v1722_v19, 0.0  ;;  %v1721_v22 = vsel %vm53_vm2, %v2850_v9, 0.0  ;;  %v2852_v26 = vpop.eup %2851  ;;  %v1019_v9 = vmul.f32 1.442695, %v1007_v59 }
 0x5e9   :  { %1733 = vadd.xlane.f32.xlu0 %v1732_v20  ;;  %v1729_v27 = vsel %vm793_vm3, %v1721_v22, 0.0  ;;  %v3369_v3 = vsel %vm56_vm6, %v2852_v26, 0.0  ;;  %v2854_v31 = vpop.eup %2853 }
 0x5ea   :  { %v1738_v4 = vsel %vm793_vm3, %v3369_v3, 0.0  ;;  %v1723_v14 = vsel %vm55_vm5, %v2854_v31, 0.0  ;;  %v2856_v62 = vpop.eup %2855  ;;  %v1025_v31 = vmul.f32 1.442695, %v1010_v24 }
 0x5eb   :  { %v1735_v8 = vsel %vm793_vm3, %v1723_v14, 0.0  ;;  %v3378_v37 = vsel %vm58_vm8, %v2856_v62, 0.0  ;;  %v2858_v1 = vpop.eup %2857 }
 0x5ec   :  { %v1744_v35 = vsel %vm793_vm3, %v3378_v37, 0.0  ;;  %v3384_v13 = vsel %vm57_vm7, %v2858_v1, 0.0  ;;  %v2860_v36 = vpop.eup %2859 }
 0x5ed   :  { %1730 = vadd.xlane.f32.xlu0 %v1729_v27  ;;  %v1741_v41 = vsel %vm793_vm3, %v3384_v13, 0.0  ;;  %v3390_v21 = vsel %vm59_vm9, %v2860_v36, 0.0  ;;  %v2862_v45 = vpop.eup %2861 }
 0x5ee   :  { %v1747_v28 = vsel %vm793_vm3, %v3390_v21, 0.0  ;;  %v3396_v39 = vsel %vm60_vm10, %v2862_v45, 0.0  ;;  %vm995_vm10 = vcmp.gt.f32.partialorder %v3321_v34, 0.0 }
 0x5ef   :  { %v1750_v43 = vsel %vm793_vm3, %v3396_v39, 0.0 }
 0x5f1   :  { %1739 = vadd.xlane.f32.xlu0 %v1738_v4 }
 0x5f5   :  { %1736 = vadd.xlane.f32.xlu0 %v1735_v8 }
 0x5f9   :  { %1745 = vadd.xlane.f32.xlu0 %v1744_v35 }
 0x5fd   :  { %1742 = vadd.xlane.f32.xlu0 %v1741_v41 }
 0x601   :  { %1748 = vadd.xlane.f32.xlu0 %v1747_v28 }
 0x605   :  { %1751 = vadd.xlane.f32.xlu0 %v1750_v43 }
 0x672   :  { %v1734_v58 = vpop.xlane.xlu0 %1733 }
 0x673   :  { %2863 = vrcp.f32 %v1734_v58  ;;  %vm1754_vm2 = vcmp.gt.f32.partialorder %v1734_v58, 0.0 }
 0x676   :  { %v1731_v44 = vpop.xlane.xlu0 %1730 }
 0x677   :  { %2865 = vrcp.f32 %v1731_v44  ;;  %vm1753_vm0 = vcmp.gt.f32.partialorder %v1731_v44, 0.0 }
 0x67a   :  { %v1740_v29 = vpop.xlane.xlu0 %1739 }
 0x67b   :  { %2867 = vrcp.f32 %v1740_v29  ;;  %vm1756_vm5 = vcmp.gt.f32.partialorder %v1740_v29, 0.0 }
 0x67e   :  { %v1737_v46 = vpop.xlane.xlu0 %1736 }
 0x67f   :  { %2869 = vrcp.f32 %v1737_v46  ;;  %vm1755_vm4 = vcmp.gt.f32.partialorder %v1737_v46, 0.0 }
 0x680   :  { %v2864_v0 = vpop.eup %2863 }
 0x681   :  { %v1770_v49 = vmul.f32 %v2864_v0, %v1722_v19  ;;  %v1009_v19 = vmin.f32 %v3333_v54, 0.0 }
 0x682   :  { %v1746_v47 = vpop.xlane.xlu0 %1745 }
 0x683   :  { %2871 = vrcp.f32 %v1746_v47  ;;  %v1794_v12 = vsel %vm1754_vm2, %v1770_v49, 0.0  ;;  %v1023_v27 = vmul.f32 1.442695, %v1009_v19  ;;  %vm1758_vm7 = vcmp.gt.f32.partialorder %v1746_v47, 0.0 }
 0x684   :  { %v2866_v25 = vpop.eup %2865 }
 0x685   :  { %v1769_v30 = vmul.f32 %v2866_v25, %v1721_v22 }
 0x686   :  { %v1743_v5 = vpop.xlane.xlu0 %1742 }
 0x687   :  { %v1793_v6 = vsel %vm1753_vm0, %v1769_v30, 0.0  ;;  %2873 = vrcp.f32 %v1743_v5  ;;  %vm1757_vm6 = vcmp.gt.f32.partialorder %v1743_v5, 0.0  ;;  %vm1002_vm0 = vcmp.gt.f32.partialorder %v3331_v53, 0.0  ;;  %v1978_v5 = vld [vmem:[%s3500_s6 + $0x8] sm:$0xff] }
 0x688   :  { %2706 = vmatprep.mubr.msk.f32.mxu1 %vm793_vm3, %v1793_v6  ;;  %v2868_v15 = vpop.eup %2867  ;;  %2718 = vmatprep.subr.mxu0 %v1978_v5 }
 0x689   :  { %2707 = vmatmul.mubr.msk.f32.vlgmr.msra.gmra.mxu1 %vm793_vm3, %v1794_v12  ;;  %v1772_v60 = vmul.f32 %v2868_v15, %v3369_v3  ;;  %2719 = vmatpush3.msra.mxu0 %v1978_v5 }
 0x68a   :  { %v1749_v55 = vpop.xlane.xlu0 %1748  ;;  %2733 = vmatpush3.msra.mxu1 %v1043_v42 }
 0x68b   :  { %2875 = vrcp.f32 %v1749_v55  ;;  %v1796_v20 = vsel %vm1756_vm5, %v1772_v60, 0.0  ;;  %vm1759_vm8 = vcmp.gt.f32.partialorder %v1749_v55, 0.0 }
 0x68c   :  { %v2870_v56 = vpop.eup %2869  ;;  %2877 = vpow2.f32 %v1011_v7 }
 0x68d   :  { %v1771_v61 = vmul.f32 %v2870_v56, %v1723_v14  ;;  %2879 = vpow2.f32 %v1013_v32 }
 0x68e   :  { %v1752_v33 = vpop.xlane.xlu0 %1751 }
 0x68f   :  { %v1795_v2 = vsel %vm1755_vm4, %v1771_v61, 0.0  ;;  %2881 = vrcp.f32 %v1752_v33  ;;  %vm1760_vm9 = vcmp.gt.f32.partialorder %v1752_v33, 0.0 }
 0x690   :  { %2883 = vpow2.f32 %v1015_v57  ;;  %2709 = vmatprep.mubr.msk.f32.mxu1 %vm793_vm3, %v1795_v2  ;;  %v2872_v22 = vpop.eup %2871 }
 0x691   :  { %2710 = vmatmul.mubr.msk.f32.gmra.mxu1 %vm793_vm3, %v1796_v20  ;;  %2885 = vpow2.f32 %v1017_v63  ;;  %v1774_v3 = vmul.f32 %v2872_v22, %v3378_v37 }
 0x692   :  { %2887 = vpow2.f32 %v1019_v9 }
 0x693   :  { %2889 = vpow2.f32 %v1021_v23  ;;  %v1798_v62 = vsel %vm1758_vm7, %v1774_v3, 0.0 }
 0x694   :  { %v2874_v26 = vpop.eup %2873  ;;  %2891 = vpow2.f32 %v1023_v27 }
 0x695   :  { %v1773_v17 = vmul.f32 %v2874_v26, %v3384_v13  ;;  %2893 = vpow2.f32 %v1025_v31 }
 0x697   :  { %v1797_v4 = vsel %vm1757_vm6, %v1773_v17, 0.0 }
 0x698   :  { %v2876_v14 = vpop.eup %2875  ;;  %2712 = vmatprep.mubr.msk.f32.mxu1 %vm793_vm3, %v1797_v4 }
 0x699   :  { %v2878_v8 = vpop.eup %2877  ;;  %v1775_v1 = vmul.f32 %v2876_v14, %v3390_v21  ;;  %2713 = vmatmul.mubr.msk.f32.gmra.mxu1 %vm793_vm3, %v1798_v62 }
 0x69a   :  { %v2880_v35 = vpop.eup %2879  ;;  %v2322_v36 = vadd.f32 -1.0, %v2878_v8 }
 0x69b   :  { %v1799_v37 = vsel %vm1759_vm8, %v1775_v1, 0.0  ;;  %v2323_v28 = vadd.f32 -1.0, %v2880_v35 }
 0x69c   :  { %v2882_v13 = vpop.eup %2881  ;;  %2715 = vmatprep.mubr.msk.f32.mxu1 %vm793_vm3, %v1799_v37  ;;  %v1035_v21 = vsel %vm995_vm10, %v3321_v34, %v2322_v36 }
 0x69d   :  { %v2884_v41 = vpop.eup %2883  ;;  %v1776_v45 = vmul.f32 %v2882_v13, %v3396_v39  ;;  %v1036_v29 = vsel %vm996_vm14, %v3319_v18, %v2323_v28  ;;  %vm2252_vm14 = vcmask 261120  }
 0x69e   :  { %v2886_v42 = vpop.eup %2885  ;;  %v2324_v58 = vadd.f32 -1.0, %v2884_v41 }
 0x69f   :  { %v1800_v43 = vsel %vm1760_vm9, %v1776_v45, 0.0  ;;  %v2888_v44 = vpop.eup %2887  ;;  %v2325_v39 = vadd.f32 -1.0, %v2886_v42 }
 0x6a0   :  { %2716 = vmatmul.mubr.msk.f32.gmra.mxu1 %vm793_vm3, %v1800_v43  ;;  %v2890_v46 = vpop.eup %2889  ;;  %v1037_v0 = vsel %vm997_vm15, %v3325_v40, %v2324_v58  ;;  %v2326_v47 = vadd.f32 -1.0, %v2888_v44  ;;  %vm998_vm3 = vcmp.gt.f32.partialorder %v3323_v38, 0.0 }
 0x6a1   :  { %2734 = vmatprep.mubr.msk.f32.mxu1 %vm330_vm1, %v1035_v21  ;;  %v2892_v25 = vpop.eup %2891  ;;  %v1038_v34 = vsel %vm998_vm3, %v3323_v38, %v2325_v39  ;;  %v2327_v48 = vadd.f32 -1.0, %v2890_v46  ;;  %v2415_v46 = vld [vmem:[%s3501_s7] ss:$0 sm:$0xff] }
 0x6a2   :  { %v2894_v18 = vpop.eup %2893  ;;  %v1039_v49 = vsel %vm999_vm11, %v3329_v52, %v2326_v47  ;;  %v2328_v30 = vadd.f32 -1.0, %v2892_v25 }
 0x6a3   :  { %v1040_v40 = vsel %vm1000_vm12, %v3327_v51, %v2327_v48  ;;  %v2329_v50 = vadd.f32 -1.0, %v2894_v18 }
 0x6a4   :  { %2735 = vmatmul.mubr.msk.f32.vlgmr.msra.gmra.mxu1 %vm330_vm1, %v1036_v29  ;;  %v1041_v38 = vsel %vm1001_vm13, %v3333_v54, %v2328_v30 }
 0x6a5   :  { %2737 = vmatprep.mubr.msk.f32.mxu1 %vm330_vm1, %v1037_v0  ;;  %v1042_v52 = vsel %vm1002_vm0, %v3331_v53, %v2329_v50 }
 0x6a8   :  { %2738 = vmatmul.mubr.msk.f32.gmra.mxu1 %vm330_vm1, %v1038_v34 }
 0x6a9   :  { %2740 = vmatprep.mubr.msk.f32.mxu1 %vm330_vm1, %v1039_v49 }
 0x6ac   :  { %2741 = vmatmul.mubr.msk.f32.gmra.mxu1 %vm330_vm1, %v1040_v40 }
 0x6ad   :  { %2743 = vmatprep.mubr.msk.f32.mxu1 %vm330_vm1, %v1041_v38 }
 0x6b0   :  { %2744 = vmatmul.mubr.msk.f32.gmra.mxu1 %vm330_vm1, %v1042_v52 }
 0x749   :  { %v2708_v51 = vpop.f32.mrf.mxu1 }
 0x74a   :  { %v1939_v6 = vmin.f32 %v2708_v51, 0.0  ;;  %vm1931_vm4 = vcmp.gt.f32.partialorder %v2708_v51, 0.0 }
 0x74b   :  { %v1891_v7 = vpop.f32.mrf.mxu1 }
 0x74c   :  { %v1948_v11 = vmul.f32 1.442695, %v1939_v6  ;;  %v1938_v12 = vmin.f32 %v1891_v7, 0.0  ;;  %vm1930_vm2 = vcmp.gt.f32.partialorder %v1891_v7, 0.0 }
 0x74e   :  { %2895 = vpow2.f32 %v1948_v11  ;;  %v1946_v54 = vmul.f32 1.442695, %v1938_v12 }
 0x750   :  { %2897 = vpow2.f32 %v1946_v54 }
 0x751   :  { %v2711_v15 = vpop.f32.mrf.mxu1 }
 0x752   :  { %v1941_v32 = vmin.f32 %v2711_v15, 0.0  ;;  %vm1933_vm6 = vcmp.gt.f32.partialorder %v2711_v15, 0.0 }
 0x753   :  { %v1901_v16 = vpop.f32.mrf.mxu1 }
 0x754   :  { %v1952_v53 = vmul.f32 1.442695, %v1941_v32  ;;  %v1940_v55 = vmin.f32 %v1901_v16, 0.0  ;;  %vm1932_vm5 = vcmp.gt.f32.partialorder %v1901_v16, 0.0 }
 0x756   :  { %2899 = vpow2.f32 %v1952_v53  ;;  %v1950_v56 = vmul.f32 1.442695, %v1940_v55 }
 0x758   :  { %2901 = vpow2.f32 %v1950_v56 }
 0x759   :  { %v2714_v57 = vpop.f32.mrf.mxu1 }
 0x75a   :  { %v1943_v59 = vmin.f32 %v2714_v57, 0.0  ;;  %vm1935_vm8 = vcmp.gt.f32.partialorder %v2714_v57, 0.0 }
 0x75b   :  { %v2896_v60 = vpop.eup %2895  ;;  %v1911_v61 = vpop.f32.mrf.mxu1 }
 0x75c   :  { %v1956_v63 = vmul.f32 1.442695, %v1943_v59  ;;  %v1942_v33 = vmin.f32 %v1911_v61, 0.0  ;;  %v2392_v2 = vadd.f32 -1.0, %v2896_v60  ;;  %vm1934_vm7 = vcmp.gt.f32.partialorder %v1911_v61, 0.0 }
 0x75d   :  { %v2898_v10 = vpop.eup %2897 }
 0x75e   :  { %2903 = vpow2.f32 %v1956_v63  ;;  %v1954_v9 = vmul.f32 1.442695, %v1942_v33  ;;  %v2391_v19 = vadd.f32 -1.0, %v2898_v10  ;;  %v1971_v23 = vsel %vm1931_vm4, %v2708_v51, %v2392_v2 }
 0x760   :  { %2905 = vpow2.f32 %v1954_v9  ;;  %v2717_v20 = vpop.f32.mrf.mxu1  ;;  %v1970_v22 = vsel %vm1930_vm2, %v1891_v7, %v2391_v19 }
 0x761   :  { %v1945_v24 = vmin.f32 %v2717_v20, 0.0  ;;  %2720 = vmatprep.mubr.msk.f32.mxu0 %vm330_vm1, %v1970_v22  ;;  %vm1937_vm10 = vcmp.gt.f32.partialorder %v2717_v20, 0.0 }
 0x762   :  { %v1921_v26 = vpop.f32.mrf.mxu1  ;;  %2721 = vmatmul.mubr.msk.f32.vlgmr.msra.gmra.mxu0 %vm330_vm1, %v1971_v23 }
 0x763   :  { %v2900_v27 = vpop.eup %2899  ;;  %v1960_v3 = vmul.f32 1.442695, %v1945_v24  ;;  %v1944_v17 = vmin.f32 %v1921_v26, 0.0  ;;  %vm1936_vm9 = vcmp.gt.f32.partialorder %v1921_v26, 0.0 }
 0x764   :  { %v2394_v14 = vadd.f32 -1.0, %v2900_v27  ;;  %v2736_v29 = vpop.f32.mrf.mxu1 }
 0x765   :  { %v2902_v31 = vpop.eup %2901  ;;  %2907 = vpow2.f32 %v1960_v3  ;;  %v1958_v4 = vmul.f32 1.442695, %v1944_v17 }
 0x766   :  { %v2393_v62 = vadd.f32 -1.0, %v2902_v31  ;;  %v1973_v1 = vsel %vm1933_vm6, %v2711_v15, %v2394_v14  ;;  %v2198_v0 = vpop.f32.mrf.mxu1 }
 0x767   :  { %2909 = vpow2.f32 %v1958_v4 }
 0x768   :  { %v1972_v8 = vsel %vm1932_vm5, %v1901_v16, %v2393_v62  ;;  %v2739_v18 = vpop.f32.mrf.mxu1 }
 0x769   :  { %2723 = vmatprep.mubr.msk.f32.mxu0 %vm330_vm1, %v1972_v8 }
 0x76a   :  { %2724 = vmatmul.mubr.msk.f32.gmra.mxu0 %vm330_vm1, %v1973_v1  ;;  %v2208_v40 = vpop.f32.mrf.mxu1 }
 0x76b   :  { %v2904_v35 = vpop.eup %2903 }
 0x76c   :  { %v2396_v13 = vadd.f32 -1.0, %v2904_v35  ;;  %v2742_v51 = vpop.f32.mrf.mxu1 }
 0x76d   :  { %v2906_v37 = vpop.eup %2905 }
 0x76e   :  { %v2395_v36 = vadd.f32 -1.0, %v2906_v37  ;;  %v1975_v45 = vsel %vm1935_vm8, %v2714_v57, %v2396_v13  ;;  %v2218_v11 = vpop.f32.mrf.mxu1 }
 0x770   :  { %v1974_v41 = vsel %vm1934_vm7, %v1911_v61, %v2395_v36  ;;  %v2745_v16 = vpop.f32.mrf.mxu1 }
 0x771   :  { %2726 = vmatprep.mubr.msk.f32.mxu0 %vm330_vm1, %v1974_v41 }
 0x772   :  { %v2908_v28 = vpop.eup %2907  ;;  %2727 = vmatmul.mubr.msk.f32.gmra.mxu0 %vm330_vm1, %v1975_v45  ;;  %v2228_v57 = vpop.f32.mrf.mxu1 }
 0x773   :  { %v2398_v42 = vadd.f32 -1.0, %v2908_v28 }
 0x774   :  { %v2910_v43 = vpop.eup %2909 }
 0x775   :  { %v2397_v21 = vadd.f32 -1.0, %v2910_v43  ;;  %v1977_v44 = vsel %vm1937_vm10, %v2717_v20, %v2398_v42 }
 0x777   :  { %v1976_v58 = vsel %vm1936_vm9, %v1921_v26, %v2397_v21 }
 0x778   :  { %2729 = vmatprep.mubr.msk.f32.mxu0 %vm330_vm1, %v1976_v58 }
 0x779   :  { %2730 = vmatmul.mubr.msk.f32.gmra.mxu0 %vm330_vm1, %v1977_v44 }
 0x822   :  { %v2722_v39 = vpop.f32.mrf.mxu0 }
 0x823   :  { %v2204_v47 = vadd.f32 %v2736_v29, %v2722_v39 }
 0x824   :  { %v2069_v25 = vpop.f32.mrf.mxu0 }
 0x825   :  { %v2245_v34 = vadd.f32 %v2415_v46, %v2204_v47  ;;  %v2199_v48 = vadd.f32 %v2198_v0, %v2069_v25 }
 0x827   :  { %2254 = vst.msk [vmem:[%s3502_s8 + $0x8] sm:$0xff] %vm2252_vm14, %v2245_v34  ;;  %v2244_v49 = vadd.f32 %v2415_v46, %v2199_v48 }
 0x829   :  { %2253 = vst.msk [vmem:[%s3502_s8] sm:$0xff] %vm2252_vm14, %v2244_v49 }
 0x82a   :  { %v2725_v30 = vpop.f32.mrf.mxu0 }
 0x82b   :  { %v2214_v50 = vadd.f32 %v2739_v18, %v2725_v30 }
 0x82c   :  { %v2079_v38 = vpop.f32.mrf.mxu0 }
 0x82d   :  { %v2247_v52 = vadd.f32 %v2415_v46, %v2214_v50  ;;  %v2209_v5 = vadd.f32 %v2208_v40, %v2079_v38 }
 0x82f   :  { %2256 = vst.msk [vmem:[%s3502_s8 + $0x18] sm:$0xff] %vm2252_vm14, %v2247_v52  ;;  %v2246_v6 = vadd.f32 %v2415_v46, %v2209_v5 }
 0x831   :  { %2255 = vst.msk [vmem:[%s3502_s8 + $0x10] sm:$0xff] %vm2252_vm14, %v2246_v6 }
 0x832   :  { %v2728_v7 = vpop.f32.mrf.mxu0 }
 0x833   :  { %v2224_v12 = vadd.f32 %v2742_v51, %v2728_v7 }
 0x834   :  { %v2089_v54 = vpop.f32.mrf.mxu0 }
 0x835   :  { %v2249_v15 = vadd.f32 %v2415_v46, %v2224_v12  ;;  %v2219_v32 = vadd.f32 %v2218_v11, %v2089_v54 }
 0x837   :  { %2258 = vst.msk [vmem:[%s3502_s8 + $0x28] sm:$0xff] %vm2252_vm14, %v2249_v15  ;;  %v2248_v53 = vadd.f32 %v2415_v46, %v2219_v32 }
 0x839   :  { %2257 = vst.msk [vmem:[%s3502_s8 + $0x20] sm:$0xff] %vm2252_vm14, %v2248_v53  ;;  %v2731_v55 = vpop.f32.mrf.mxu0 }
 0x83a   :  { %v2234_v56 = vadd.f32 %v2745_v16, %v2731_v55 }
 0x83b   :  { %v2099_v59 = vpop.f32.mrf.mxu0 }
 0x83c   :  { %v2251_v60 = vadd.f32 %v2415_v46, %v2234_v56  ;;  %v2229_v61 = vadd.f32 %v2228_v57, %v2099_v59 }
 0x83e   :  { %2260 = vst.msk [vmem:[%s3502_s8 + $0x38] sm:$0xff] %vm2252_vm14, %v2251_v60  ;;  %v2250_v63 = vadd.f32 %v2415_v46, %v2229_v61 }
 0x840   :  { %2259 = vst.msk [vmem:[%s3502_s8 + $0x30] sm:$0xff] %vm2252_vm14, %v2250_v63 }

// kernel: deconvnet1_forward.2
= control target key start
LH: loop header
LB: loop body
LE: loop exit
PB: predicated region body
PF: predicated region fallthrough
CT: control target
= control target key end

     0   :  { %vm73_vm0 = vcmask 261120   ;;  %vm332_vm1 = vcmask 64512   ;;  %v2940_v54 = vmov 0   ;;  %vm795_vm3 = vcmask 523264   ;;  %s3547_s3 = inlined_call_operand.vmem [shape: f32[2,32,8], index: 3, kind: input, shape index: {}]   ;;  %s3548_s0 = inlined_call_operand.vmem [shape: f32[64,32], index: 0, kind: input, shape index: {}, may-alias: {0,1}]   ;;  %s3549_s1 = inlined_call_operand.vmem [shape: f32[64,32], index: 1, kind: input, shape index: {}, may-alias: {0,1}]   ;;  %s3550_s5 = inlined_call_operand.vmem [shape: f32[2,8,2], index: 5, kind: input, shape index: {}]   ;;  %s3551_s4 = inlined_call_operand.vmem [shape: f32[2,1,8], index: 4, kind: input, shape index: {}]   ;;  %s3552_s2 = inlined_call_operand.vmem [shape: f32[64,64], index: 2, kind: input, shape index: {}]   ;;  %s3553_s6 = inlined_call_operand.vmem [shape: f32[16,8], index: 6, kind: input, shape index: {}]   ;;  %s3554_s7 = inlined_call_operand.vmem [shape: f32[1,8], index: 7, kind: input, shape index: {}]   ;;  %s3555_s8 = inlined_call_operand.vmem [shape: f32[64,8], index: 8, kind: output, shape index: {}]  }
   0x1   :  { %v64_v0 = vld [vmem:[%s3547_s3 + $0x18] sm:$0xff]  ;;  %v63_v1 = vld [vmem:[%s3547_s3 + $0x10] sm:$0xff]  ;;  %v2996_v2 = vld [vmem:[%s3548_s0] sm:$0xff]  ;;  %2779 = vset.pattern.permute.xlu1 %v2940_v54  ;;  %2778 = vset.pattern.permute.xlu0 %v2940_v54 }
   0x2   :  { %2555 = vmatprep.subr.mxu0 %v64_v0  ;;  %2575 = vmatprep.subr.mxu1 %v64_v0  ;;  %v62_v3 = vld [vmem:[%s3547_s3 + $0x8] sm:$0xff]  ;;  %v61_v4 = vld [vmem:[%s3547_s3] sm:$0xff]  ;;  %v3014_v6 = vld [vmem:[%s3548_s0 + $0x10] sm:$0xff] }
   0x3   :  { %2556 = vmatpush3.msra.mxu0 %v64_v0  ;;  %2563 = vmatprep.mubr.msk.f32.mxu0 %vm73_vm0, %v2996_v2  ;;  %v3009_v5 = vld [vmem:[%s3548_s0 + $0x8] sm:$0xff]  ;;  %v3019_v7 = vld [vmem:[%s3549_s1] sm:$0xff]  ;;  %v3034_v10 = vld [vmem:[%s3549_s1 + $0x10] sm:$0xff] }
   0x4   :  { %2557 = vmatprep.subr.mxu0 %v63_v1  ;;  %2576 = vmatpush3.msra.mxu1 %v64_v0  ;;  %v3024_v8 = vld [vmem:[%s3549_s1 + $0x8] sm:$0xff]  ;;  %v66_v9 = vld [vmem:[%s3550_s5] sm:$0xff]  ;;  %v3041_v11 = vld [vmem:[%s3548_s0 + $0x18] sm:$0xff] }
   0x5   :  { %2558 = vmatpush3.msra.mxu0 %v63_v1  ;;  %2577 = vmatprep.subr.mxu1 %v63_v1  ;;  %v3048_v12 = vld [vmem:[%s3548_s0 + $0x20] sm:$0xff]  ;;  %v3057_v13 = vld [vmem:[%s3549_s1 + $0x18] sm:$0xff]  ;;  %v3071_v15 = vld [vmem:[%s3548_s0 + $0x28] sm:$0xff] }
   0x6   :  { %2559 = vmatprep.subr.mxu0 %v62_v3  ;;  %2578 = vmatpush3.msra.mxu1 %v63_v1  ;;  %v3064_v14 = vld [vmem:[%s3549_s1 + $0x20] sm:$0xff]  ;;  %v3076_v16 = vld [vmem:[%s3548_s0 + $0x30] sm:$0xff]  ;;  %v3085_v17 = vld [vmem:[%s3549_s1 + $0x28] sm:$0xff] }
   0x7   :  { %2560 = vmatpush3.msra.mxu0 %v62_v3  ;;  %2579 = vmatprep.subr.mxu1 %v62_v3  ;;  %v3092_v18 = vld [vmem:[%s3549_s1 + $0x30] sm:$0xff]  ;;  %v3099_v19 = vld [vmem:[%s3548_s0 + $0x38] sm:$0xff]  ;;  %v2268_v22 = vld [vmem:[%s3551_s4] ss:$0 sm:$0xff] }
   0x8   :  { %2561 = vmatprep.subr.mxu0 %v61_v4  ;;  %2580 = vmatpush3.msra.mxu1 %v62_v3  ;;  %v3108_v20 = vld [vmem:[%s3549_s1 + $0x38] sm:$0xff]  ;;  %s2941_s1 = smov 127  }
   0x9   :  { %2562 = vmatpush3.msra.mxu0 %v61_v4  ;;  %2581 = vmatprep.subr.mxu1 %v61_v4 }
   0xa   :  { %2564 = vmatmul.mubr.msk.f32.vlgmr.msra.gmra.mxu0 %vm73_vm0, %v3009_v5  ;;  %2582 = vmatpush3.msra.mxu1 %v61_v4 }
   0xb   :  { %2566 = vmatprep.mubr.msk.f32.mxu0 %vm73_vm0, %v3014_v6  ;;  %2583 = vmatprep.mubr.msk.f32.mxu1 %vm73_vm0, %v3019_v7 }
   0xc   :  { %2584 = vmatmul.mubr.msk.f32.vlgmr.msra.gmra.mxu1 %vm73_vm0, %v3024_v8  ;;  %2595 = vmatprep.subr.mxu0 %v66_v9 }
   0xd   :  { %2586 = vmatprep.mubr.msk.f32.mxu1 %vm73_vm0, %v3034_v10  ;;  %2596 = vmatpush3.msra.mxu0 %v66_v9 }
   0xe   :  { %2567 = vmatmul.mubr.msk.f32.gmra.mxu0 %vm73_vm0, %v3041_v11  ;;  %2609 = vmatprep.subr.mxu1 %v66_v9 }
   0xf   :  { %2569 = vmatprep.mubr.msk.f32.mxu0 %vm73_vm0, %v3048_v12  ;;  %2610 = vmatpush3.msra.mxu1 %v66_v9 }
  0x10   :  { %2587 = vmatmul.mubr.msk.f32.gmra.mxu1 %vm73_vm0, %v3057_v13 }
  0x11   :  { %2589 = vmatprep.mubr.msk.f32.mxu1 %vm73_vm0, %v3064_v14 }
  0x12   :  { %2570 = vmatmul.mubr.msk.f32.gmra.mxu0 %vm73_vm0, %v3071_v15 }
  0x13   :  { %2572 = vmatprep.mubr.msk.f32.mxu0 %vm73_vm0, %v3076_v16 }
  0x14   :  { %2590 = vmatmul.mubr.msk.f32.gmra.mxu1 %vm73_vm0, %v3085_v17 }
  0x15   :  { %2592 = vmatprep.mubr.msk.f32.mxu1 %vm73_vm0, %v3092_v18 }
  0x16   :  { %2573 = vmatmul.mubr.msk.f32.gmra.mxu0 %vm73_vm0, %v3099_v19 }
  0x18   :  { %2593 = vmatmul.mubr.msk.f32.gmra.mxu1 %vm73_vm0, %v3108_v20 }
  0xca   :  { %v2565_v21 = vpop.f32.mrf.mxu0 }
  0xcb   :  { %v170_v26 = vadd.f32 %v2565_v21, %v2268_v22 }
  0xcc   :  { %v164_v23 = vpop.f32.mrf.mxu0  ;;  %v2585_v24 = vpop.f32.mrf.mxu1 }
  0xcd   :  { %v165_v25 = vadd.f32 %v2268_v22, %v164_v23  ;;  %v299_v28 = vadd.f32 %v2585_v24, %v2268_v22 }
  0xce   :  { %v2568_v27 = vpop.f32.mrf.mxu0  ;;  %v293_v29 = vpop.f32.mrf.mxu1 }
  0xcf   :  { %2597 = vmatprep.mubr.msk.f32.mxu0 %vm332_vm1, %v165_v25  ;;  %v294_v30 = vadd.f32 %v2268_v22, %v293_v29  ;;  %v180_v31 = vadd.f32 %v2568_v27, %v2268_v22 }
  0xd0   :  { %v174_v32 = vpop.f32.mrf.mxu0  ;;  %2598 = vmatmul.mubr.msk.f32.vlgmr.msra.gmra.mxu0 %vm332_vm1, %v170_v26  ;;  %v2588_v33 = vpop.f32.mrf.mxu1 }
  0xd1   :  { %v175_v34 = vadd.f32 %v2268_v22, %v174_v32  ;;  %2611 = vmatprep.mubr.msk.f32.mxu1 %vm332_vm1, %v294_v30  ;;  %v309_v36 = vadd.f32 %v2588_v33, %v2268_v22  ;;  %v3146_v30 = vld [vmem:[%s3547_s3 + $0x38] sm:$0xff]  ;;  %v3159_v32 = vld [vmem:[%s3547_s3 + $0x28] sm:$0xff]  ;;  %v3166_v33 = vld [vmem:[%s3547_s3 + $0x20] sm:$0xff] }
  0xd2   :  { %v2571_v35 = vpop.f32.mrf.mxu0  ;;  %v303_v37 = vpop.f32.mrf.mxu1  ;;  %2612 = vmatmul.mubr.msk.f32.vlgmr.msra.gmra.mxu1 %vm332_vm1, %v299_v28  ;;  %2651 = vmatprep.subr.mxu1 %v3146_v30 }
  0xd3   :  { %2600 = vmatprep.mubr.msk.f32.mxu0 %vm332_vm1, %v175_v34  ;;  %v304_v38 = vadd.f32 %v2268_v22, %v303_v37  ;;  %v190_v39 = vadd.f32 %v2571_v35, %v2268_v22  ;;  %2652 = vmatpush3.msra.mxu1 %v3146_v30  ;;  %v695_v35 = vlaneseq }
  0xd4   :  { %v184_v40 = vpop.f32.mrf.mxu0  ;;  %2601 = vmatmul.mubr.msk.f32.gmra.mxu0 %vm332_vm1, %v180_v31  ;;  %v2591_v41 = vpop.f32.mrf.mxu1 }
  0xd5   :  { %v185_v42 = vadd.f32 %v2268_v22, %v184_v40  ;;  %2614 = vmatprep.mubr.msk.f32.mxu1 %vm332_vm1, %v304_v38  ;;  %v319_v44 = vadd.f32 %v2591_v41, %v2268_v22  ;;  %v3186_v37 = vshrl.u32 %v695_v35, 7  ;;  %v3204_v40 = vld [vmem:[%s3552_s2 + $0x10] sm:$0xff]  ;;  %v3209_v41 = vld [vmem:[%s3552_s2 + $0x18] sm:$0xff] }
  0xd6   :  { %v2574_v43 = vpop.f32.mrf.mxu0  ;;  %v313_v45 = vpop.f32.mrf.mxu1  ;;  %2615 = vmatmul.mubr.msk.f32.gmra.mxu1 %vm332_vm1, %v309_v36  ;;  %vm55_vm5 = vcmp.ne.f32.partialorder %v3204_v40, 0.0  ;;  %vm56_vm6 = vcmp.ne.f32.partialorder %v3209_v41, 0.0 }
  0xd7   :  { %v200_v46 = vadd.f32 %v2574_v43, %v2268_v22  ;;  %2603 = vmatprep.mubr.msk.f32.mxu0 %vm332_vm1, %v185_v42  ;;  %v314_v47 = vadd.f32 %v2268_v22, %v313_v45 }
  0xd8   :  { %v194_v48 = vpop.f32.mrf.mxu0  ;;  %2604 = vmatmul.mubr.msk.f32.gmra.mxu0 %vm332_vm1, %v190_v39  ;;  %v2594_v49 = vpop.f32.mrf.mxu1 }
  0xd9   :  { %v195_v50 = vadd.f32 %v2268_v22, %v194_v48  ;;  %2623 = vmatprep.subr.mxu0 %v200_v46  ;;  %2617 = vmatprep.mubr.msk.f32.mxu1 %vm332_vm1, %v314_v47  ;;  %v329_v52 = vadd.f32 %v2594_v49, %v2268_v22  ;;  %v3214_v47 = vld [vmem:[%s3552_s2 + $0x20] sm:$0xff]  ;;  %v3219_v49 = vld [vmem:[%s3552_s2 + $0x28] sm:$0xff] }
  0xda   :  { %2624 = vmatpush3.msra.mxu0 %v200_v46  ;;  %v323_v51 = vpop.f32.mrf.mxu1  ;;  %2618 = vmatmul.mubr.msk.f32.gmra.mxu1 %vm332_vm1, %v319_v44  ;;  %vm57_vm7 = vcmp.ne.f32.partialorder %v3214_v47, 0.0  ;;  %vm58_vm8 = vcmp.ne.f32.partialorder %v3219_v49, 0.0 }
  0xdb   :  { %2625 = vmatprep.subr.mxu0 %v195_v50  ;;  %2606 = vmatprep.mubr.msk.f32.mxu0 %vm332_vm1, %v195_v50  ;;  %v324_v53 = vadd.f32 %v2268_v22, %v323_v51 }
  0xdc   :  { %2626 = vmatpush3.msra.mxu0 %v195_v50 }
  0xdd   :  { %2627 = vmatprep.subr.mxu0 %v190_v39  ;;  %2607 = vmatmul.mubr.msk.f32.gmra.mxu0 %vm332_vm1, %v200_v46 }
  0xde   :  { %2628 = vmatpush3.msra.mxu0 %v190_v39  ;;  %2620 = vmatprep.mubr.msk.f32.mxu1 %vm332_vm1, %v324_v53 }
  0xdf   :  { %2629 = vmatprep.subr.mxu0 %v185_v42  ;;  %2621 = vmatmul.mubr.msk.f32.gmra.mxu1 %vm332_vm1, %v329_v52 }
  0xe0   :  { %2630 = vmatpush3.msra.mxu0 %v185_v42  ;;  %2659 = vmatprep.mubr.msk.f32.mxu1 %vm73_vm0, %v2996_v2 }
  0xe1   :  { %2631 = vmatprep.subr.mxu0 %v180_v31 }
  0xe2   :  { %2632 = vmatpush3.msra.mxu0 %v180_v31  ;;  %v3151_v31 = vld [vmem:[%s3547_s3 + $0x30] sm:$0xff] }
  0xe3   :  { %2633 = vmatprep.subr.mxu0 %v175_v34  ;;  %2653 = vmatprep.subr.mxu1 %v3151_v31 }
  0xe4   :  { %2634 = vmatpush3.msra.mxu0 %v175_v34  ;;  %2654 = vmatpush3.msra.mxu1 %v3151_v31 }
  0xe5   :  { %2635 = vmatprep.subr.mxu0 %v170_v26  ;;  %2655 = vmatprep.subr.mxu1 %v3159_v32 }
  0xe6   :  { %2636 = vmatpush3.msra.mxu0 %v170_v26  ;;  %2656 = vmatpush3.msra.mxu1 %v3159_v32 }
  0xe7   :  { %2637 = vmatprep.subr.mxu0 %v165_v25  ;;  %2657 = vmatprep.subr.mxu1 %v3166_v33 }
  0xe8   :  { %2638 = vmatpush3.msra.mxu0 %v165_v25  ;;  %2658 = vmatpush3.msra.mxu1 %v3166_v33 }
  0xe9   :  { %2671 = vmatprep.subr.mxu0 %v3146_v30  ;;  %2660 = vmatmul.mubr.msk.f32.vlgmr.msra.gmra.mxu1 %vm73_vm0, %v3009_v5 }
  0xea   :  { %2662 = vmatprep.mubr.msk.f32.mxu1 %vm73_vm0, %v3014_v6 }
  0xed   :  { %2663 = vmatmul.mubr.msk.f32.gmra.mxu1 %vm73_vm0, %v3041_v11 }
  0xee   :  { %2665 = vmatprep.mubr.msk.f32.mxu1 %vm73_vm0, %v3048_v12  ;;  %v697_v12 = vsub.s32 0, %v3186_v37 }
  0xf1   :  { %2666 = vmatmul.mubr.msk.f32.gmra.mxu1 %vm73_vm0, %v3071_v15 }
  0xf2   :  { %2668 = vmatprep.mubr.msk.f32.mxu1 %vm73_vm0, %v3076_v16  ;;  %v3194_v16 = vld [vmem:[%s3552_s2] sm:$0xff] }
  0xf3   :  { %vm53_vm2 = vcmp.ne.f32.partialorder %v3194_v16, 0.0 }
  0xf5   :  { %2669 = vmatmul.mubr.msk.f32.gmra.mxu1 %vm73_vm0, %v3099_v19  ;;  %v3199_v19 = vld [vmem:[%s3552_s2 + $0x8] sm:$0xff] }
  0xf6   :  { %vm54_vm4 = vcmp.ne.f32.partialorder %v3199_v19, 0.0 }
 0x190   :  { %v2599_v55 = vpop.f32.mrf.mxu0 }
 0x192   :  { %v423_v56 = vpop.f32.mrf.mxu0  ;;  %v2613_v57 = vpop.f32.mrf.mxu1 }
 0x193   :  { %599 = vrot.lane.b32.xlu0 %v423_v56, %s2941_s1 }
 0x194   :  { %v2602_v58 = vpop.f32.mrf.mxu0  ;;  %v552_v60 = vpop.f32.mrf.mxu1 }
 0x195   :  { %605 = vrot.lane.b32.xlu1 %v2602_v58, %s2941_s1 }
 0x196   :  { %v433_v59 = vpop.f32.mrf.mxu0  ;;  %v2616_v63 = vpop.f32.mrf.mxu1 }
 0x197   :  { %601 = vrot.lane.b32.xlu0 %v2599_v55, %s2941_s1 }
 0x198   :  { %v2605_v61 = vpop.f32.mrf.mxu0  ;;  %v562_v1 = vpop.f32.mrf.mxu1 }
 0x199   :  { %603 = vrot.lane.b32.xlu1 %v433_v59, %s2941_s1 }
 0x19a   :  { %v443_v62 = vpop.f32.mrf.mxu0  ;;  %v2619_v3 = vpop.f32.mrf.mxu1 }
 0x19b   :  { %607 = vrot.lane.b32.xlu0 %v443_v62, %s2941_s1  ;;  %v3230_v62 = vld [vmem:[%s3552_s2 + $0x30] sm:$0xff] }
 0x19c   :  { %v572_v4 = vpop.f32.mrf.mxu1  ;;  %vm59_vm9 = vcmp.ne.f32.partialorder %v3230_v62, 0.0 }
 0x19d   :  { %609 = vrot.lane.b32.xlu1 %v2605_v61, %s2941_s1  ;;  %v2608_v0 = vpop.f32.mrf.mxu0 }
 0x19f   :  { %v453_v2 = vpop.f32.mrf.mxu0  ;;  %v2622_v9 = vpop.f32.mrf.mxu1 }
 0x1a0   :  { %611 = vrot.lane.b32.xlu0 %v453_v2, %s2941_s1 }
 0x1a1   :  { %613 = vrot.lane.b32.xlu1 %v2608_v0, %s2941_s1  ;;  %v582_v21 = vpop.f32.mrf.mxu1 }
 0x1a4   :  { %657 = vperm.xlu0 %2778, %v552_v60  }
 0x1a5   :  { %662 = vperm.xlu1 %2779, %v2613_v57  }
 0x1a8   :  { %672 = vperm.xlu0 %2778, %v2616_v63  }
 0x1a9   :  { %667 = vperm.xlu1 %2779, %v562_v1  }
 0x1ac   :  { %682 = vperm.xlu0 %2778, %v2619_v3  }
 0x1ad   :  { %677 = vperm.xlu1 %2779, %v572_v4   ;;  %v3236_v4 = vld [vmem:[%s3552_s2 + $0x38] sm:$0xff] }
 0x1ae   :  { %vm60_vm10 = vcmp.ne.f32.partialorder %v3236_v4, 0.0 }
 0x1b0   :  { %692 = vperm.xlu0 %2778, %v2622_v9  }
 0x1b1   :  { %687 = vperm.xlu1 %2779, %v582_v21  }
 0x205   :  { %v600_v22 = vpop.permute.xlu0 %599 }
 0x206   :  { %623 = vxpose.xlu1.b32.start [1/8] (short) (narrow) %v600_v22, 8 }
 0x207   :  { %v606_v23 = vpop.permute.xlu1 %605 }
 0x209   :  { %v602_v24 = vpop.permute.xlu0 %601 }
 0x20a   :  { %624 = vxpose.xlu1.b32.cont [2/8] (short) (narrow) %v602_v24, 8 }
 0x20b   :  { %v604_v25 = vpop.permute.xlu1 %603 }
 0x20d   :  { %v608_v26 = vpop.permute.xlu0 %607 }
 0x20e   :  { %625 = vxpose.xlu1.b32.cont [3/8] (short) (narrow) %v604_v25, 8 }
 0x20f   :  { %v610_v27 = vpop.permute.xlu1 %609 }
 0x212   :  { %626 = vxpose.xlu1.b32.cont [4/8] (short) (narrow) %v606_v23, 8  ;;  %v612_v28 = vpop.permute.xlu0 %611 }
 0x213   :  { %v614_v29 = vpop.permute.xlu1 %613 }
 0x216   :  { %627 = vxpose.xlu1.b32.cont [5/8] (short) (narrow) %v608_v26, 8 }
 0x21a   :  { %628 = vxpose.xlu1.b32.cont [6/8] (short) (narrow) %v610_v27, 8 }
 0x21e   :  { %629 = vxpose.xlu1.b32.cont [7/8] (short) (narrow) %v612_v28, 8 }
 0x21f   :  { %v658_v6 = vpop.permute.xlu0 %657 }
 0x220   :  { %v663_v34 = vpop.permute.xlu1 %662 }
 0x222   :  { %630 = vxpose.xlu1.b32.end [8/8] (short) (narrow) %v614_v29, 8 }
 0x223   :  { %v673_v38 = vpop.permute.xlu0 %672 }
 0x224   :  { %v668_v5 = vpop.permute.xlu1 %667 }
 0x227   :  { %v683_v42 = vpop.permute.xlu0 %682 }
 0x228   :  { %v678_v36 = vpop.permute.xlu1 %677 }
 0x22b   :  { %v693_v63 = vpop.permute.xlu0 %692 }
 0x22c   :  { %v688_v11 = vpop.permute.xlu1 %687 }
 0x282   :  { %v639_v39 = vpop.trf.xlu1 }
 0x283   :  { %v698_v15 = vrot.slane %v639_v39, %v697_v12 }
 0x285   :  { %v699_v43 = vadd.f32 %v698_v15, %v658_v6  ;;  %v700_v44 = vadd.f32 %v698_v15, %v663_v34  ;;  %v701_v45 = vadd.f32 %v698_v15, %v668_v5  ;;  %v702_v46 = vadd.f32 %v698_v15, %v673_v38 }
 0x286   :  { %v703_v48 = vadd.f32 %v698_v15, %v678_v36  ;;  %v704_v50 = vadd.f32 %v698_v15, %v683_v42  ;;  %v705_v56 = vadd.f32 %v698_v15, %v688_v11  ;;  %v706_v1 = vadd.f32 %v698_v15, %v693_v63 }
 0x287   :  { %v707_v51 = vmul.f32 %v699_v43, %v3194_v16  ;;  %v708_v52 = vmul.f32 %v700_v44, %v3199_v19  ;;  %v709_v53 = vmul.f32 %v701_v45, %v3204_v40  ;;  %v710_v54 = vmul.f32 %v702_v46, %v3209_v41 }
 0x288   :  { %v711_v55 = vmul.f32 %v703_v48, %v3214_v47  ;;  %v712_v60 = vmul.f32 %v704_v50, %v3219_v49  ;;  %v713_v3 = vmul.f32 %v705_v56, %v3230_v62  ;;  %v714_v9 = vmul.f32 %v706_v1, %v3236_v4 }
 0x289   :  { %v2301_v57 = vmul.f32 -1.442695, %v707_v51  ;;  %v2302_v58 = vmul.f32 -1.442695, %v708_v52  ;;  %v2303_v59 = vmul.f32 -1.442695, %v709_v53 }
 0x28a   :  { %v2304_v61 = vmul.f32 -1.442695, %v710_v54  ;;  %v2305_v0 = vmul.f32 -1.442695, %v711_v55  ;;  %v2306_v2 = vmul.f32 -1.442695, %v712_v60 }
 0x28b   :  { %2780 = vpow2.f32 %v2301_v57  ;;  %v2307_v21 = vmul.f32 -1.442695, %v713_v3  ;;  %v2308_v22 = vmul.f32 -1.442695, %v714_v9 }
 0x28c   :  { %2782 = vpow2.f32 %v2302_v58 }
 0x28d   :  { %2784 = vpow2.f32 %v2303_v59 }
 0x28e   :  { %2786 = vpow2.f32 %v2304_v61 }
 0x28f   :  { %2788 = vpow2.f32 %v2305_v0 }
 0x290   :  { %2790 = vpow2.f32 %v2306_v2 }
 0x291   :  { %2792 = vpow2.f32 %v2307_v21 }
 0x292   :  { %2794 = vpow2.f32 %v2308_v22 }
 0x298   :  { %v2781_v23 = vpop.eup %2780 }
 0x299   :  { %v2783_v24 = vpop.eup %2782  ;;  %v739_v25 = vadd.f32 1.0, %v2781_v23 }
 0x29a   :  { %v2785_v26 = vpop.eup %2784  ;;  %v740_v27 = vadd.f32 1.0, %v2783_v24 }
 0x29b   :  { %v2787_v28 = vpop.eup %2786  ;;  %2796 = vrcp.f32 %v739_v25  ;;  %v741_v29 = vadd.f32 1.0, %v2785_v26 }
 0x29c   :  { %v2789_v34 = vpop.eup %2788  ;;  %2798 = vrcp.f32 %v740_v27  ;;  %v742_v5 = vadd.f32 1.0, %v2787_v28 }
 0x29d   :  { %2800 = vrcp.f32 %v741_v29  ;;  %v743_v35 = vadd.f32 1.0, %v2789_v34  ;;  %v2791_v36 = vpop.eup %2790 }
 0x29e   :  { %2802 = vrcp.f32 %v742_v5  ;;  %v744_v6 = vadd.f32 1.0, %v2791_v36  ;;  %v2793_v11 = vpop.eup %2792 }
 0x29f   :  { %2804 = vrcp.f32 %v743_v35  ;;  %v2795_v38 = vpop.eup %2794  ;;  %v745_v39 = vadd.f32 1.0, %v2793_v11 }
 0x2a0   :  { %2806 = vrcp.f32 %v744_v6  ;;  %v746_v42 = vadd.f32 1.0, %v2795_v38 }
 0x2a1   :  { %2808 = vrcp.f32 %v745_v39 }
 0x2a2   :  { %2810 = vrcp.f32 %v746_v42 }
 0x2a8   :  { %v2797_v15 = vpop.eup %2796 }
 0x2a9   :  { %v2799_v43 = vpop.eup %2798  ;;  %v2309_v44 = vadd.f32 -0.5, %v2797_v15 }
 0x2aa   :  { %v2801_v45 = vpop.eup %2800  ;;  %v2310_v46 = vadd.f32 -0.5, %v2799_v43 }
 0x2ab   :  { %v2803_v48 = vpop.eup %2802  ;;  %v771_v50 = vmul.f32 1.442695, %v2309_v44  ;;  %v2311_v51 = vadd.f32 -0.5, %v2801_v45 }
 0x2ac   :  { %v773_v52 = vmul.f32 1.442695, %v2310_v46  ;;  %v2312_v54 = vadd.f32 -0.5, %v2803_v48  ;;  %v2805_v55 = vpop.eup %2804 }
 0x2ad   :  { %2812 = vpow2.f32 %v771_v50  ;;  %v775_v53 = vmul.f32 1.442695, %v2311_v51  ;;  %v2313_v57 = vadd.f32 -0.5, %v2805_v55  ;;  %v2807_v58 = vpop.eup %2806  ;;  %v3298_v50 = vld [vmem:[%s3550_s5 + $0x8] sm:$0xff]  ;;  %v3305_v51 = vld [vmem:[%s3551_s4 + $0x1] ss:$0 sm:$0xff] }
 0x2ae   :  { %2814 = vpow2.f32 %v773_v52  ;;  %v777_v56 = vmul.f32 1.442695, %v2312_v54  ;;  %v2314_v60 = vadd.f32 -0.5, %v2807_v58  ;;  %v2809_v61 = vpop.eup %2808  ;;  %2691 = vmatprep.subr.mxu1 %v3298_v50  ;;  %v2661_v52 = vpop.f32.mrf.mxu1 }
 0x2af   :  { %2816 = vpow2.f32 %v775_v53  ;;  %v779_v59 = vmul.f32 1.442695, %v2313_v57  ;;  %v2811_v63 = vpop.eup %2810  ;;  %v2315_v1 = vadd.f32 -0.5, %v2809_v61  ;;  %2692 = vmatpush3.msra.mxu1 %v3298_v50  ;;  %v1133_v53 = vadd.f32 %v2661_v52, %v3305_v51 }
 0x2b0   :  { %2818 = vpow2.f32 %v777_v56  ;;  %v781_v0 = vmul.f32 1.442695, %v2314_v60  ;;  %v2316_v24 = vadd.f32 -0.5, %v2811_v63  ;;  %v1127_v54 = vpop.f32.mrf.mxu1 }
 0x2b1   :  { %2820 = vpow2.f32 %v779_v59  ;;  %v783_v23 = vmul.f32 1.442695, %v2315_v1  ;;  %v1128_v55 = vadd.f32 %v3305_v51, %v1127_v54 }
 0x2b2   :  { %2822 = vpow2.f32 %v781_v0  ;;  %v785_v28 = vmul.f32 1.442695, %v2316_v24  ;;  %v2664_v56 = vpop.f32.mrf.mxu1 }
 0x2b3   :  { %2824 = vpow2.f32 %v783_v23  ;;  %2693 = vmatprep.mubr.msk.f32.mxu1 %vm332_vm1, %v1128_v55  ;;  %v1143_v59 = vadd.f32 %v2664_v56, %v3305_v51 }
 0x2b4   :  { %2826 = vpow2.f32 %v785_v28  ;;  %v1137_v57 = vpop.f32.mrf.mxu1  ;;  %2694 = vmatmul.mubr.msk.f32.vlgmr.msra.gmra.mxu1 %vm332_vm1, %v1133_v53 }
 0x2b5   :  { %v1138_v58 = vadd.f32 %v3305_v51, %v1137_v57 }
 0x2b6   :  { %v2667_v60 = vpop.f32.mrf.mxu1 }
 0x2b7   :  { %2696 = vmatprep.mubr.msk.f32.mxu1 %vm332_vm1, %v1138_v58  ;;  %v1153_v0 = vadd.f32 %v2667_v60, %v3305_v51 }
 0x2b8   :  { %v1147_v61 = vpop.f32.mrf.mxu1  ;;  %2697 = vmatmul.mubr.msk.f32.gmra.mxu1 %vm332_vm1, %v1143_v59 }
 0x2b9   :  { %v1148_v63 = vadd.f32 %v3305_v51, %v1147_v61 }
 0x2ba   :  { %v2813_v2 = vpop.eup %2812  ;;  %v2670_v1 = vpop.f32.mrf.mxu1 }
 0x2bb   :  { %v2815_v3 = vpop.eup %2814  ;;  %v3243_v9 = vsel %vm53_vm2, %v2813_v2, 0.0  ;;  %v1163_v2 = vadd.f32 %v2670_v1, %v3305_v51  ;;  %2699 = vmatprep.mubr.msk.f32.mxu1 %vm332_vm1, %v1148_v63 }
 0x2bc   :  { %v796_v21 = vsel %vm795_vm3, %v3243_v9, 0.0  ;;  %v3249_v22 = vsel %vm54_vm4, %v2815_v3, 0.0  ;;  %v2817_v25 = vpop.eup %2816  ;;  %v1157_v3 = vpop.f32.mrf.mxu1  ;;  %2700 = vmatmul.mubr.msk.f32.gmra.mxu1 %vm332_vm1, %v1153_v0 }
 0x2bd   :  { %797 = vadd.xlane.f32.xlu0 %v796_v21  ;;  %v799_v26 = vsel %vm795_vm3, %v3249_v22, 0.0  ;;  %v3256_v27 = vsel %vm55_vm5, %v2817_v25, 0.0  ;;  %v2819_v29 = vpop.eup %2818  ;;  %v1158_v21 = vadd.f32 %v3305_v51, %v1157_v3  ;;  %2719 = vmatprep.subr.mxu1 %v1163_v2 }
 0x2be   :  { %v802_v34 = vsel %vm795_vm3, %v3256_v27, 0.0  ;;  %v3263_v5 = vsel %vm56_vm6, %v2819_v29, 0.0  ;;  %v2821_v35 = vpop.eup %2820  ;;  %2720 = vmatpush3.msra.mxu1 %v1163_v2 }
 0x2bf   :  { %v805_v36 = vsel %vm795_vm3, %v3263_v5, 0.0  ;;  %v3270_v6 = vsel %vm57_vm7, %v2821_v35, 0.0  ;;  %v2823_v11 = vpop.eup %2822  ;;  %2721 = vmatprep.subr.mxu1 %v1158_v21  ;;  %2702 = vmatprep.mubr.msk.f32.mxu1 %vm332_vm1, %v1158_v21 }
 0x2c0   :  { %v808_v38 = vsel %vm795_vm3, %v3270_v6, 0.0  ;;  %v3277_v39 = vsel %vm58_vm8, %v2823_v11, 0.0  ;;  %v2825_v15 = vpop.eup %2824  ;;  %2722 = vmatpush3.msra.mxu1 %v1158_v21 }
 0x2c1   :  { %800 = vadd.xlane.f32.xlu0 %v799_v26  ;;  %v811_v42 = vsel %vm795_vm3, %v3277_v39, 0.0  ;;  %v3284_v43 = vsel %vm59_vm9, %v2825_v15, 0.0  ;;  %v2827_v44 = vpop.eup %2826  ;;  %2723 = vmatprep.subr.mxu1 %v1153_v0 }
 0x2c2   :  { %v814_v45 = vsel %vm795_vm3, %v3284_v43, 0.0  ;;  %v3291_v46 = vsel %vm60_vm10, %v2827_v44, 0.0  ;;  %2703 = vmatmul.mubr.msk.f32.gmra.mxu1 %vm332_vm1, %v1163_v2 }
 0x2c3   :  { %v817_v48 = vsel %vm795_vm3, %v3291_v46, 0.0  ;;  %2724 = vmatpush3.msra.mxu1 %v1153_v0 }
 0x2c4   :  { %2725 = vmatprep.subr.mxu1 %v1148_v63 }
 0x2c5   :  { %803 = vadd.xlane.f32.xlu0 %v802_v34  ;;  %2726 = vmatpush3.msra.mxu1 %v1148_v63 }
 0x2c6   :  { %2727 = vmatprep.subr.mxu1 %v1143_v59 }
 0x2c7   :  { %2728 = vmatpush3.msra.mxu1 %v1143_v59 }
 0x2c8   :  { %2729 = vmatprep.subr.mxu1 %v1138_v58 }
 0x2c9   :  { %806 = vadd.xlane.f32.xlu0 %v805_v36  ;;  %2730 = vmatpush3.msra.mxu1 %v1138_v58 }
 0x2ca   :  { %2731 = vmatprep.subr.mxu1 %v1133_v53 }
 0x2cb   :  { %2732 = vmatpush3.msra.mxu1 %v1133_v53 }
 0x2cc   :  { %2733 = vmatprep.subr.mxu1 %v1128_v55 }
 0x2cd   :  { %809 = vadd.xlane.f32.xlu0 %v808_v38  ;;  %2734 = vmatpush3.msra.mxu1 %v1128_v55 }
 0x2d1   :  { %812 = vadd.xlane.f32.xlu0 %v811_v42 }
 0x2d5   :  { %815 = vadd.xlane.f32.xlu0 %v814_v45 }
 0x2d9   :  { %818 = vadd.xlane.f32.xlu0 %v817_v48 }
 0x346   :  { %v798_v23 = vpop.xlane.xlu0 %797 }
 0x347   :  { %2828 = vrcp.f32 %v798_v23  ;;  %vm820_vm11 = vcmp.gt.f32.partialorder %v798_v23, 0.0 }
 0x34a   :  { %v801_v24 = vpop.xlane.xlu0 %800 }
 0x34b   :  { %2830 = vrcp.f32 %v801_v24  ;;  %vm821_vm12 = vcmp.gt.f32.partialorder %v801_v24, 0.0 }
 0x34e   :  { %v804_v25 = vpop.xlane.xlu0 %803 }
 0x34f   :  { %2832 = vrcp.f32 %v804_v25  ;;  %vm822_vm13 = vcmp.gt.f32.partialorder %v804_v25, 0.0 }
 0x352   :  { %v807_v26 = vpop.xlane.xlu0 %806 }
 0x353   :  { %2834 = vrcp.f32 %v807_v26  ;;  %vm823_vm14 = vcmp.gt.f32.partialorder %v807_v26, 0.0 }
 0x354   :  { %v2829_v28 = vpop.eup %2828 }
 0x355   :  { %v836_v29 = vmul.f32 %v2829_v28, %v3243_v9 }
 0x356   :  { %v810_v34 = vpop.xlane.xlu0 %809 }
 0x357   :  { %v860_v35 = vsel %vm820_vm11, %v836_v29, 0.0  ;;  %2836 = vrcp.f32 %v810_v34  ;;  %vm824_vm15 = vcmp.gt.f32.partialorder %v810_v34, 0.0 }
 0x358   :  { %v2831_v36 = vpop.eup %2830  ;;  %2639 = vmatprep.mubr.msk.f32.mxu0 %vm795_vm3, %v860_v35 }
 0x359   :  { %v837_v11 = vmul.f32 %v2831_v36, %v3249_v22 }
 0x35a   :  { %v813_v38 = vpop.xlane.xlu0 %812 }
 0x35b   :  { %v861_v15 = vsel %vm821_vm12, %v837_v11, 0.0  ;;  %2838 = vrcp.f32 %v813_v38  ;;  %vm825_vm11 = vcmp.gt.f32.partialorder %v813_v38, 0.0 }
 0x35c   :  { %v2833_v42 = vpop.eup %2832  ;;  %2640 = vmatmul.mubr.msk.f32.vlgmr.msra.gmra.mxu0 %vm795_vm3, %v861_v15 }
 0x35d   :  { %v838_v44 = vmul.f32 %v2833_v42, %v3256_v27  ;;  %2672 = vmatpush3.msra.mxu0 %v3146_v30 }
 0x35e   :  { %v816_v9 = vpop.xlane.xlu0 %815  ;;  %2673 = vmatprep.subr.mxu0 %v3151_v31 }
 0x35f   :  { %v862_v45 = vsel %vm822_vm13, %v838_v44, 0.0  ;;  %2840 = vrcp.f32 %v816_v9  ;;  %2674 = vmatpush3.msra.mxu0 %v3151_v31  ;;  %vm826_vm12 = vcmp.gt.f32.partialorder %v816_v9, 0.0 }
 0x360   :  { %v2835_v22 = vpop.eup %2834  ;;  %2642 = vmatprep.mubr.msk.f32.mxu0 %vm795_vm3, %v862_v45  ;;  %2675 = vmatprep.subr.mxu0 %v3159_v32 }
 0x361   :  { %v839_v48 = vmul.f32 %v2835_v22, %v3263_v5  ;;  %2676 = vmatpush3.msra.mxu0 %v3159_v32 }
 0x362   :  { %v819_v27 = vpop.xlane.xlu0 %818  ;;  %2677 = vmatprep.subr.mxu0 %v3166_v33 }
 0x363   :  { %v863_v30 = vsel %vm823_vm14, %v839_v48, 0.0  ;;  %2842 = vrcp.f32 %v819_v27  ;;  %2678 = vmatpush3.msra.mxu0 %v3166_v33  ;;  %vm827_vm13 = vcmp.gt.f32.partialorder %v819_v27, 0.0 }
 0x364   :  { %v2837_v52 = vpop.eup %2836  ;;  %2643 = vmatmul.mubr.msk.f32.gmra.mxu0 %vm795_vm3, %v863_v30  ;;  %2705 = vmatprep.subr.mxu0 %v3298_v50 }
 0x365   :  { %v840_v31 = vmul.f32 %v2837_v52, %v3270_v6 }
 0x367   :  { %v864_v53 = vsel %vm824_vm15, %v840_v31, 0.0 }
 0x368   :  { %v2839_v5 = vpop.eup %2838  ;;  %2645 = vmatprep.mubr.msk.f32.mxu0 %vm795_vm3, %v864_v53 }
 0x369   :  { %v841_v32 = vmul.f32 %v2839_v5, %v3277_v39 }
 0x36b   :  { %v865_v54 = vsel %vm825_vm11, %v841_v32, 0.0 }
 0x36c   :  { %v2841_v55 = vpop.eup %2840  ;;  %2646 = vmatmul.mubr.msk.f32.gmra.mxu0 %vm795_vm3, %v865_v54 }
 0x36d   :  { %v842_v33 = vmul.f32 %v2841_v55, %v3284_v43 }
 0x36f   :  { %v866_v56 = vsel %vm826_vm12, %v842_v33, 0.0 }
 0x370   :  { %v2843_v57 = vpop.eup %2842  ;;  %2648 = vmatprep.mubr.msk.f32.mxu0 %vm795_vm3, %v866_v56 }
 0x371   :  { %v843_v6 = vmul.f32 %v2843_v57, %v3291_v46 }
 0x373   :  { %v867_v58 = vsel %vm827_vm13, %v843_v6, 0.0 }
 0x374   :  { %2649 = vmatmul.mubr.msk.f32.gmra.mxu0 %vm795_vm3, %v867_v58 }
 0x375   :  { %2679 = vmatprep.mubr.msk.f32.mxu0 %vm73_vm0, %v3019_v7  ;;  %v2695_v7 = vpop.f32.mrf.mxu1 }
 0x376   :  { %1539 = vrot.lane.b32.xlu1 %v2695_v7, %s2941_s1 }
 0x378   :  { %2680 = vmatmul.mubr.msk.f32.vlgmr.msra.gmra.mxu0 %vm73_vm0, %v3024_v8  ;;  %v1361_v8 = vpop.f32.mrf.mxu1 }
 0x379   :  { %2682 = vmatprep.mubr.msk.f32.mxu0 %vm73_vm0, %v3034_v10  ;;  %2706 = vmatpush3.msra.mxu0 %v3298_v50 }
 0x37a   :  { %1537 = vrot.lane.b32.xlu0 %v1361_v8, %s2941_s1  ;;  %v2698_v10 = vpop.f32.mrf.mxu1 }
 0x37c   :  { %2683 = vmatmul.mubr.msk.f32.gmra.mxu0 %vm73_vm0, %v3057_v13  ;;  %v1371_v13 = vpop.f32.mrf.mxu1 }
 0x37d   :  { %2685 = vmatprep.mubr.msk.f32.mxu0 %vm73_vm0, %v3064_v14 }
 0x37e   :  { %1541 = vrot.lane.b32.xlu0 %v1371_v13, %s2941_s1  ;;  %v2701_v14 = vpop.f32.mrf.mxu1 }
 0x380   :  { %2686 = vmatmul.mubr.msk.f32.gmra.mxu0 %vm73_vm0, %v3085_v17  ;;  %v1381_v17 = vpop.f32.mrf.mxu1 }
 0x381   :  { %2688 = vmatprep.mubr.msk.f32.mxu0 %vm73_vm0, %v3092_v18 }
 0x382   :  { %1543 = vrot.lane.b32.xlu0 %v2698_v10, %s2941_s1  ;;  %v2704_v39 = vpop.f32.mrf.mxu1 }
 0x384   :  { %2689 = vmatmul.mubr.msk.f32.gmra.mxu0 %vm73_vm0, %v3108_v20  ;;  %v1391_v18 = vpop.f32.mrf.mxu1 }
 0x385   :  { %1549 = vrot.lane.b32.xlu1 %v1391_v18, %s2941_s1 }
 0x386   :  { %1545 = vrot.lane.b32.xlu0 %v1381_v17, %s2941_s1 }
 0x38a   :  { %1547 = vrot.lane.b32.xlu0 %v2701_v14, %s2941_s1 }
 0x38e   :  { %1551 = vrot.lane.b32.xlu0 %v2704_v39, %s2941_s1 }
 0x3e8   :  { %v1540_v52 = vpop.permute.xlu1 %1539 }
 0x3f7   :  { %v1550_v32 = vpop.permute.xlu1 %1549 }
 0x41c   :  { %v3372_v20 = vpop.f32.mrf.mxu0 }
 0x41d   :  { %vm998_vm14 = vcmp.gt.f32.partialorder %v3372_v20, 0.0 }
 0x41e   :  { %v3374_v43 = vpop.f32.mrf.mxu0 }
 0x424   :  { %v3376_v46 = vpop.f32.mrf.mxu0 }
 0x426   :  { %v3378_v50 = vpop.f32.mrf.mxu0 }
 0x427   :  { %vm999_vm15 = vcmp.gt.f32.partialorder %v3378_v50, 0.0 }
 0x42c   :  { %v3380_v59 = vpop.f32.mrf.mxu0 }
 0x42d   :  { %vm1002_vm12 = vcmp.gt.f32.partialorder %v3380_v59, 0.0 }
 0x42e   :  { %v3382_v60 = vpop.f32.mrf.mxu0 }
 0x42f   :  { %vm1001_vm11 = vcmp.gt.f32.partialorder %v3382_v60, 0.0 }
 0x434   :  { %v3384_v61 = vpop.f32.mrf.mxu0 }
 0x436   :  { %v3386_v63 = vpop.f32.mrf.mxu0 }
 0x437   :  { %vm1003_vm13 = vcmp.gt.f32.partialorder %v3386_v63, 0.0 }
 0x438   :  { %v2681_v0 = vpop.f32.mrf.mxu0 }
 0x439   :  { %v1238_v3 = vadd.f32 %v2681_v0, %v3305_v51 }
 0x43a   :  { %v1232_v1 = vpop.f32.mrf.mxu0 }
 0x43b   :  { %v1233_v2 = vadd.f32 %v3305_v51, %v1232_v1 }
 0x43c   :  { %v2684_v21 = vpop.f32.mrf.mxu0 }
 0x43d   :  { %2707 = vmatprep.mubr.msk.f32.mxu0 %vm332_vm1, %v1233_v2  ;;  %v1248_v25 = vadd.f32 %v2684_v21, %v3305_v51 }
 0x43e   :  { %v1242_v23 = vpop.f32.mrf.mxu0  ;;  %2708 = vmatmul.mubr.msk.f32.vlgmr.msra.gmra.mxu0 %vm332_vm1, %v1238_v3 }
 0x43f   :  { %v1243_v24 = vadd.f32 %v3305_v51, %v1242_v23 }
 0x440   :  { %v2687_v26 = vpop.f32.mrf.mxu0 }
 0x441   :  { %2710 = vmatprep.mubr.msk.f32.mxu0 %vm332_vm1, %v1243_v24  ;;  %v1258_v34 = vadd.f32 %v2687_v26, %v3305_v51 }
 0x442   :  { %v1252_v28 = vpop.f32.mrf.mxu0  ;;  %2711 = vmatmul.mubr.msk.f32.gmra.mxu0 %vm332_vm1, %v1248_v25 }
 0x443   :  { %v1253_v29 = vadd.f32 %v3305_v51, %v1252_v28 }
 0x444   :  { %v2690_v35 = vpop.f32.mrf.mxu0 }
 0x445   :  { %2713 = vmatprep.mubr.msk.f32.mxu0 %vm332_vm1, %v1253_v29  ;;  %v1268_v38 = vadd.f32 %v2690_v35, %v3305_v51 }
 0x446   :  { %v1262_v36 = vpop.f32.mrf.mxu0  ;;  %2714 = vmatmul.mubr.msk.f32.gmra.mxu0 %vm332_vm1, %v1258_v34 }
 0x447   :  { %v1263_v11 = vadd.f32 %v3305_v51, %v1262_v36  ;;  %v1538_v51 = vpop.permute.xlu0 %1537 }
 0x449   :  { %2716 = vmatprep.mubr.msk.f32.mxu0 %vm332_vm1, %v1263_v11 }
 0x44a   :  { %2717 = vmatmul.mubr.msk.f32.gmra.mxu0 %vm332_vm1, %v1268_v38 }
 0x44b   :  { %v1542_v30 = vpop.permute.xlu0 %1541 }
 0x44f   :  { %v1544_v31 = vpop.permute.xlu0 %1543 }
 0x453   :  { %v1546_v53 = vpop.permute.xlu0 %1545 }
 0x457   :  { %v1548_v5 = vpop.permute.xlu0 %1547 }
 0x45b   :  { %v1552_v54 = vpop.permute.xlu0 %1551 }
 0x4fe   :  { %v2709_v15 = vpop.f32.mrf.mxu0 }
 0x4ff   :  { %1600 = vperm.xlu0 %2778, %v2709_v15  }
 0x500   :  { %v1490_v42 = vpop.f32.mrf.mxu0 }
 0x501   :  { %1595 = vperm.xlu1 %2779, %v1490_v42  }
 0x502   :  { %v2712_v44 = vpop.f32.mrf.mxu0 }
 0x503   :  { %1610 = vperm.xlu0 %2778, %v2712_v44  }
 0x504   :  { %v1500_v9 = vpop.f32.mrf.mxu0 }
 0x505   :  { %1605 = vperm.xlu1 %2779, %v1500_v9  }
 0x506   :  { %v2715_v45 = vpop.f32.mrf.mxu0 }
 0x507   :  { %1620 = vperm.xlu0 %2778, %v2715_v45  }
 0x508   :  { %v1510_v22 = vpop.f32.mrf.mxu0 }
 0x509   :  { %1615 = vperm.xlu1 %2779, %v1510_v22  }
 0x50a   :  { %v2718_v48 = vpop.f32.mrf.mxu0 }
 0x50b   :  { %1630 = vperm.xlu0 %2778, %v2718_v48  }
 0x50c   :  { %v1520_v27 = vpop.f32.mrf.mxu0 }
 0x50d   :  { %1625 = vperm.xlu1 %2779, %v1520_v27  }
 0x536   :  { %1561 = vxpose.xlu1.b32.start [1/8] (short) (narrow) %v1538_v51, 8 }
 0x53a   :  { %1562 = vxpose.xlu1.b32.cont [2/8] (short) (narrow) %v1540_v52, 8 }
 0x53e   :  { %1563 = vxpose.xlu1.b32.cont [3/8] (short) (narrow) %v1542_v30, 8 }
 0x542   :  { %1564 = vxpose.xlu1.b32.cont [4/8] (short) (narrow) %v1544_v31, 8 }
 0x546   :  { %1565 = vxpose.xlu1.b32.cont [5/8] (short) (narrow) %v1546_v53, 8 }
 0x54a   :  { %1566 = vxpose.xlu1.b32.cont [6/8] (short) (narrow) %v1548_v5, 8 }
 0x54e   :  { %1567 = vxpose.xlu1.b32.cont [7/8] (short) (narrow) %v1550_v32, 8 }
 0x552   :  { %1568 = vxpose.xlu1.b32.end [8/8] (short) (narrow) %v1552_v54, 8 }
 0x57a   :  { %v1601_v57 = vpop.permute.xlu0 %1600 }
 0x57c   :  { %v1596_v55 = vpop.permute.xlu1 %1595 }
 0x57e   :  { %v1611_v58 = vpop.permute.xlu0 %1610 }
 0x580   :  { %v1606_v33 = vpop.permute.xlu1 %1605 }
 0x582   :  { %v1621_v10 = vpop.permute.xlu0 %1620 }
 0x584   :  { %v1616_v56 = vpop.permute.xlu1 %1615 }
 0x586   :  { %v1631_v29 = vpop.permute.xlu0 %1630 }
 0x588   :  { %v1626_v6 = vpop.permute.xlu1 %1625 }
 0x5b2   :  { %v1577_v7 = vpop.trf.xlu1 }
 0x5b3   :  { %v1636_v8 = vrot.slane %v1577_v7, %v697_v12 }
 0x5b5   :  { %v1638_v13 = vadd.f32 %v1636_v8, %v1601_v57  ;;  %v1637_v14 = vadd.f32 %v1636_v8, %v1596_v55  ;;  %v1640_v17 = vadd.f32 %v1636_v8, %v1611_v58  ;;  %v1639_v39 = vadd.f32 %v1636_v8, %v1606_v33 }
 0x5b6   :  { %v1642_v18 = vadd.f32 %v1636_v8, %v1621_v10  ;;  %v1641_v0 = vadd.f32 %v1636_v8, %v1616_v56  ;;  %v1643_v24 = vadd.f32 %v1636_v8, %v1626_v6  ;;  %v1644_v35 = vadd.f32 %v1636_v8, %v1631_v29 }
 0x5b7   :  { %v1646_v1 = vmul.f32 %v1638_v13, %v3199_v19  ;;  %v1645_v2 = vmul.f32 %v1637_v14, %v3194_v16  ;;  %v1648_v3 = vmul.f32 %v1640_v17, %v3209_v41  ;;  %v1647_v21 = vmul.f32 %v1639_v39, %v3204_v40 }
 0x5b8   :  { %v1650_v23 = vmul.f32 %v1642_v18, %v3219_v49  ;;  %v1649_v26 = vmul.f32 %v1641_v0, %v3214_v47  ;;  %v1651_v11 = vmul.f32 %v1643_v24, %v3230_v62  ;;  %v1652_v38 = vmul.f32 %v1644_v35, %v3236_v4 }
 0x5b9   :  { %v2373_v37 = vmul.f32 -1.442695, %v1646_v1  ;;  %v2372_v12 = vmul.f32 -1.442695, %v1645_v2  ;;  %v2375_v25 = vmul.f32 -1.442695, %v1648_v3 }
 0x5ba   :  { %v2374_v28 = vmul.f32 -1.442695, %v1647_v21  ;;  %v2377_v34 = vmul.f32 -1.442695, %v1650_v23  ;;  %v2376_v36 = vmul.f32 -1.442695, %v1649_v26 }
 0x5bb   :  { %2844 = vpow2.f32 %v2373_v37  ;;  %v2378_v15 = vmul.f32 -1.442695, %v1651_v11  ;;  %v2379_v42 = vmul.f32 -1.442695, %v1652_v38 }
 0x5bc   :  { %2846 = vpow2.f32 %v2372_v12 }
 0x5bd   :  { %2848 = vpow2.f32 %v2375_v25 }
 0x5be   :  { %2850 = vpow2.f32 %v2374_v28 }
 0x5bf   :  { %2852 = vpow2.f32 %v2377_v34 }
 0x5c0   :  { %2854 = vpow2.f32 %v2376_v36 }
 0x5c1   :  { %2856 = vpow2.f32 %v2378_v15 }
 0x5c2   :  { %2858 = vpow2.f32 %v2379_v42 }
 0x5c8   :  { %v2845_v44 = vpop.eup %2844 }
 0x5c9   :  { %v2847_v9 = vpop.eup %2846  ;;  %v1678_v45 = vadd.f32 1.0, %v2845_v44 }
 0x5ca   :  { %v2849_v22 = vpop.eup %2848  ;;  %v1677_v48 = vadd.f32 1.0, %v2847_v9 }
 0x5cb   :  { %v2851_v27 = vpop.eup %2850  ;;  %2860 = vrcp.f32 %v1678_v45  ;;  %v1680_v51 = vadd.f32 1.0, %v2849_v22 }
 0x5cc   :  { %v2853_v30 = vpop.eup %2852  ;;  %2862 = vrcp.f32 %v1677_v48  ;;  %v1679_v52 = vadd.f32 1.0, %v2851_v27 }
 0x5cd   :  { %2864 = vrcp.f32 %v1680_v51  ;;  %v1682_v31 = vadd.f32 1.0, %v2853_v30  ;;  %v2855_v53 = vpop.eup %2854 }
 0x5ce   :  { %2866 = vrcp.f32 %v1679_v52  ;;  %v1681_v5 = vadd.f32 1.0, %v2855_v53  ;;  %v2857_v32 = vpop.eup %2856  ;;  %v1045_v53 = vld [vmem:[%s3553_s6] sm:$0xff] }
 0x5cf   :  { %2868 = vrcp.f32 %v1682_v31  ;;  %v2859_v54 = vpop.eup %2858  ;;  %v1683_v55 = vadd.f32 1.0, %v2857_v32  ;;  %2761 = vmatprep.subr.mxu1 %v1045_v53 }
 0x5d0   :  { %2870 = vrcp.f32 %v1681_v5  ;;  %v1684_v56 = vadd.f32 1.0, %v2859_v54 }
 0x5d1   :  { %2872 = vrcp.f32 %v1683_v55 }
 0x5d2   :  { %2874 = vrcp.f32 %v1684_v56  ;;  %v1005_v56 = vmin.f32 %v3374_v43, 0.0 }
 0x5d8   :  { %v2861_v33 = vpop.eup %2860 }
 0x5d9   :  { %v2863_v57 = vpop.eup %2862  ;;  %v2381_v6 = vadd.f32 -0.5, %v2861_v33 }
 0x5da   :  { %v2865_v58 = vpop.eup %2864  ;;  %v2380_v7 = vadd.f32 -0.5, %v2863_v57 }
 0x5db   :  { %v2867_v8 = vpop.eup %2866  ;;  %v1711_v10 = vmul.f32 1.442695, %v2381_v6  ;;  %v2383_v13 = vadd.f32 -0.5, %v2865_v58  ;;  %v1006_v58 = vmin.f32 %v3372_v20, 0.0 }
 0x5dc   :  { %v1709_v14 = vmul.f32 1.442695, %v2380_v7  ;;  %v2382_v39 = vadd.f32 -0.5, %v2867_v8  ;;  %v2869_v18 = vpop.eup %2868 }
 0x5dd   :  { %2876 = vpow2.f32 %v1711_v10  ;;  %v1715_v17 = vmul.f32 1.442695, %v2383_v13  ;;  %v2385_v1 = vadd.f32 -0.5, %v2869_v18  ;;  %v2871_v2 = vpop.eup %2870  ;;  %v1013_v10 = vmul.f32 1.442695, %v1005_v56 }
 0x5de   :  { %2878 = vpow2.f32 %v1709_v14  ;;  %v1713_v0 = vmul.f32 1.442695, %v2382_v39  ;;  %v2384_v21 = vadd.f32 -0.5, %v2871_v2  ;;  %v2873_v23 = vpop.eup %2872  ;;  %v1007_v13 = vmin.f32 %v3378_v50, 0.0 }
 0x5df   :  { %2880 = vpow2.f32 %v1715_v17  ;;  %v1719_v3 = vmul.f32 1.442695, %v2385_v1  ;;  %v2875_v24 = vpop.eup %2874  ;;  %v2386_v12 = vadd.f32 -0.5, %v2873_v23  ;;  %v1015_v39 = vmul.f32 1.442695, %v1006_v58 }
 0x5e0   :  { %2882 = vpow2.f32 %v1713_v0  ;;  %v1717_v37 = vmul.f32 1.442695, %v2384_v21  ;;  %v2387_v36 = vadd.f32 -0.5, %v2875_v24  ;;  %v1008_v18 = vmin.f32 %v3376_v46, 0.0 }
 0x5e1   :  { %2884 = vpow2.f32 %v1719_v3  ;;  %v1721_v35 = vmul.f32 1.442695, %v2386_v12  ;;  %v1017_v2 = vmul.f32 1.442695, %v1007_v13  ;;  %v1009_v3 = vmin.f32 %v3382_v60, 0.0 }
 0x5e2   :  { %2886 = vpow2.f32 %v1717_v37  ;;  %v1723_v19 = vmul.f32 1.442695, %v2387_v36  ;;  %v1019_v24 = vmul.f32 1.442695, %v1008_v18  ;;  %v1010_v12 = vmin.f32 %v3380_v59, 0.0 }
 0x5e3   :  { %2888 = vpow2.f32 %v1721_v35  ;;  %v1012_v36 = vmin.f32 %v3384_v61, 0.0 }
 0x5e4   :  { %2890 = vpow2.f32 %v1723_v19  ;;  %v1023_v35 = vmul.f32 1.442695, %v1010_v12 }
 0x5ea   :  { %v2877_v25 = vpop.eup %2876 }
 0x5eb   :  { %v2879_v26 = vpop.eup %2878  ;;  %v1726_v28 = vsel %vm54_vm4, %v2877_v25, 0.0 }
 0x5ec   :  { %v1736_v29 = vsel %vm795_vm3, %v1726_v28, 0.0  ;;  %v1725_v34 = vsel %vm53_vm2, %v2879_v26, 0.0  ;;  %v2881_v11 = vpop.eup %2880  ;;  %v1021_v26 = vmul.f32 1.442695, %v1009_v3 }
 0x5ed   :  { %1737 = vadd.xlane.f32.xlu0 %v1736_v29  ;;  %v1733_v38 = vsel %vm795_vm3, %v1725_v34, 0.0  ;;  %v3422_v15 = vsel %vm56_vm6, %v2881_v11, 0.0  ;;  %v2883_v42 = vpop.eup %2882 }
 0x5ee   :  { %v1742_v44 = vsel %vm795_vm3, %v3422_v15, 0.0  ;;  %v1727_v16 = vsel %vm55_vm5, %v2883_v42, 0.0  ;;  %v2885_v9 = vpop.eup %2884  ;;  %v1027_v42 = vmul.f32 1.442695, %v1012_v36 }
 0x5ef   :  { %v1739_v45 = vsel %vm795_vm3, %v1727_v16, 0.0  ;;  %v3431_v41 = vsel %vm58_vm8, %v2885_v9, 0.0  ;;  %v2887_v22 = vpop.eup %2886 }
 0x5f0   :  { %v1748_v48 = vsel %vm795_vm3, %v3431_v41, 0.0  ;;  %v3437_v27 = vsel %vm57_vm7, %v2887_v22, 0.0  ;;  %v2889_v40 = vpop.eup %2888 }
 0x5f1   :  { %1734 = vadd.xlane.f32.xlu0 %v1733_v38  ;;  %v1745_v51 = vsel %vm795_vm3, %v3437_v27, 0.0  ;;  %v3443_v30 = vsel %vm59_vm9, %v2889_v40, 0.0  ;;  %v2891_v49 = vpop.eup %2890 }
 0x5f2   :  { %v1751_v52 = vsel %vm795_vm3, %v3443_v30, 0.0  ;;  %v3449_v31 = vsel %vm60_vm10, %v2891_v49, 0.0  ;;  %vm997_vm10 = vcmp.gt.f32.partialorder %v3374_v43, 0.0 }
 0x5f3   :  { %v1754_v47 = vsel %vm795_vm3, %v3449_v31, 0.0 }
 0x5f5   :  { %1743 = vadd.xlane.f32.xlu0 %v1742_v44 }
 0x5f9   :  { %1740 = vadd.xlane.f32.xlu0 %v1739_v45 }
 0x5fd   :  { %1749 = vadd.xlane.f32.xlu0 %v1748_v48 }
 0x601   :  { %1746 = vadd.xlane.f32.xlu0 %v1745_v51 }
 0x605   :  { %1752 = vadd.xlane.f32.xlu0 %v1751_v52 }
 0x609   :  { %1755 = vadd.xlane.f32.xlu0 %v1754_v47 }
 0x676   :  { %v1738_v62 = vpop.xlane.xlu0 %1737 }
 0x677   :  { %2892 = vrcp.f32 %v1738_v62  ;;  %vm1758_vm2 = vcmp.gt.f32.partialorder %v1738_v62, 0.0 }
 0x67a   :  { %v1735_v5 = vpop.xlane.xlu0 %1734 }
 0x67b   :  { %2894 = vrcp.f32 %v1735_v5  ;;  %vm1757_vm0 = vcmp.gt.f32.partialorder %v1735_v5, 0.0 }
 0x67e   :  { %v1744_v32 = vpop.xlane.xlu0 %1743 }
 0x67f   :  { %2896 = vrcp.f32 %v1744_v32  ;;  %vm1760_vm5 = vcmp.gt.f32.partialorder %v1744_v32, 0.0 }
 0x682   :  { %v1741_v54 = vpop.xlane.xlu0 %1740 }
 0x683   :  { %2898 = vrcp.f32 %v1741_v54  ;;  %vm1759_vm4 = vcmp.gt.f32.partialorder %v1741_v54, 0.0 }
 0x684   :  { %v2893_v4 = vpop.eup %2892 }
 0x685   :  { %v1774_v57 = vmul.f32 %v2893_v4, %v1726_v28  ;;  %v1011_v28 = vmin.f32 %v3386_v63, 0.0 }
 0x686   :  { %v1750_v55 = vpop.xlane.xlu0 %1749 }
 0x687   :  { %2900 = vrcp.f32 %v1750_v55  ;;  %v1798_v14 = vsel %vm1758_vm2, %v1774_v57, 0.0  ;;  %v1025_v38 = vmul.f32 1.442695, %v1011_v28  ;;  %vm1762_vm7 = vcmp.gt.f32.partialorder %v1750_v55, 0.0 }
 0x688   :  { %v2895_v33 = vpop.eup %2894 }
 0x689   :  { %v1773_v6 = vmul.f32 %v2895_v33, %v1725_v34 }
 0x68a   :  { %v1747_v7 = vpop.xlane.xlu0 %1746 }
 0x68b   :  { %v1797_v8 = vsel %vm1757_vm0, %v1773_v6, 0.0  ;;  %2902 = vrcp.f32 %v1747_v7  ;;  %vm1761_vm6 = vcmp.gt.f32.partialorder %v1747_v7, 0.0  ;;  %vm1004_vm0 = vcmp.gt.f32.partialorder %v3384_v61, 0.0  ;;  %v1982_v7 = vld [vmem:[%s3553_s6 + $0x8] sm:$0xff] }
 0x68c   :  { %2735 = vmatprep.mubr.msk.f32.mxu1 %vm795_vm3, %v1797_v8  ;;  %v2897_v17 = vpop.eup %2896  ;;  %2747 = vmatprep.subr.mxu0 %v1982_v7 }
 0x68d   :  { %2736 = vmatmul.mubr.msk.f32.vlgmr.msra.gmra.mxu1 %vm795_vm3, %v1798_v14  ;;  %v1776_v21 = vmul.f32 %v2897_v17, %v3422_v15  ;;  %2748 = vmatpush3.msra.mxu0 %v1982_v7 }
 0x68e   :  { %v1753_v0 = vpop.xlane.xlu0 %1752  ;;  %2762 = vmatpush3.msra.mxu1 %v1045_v53 }
 0x68f   :  { %2904 = vrcp.f32 %v1753_v0  ;;  %v1800_v29 = vsel %vm1760_vm5, %v1776_v21, 0.0  ;;  %vm1763_vm8 = vcmp.gt.f32.partialorder %v1753_v0, 0.0 }
 0x690   :  { %v2899_v1 = vpop.eup %2898  ;;  %2906 = vpow2.f32 %v1013_v10 }
 0x691   :  { %v1775_v23 = vmul.f32 %v2899_v1, %v1727_v16  ;;  %2908 = vpow2.f32 %v1015_v39 }
 0x692   :  { %v1756_v37 = vpop.xlane.xlu0 %1755 }
 0x693   :  { %v1799_v25 = vsel %vm1759_vm4, %v1775_v23, 0.0  ;;  %2910 = vrcp.f32 %v1756_v37  ;;  %vm1764_vm9 = vcmp.gt.f32.partialorder %v1756_v37, 0.0 }
 0x694   :  { %2912 = vpow2.f32 %v1017_v2  ;;  %2738 = vmatprep.mubr.msk.f32.mxu1 %vm795_vm3, %v1799_v25  ;;  %v2901_v34 = vpop.eup %2900 }
 0x695   :  { %2739 = vmatmul.mubr.msk.f32.gmra.mxu1 %vm795_vm3, %v1800_v29  ;;  %2914 = vpow2.f32 %v1019_v24  ;;  %v1778_v15 = vmul.f32 %v2901_v34, %v3431_v41 }
 0x696   :  { %2916 = vpow2.f32 %v1021_v26 }
 0x697   :  { %2918 = vpow2.f32 %v1023_v35  ;;  %v1802_v9 = vsel %vm1762_vm7, %v1778_v15, 0.0 }
 0x698   :  { %v2903_v11 = vpop.eup %2902  ;;  %2920 = vpow2.f32 %v1025_v38 }
 0x699   :  { %v1777_v19 = vmul.f32 %v2903_v11, %v3437_v27  ;;  %2922 = vpow2.f32 %v1027_v42 }
 0x69b   :  { %v1801_v44 = vsel %vm1761_vm6, %v1777_v19, 0.0 }
 0x69c   :  { %v2905_v16 = vpop.eup %2904  ;;  %2741 = vmatprep.mubr.msk.f32.mxu1 %vm795_vm3, %v1801_v44 }
 0x69d   :  { %v2907_v45 = vpop.eup %2906  ;;  %v1779_v22 = vmul.f32 %v2905_v16, %v3443_v30  ;;  %2742 = vmatmul.mubr.msk.f32.gmra.mxu1 %vm795_vm3, %v1802_v9 }
 0x69e   :  { %v2909_v48 = vpop.eup %2908  ;;  %v2325_v40 = vadd.f32 -1.0, %v2907_v45 }
 0x69f   :  { %v1803_v41 = vsel %vm1763_vm8, %v1779_v22, 0.0  ;;  %v2326_v52 = vadd.f32 -1.0, %v2909_v48 }
 0x6a0   :  { %v2911_v27 = vpop.eup %2910  ;;  %2744 = vmatprep.mubr.msk.f32.mxu1 %vm795_vm3, %v1803_v41  ;;  %v1037_v30 = vsel %vm997_vm10, %v3374_v43, %v2325_v40 }
 0x6a1   :  { %v2913_v51 = vpop.eup %2912  ;;  %v1780_v49 = vmul.f32 %v2911_v27, %v3449_v31  ;;  %v1038_v32 = vsel %vm998_vm14, %v3372_v20, %v2326_v52 }
 0x6a2   :  { %v2915_v53 = vpop.eup %2914  ;;  %v2327_v62 = vadd.f32 -1.0, %v2913_v51 }
 0x6a3   :  { %v1804_v47 = vsel %vm1764_vm9, %v1780_v49, 0.0  ;;  %v2917_v5 = vpop.eup %2916  ;;  %v2328_v31 = vadd.f32 -1.0, %v2915_v53 }
 0x6a4   :  { %2745 = vmatmul.mubr.msk.f32.gmra.mxu1 %vm795_vm3, %v1804_v47  ;;  %v2919_v54 = vpop.eup %2918  ;;  %v1039_v4 = vsel %vm999_vm15, %v3378_v50, %v2327_v62  ;;  %v2329_v55 = vadd.f32 -1.0, %v2917_v5  ;;  %vm1000_vm3 = vcmp.gt.f32.partialorder %v3376_v46, 0.0 }
 0x6a5   :  { %2763 = vmatprep.mubr.msk.f32.mxu1 %vm332_vm1, %v1037_v30  ;;  %v2921_v33 = vpop.eup %2920  ;;  %v1040_v43 = vsel %vm1000_vm3, %v3376_v46, %v2328_v31  ;;  %v2330_v56 = vadd.f32 -1.0, %v2919_v54  ;;  %v2420_v54 = vld [vmem:[%s3554_s7] ss:$0 sm:$0xff] }
 0x6a6   :  { %v2923_v20 = vpop.eup %2922  ;;  %v1041_v57 = vsel %vm1001_vm11, %v3382_v60, %v2329_v55  ;;  %v2331_v6 = vadd.f32 -1.0, %v2921_v33 }
 0x6a7   :  { %v1042_v50 = vsel %vm1002_vm12, %v3380_v59, %v2330_v56  ;;  %v2332_v58 = vadd.f32 -1.0, %v2923_v20 }
 0x6a8   :  { %2764 = vmatmul.mubr.msk.f32.vlgmr.msra.gmra.mxu1 %vm332_vm1, %v1038_v32  ;;  %v1043_v46 = vsel %vm1003_vm13, %v3386_v63, %v2331_v6 }
 0x6a9   :  { %2766 = vmatprep.mubr.msk.f32.mxu1 %vm332_vm1, %v1039_v4  ;;  %v1044_v60 = vsel %vm1004_vm0, %v3384_v61, %v2332_v58 }
 0x6ac   :  { %2767 = vmatmul.mubr.msk.f32.gmra.mxu1 %vm332_vm1, %v1040_v43 }
 0x6ad   :  { %2769 = vmatprep.mubr.msk.f32.mxu1 %vm332_vm1, %v1041_v57 }
 0x6b0   :  { %2770 = vmatmul.mubr.msk.f32.gmra.mxu1 %vm332_vm1, %v1042_v50 }
 0x6b1   :  { %2772 = vmatprep.mubr.msk.f32.mxu1 %vm332_vm1, %v1043_v46 }
 0x6b4   :  { %2773 = vmatmul.mubr.msk.f32.gmra.mxu1 %vm332_vm1, %v1044_v60 }
 0x74d   :  { %v2737_v59 = vpop.f32.mrf.mxu1 }
 0x74e   :  { %v1943_v8 = vmin.f32 %v2737_v59, 0.0  ;;  %vm1935_vm4 = vcmp.gt.f32.partialorder %v2737_v59, 0.0 }
 0x74f   :  { %v1895_v10 = vpop.f32.mrf.mxu1 }
 0x750   :  { %v1952_v13 = vmul.f32 1.442695, %v1943_v8  ;;  %v1942_v14 = vmin.f32 %v1895_v10, 0.0  ;;  %vm1934_vm2 = vcmp.gt.f32.partialorder %v1895_v10, 0.0 }
 0x752   :  { %2924 = vpow2.f32 %v1952_v13  ;;  %v1950_v63 = vmul.f32 1.442695, %v1942_v14 }
 0x754   :  { %2926 = vpow2.f32 %v1950_v63 }
 0x755   :  { %v2740_v17 = vpop.f32.mrf.mxu1 }
 0x756   :  { %v1945_v39 = vmin.f32 %v2740_v17, 0.0  ;;  %vm1937_vm6 = vcmp.gt.f32.partialorder %v2740_v17, 0.0 }
 0x757   :  { %v1905_v18 = vpop.f32.mrf.mxu1 }
 0x758   :  { %v1956_v61 = vmul.f32 1.442695, %v1945_v39  ;;  %v1944_v0 = vmin.f32 %v1905_v18, 0.0  ;;  %vm1936_vm5 = vcmp.gt.f32.partialorder %v1905_v18, 0.0 }
 0x75a   :  { %2928 = vpow2.f32 %v1956_v61  ;;  %v1954_v1 = vmul.f32 1.442695, %v1944_v0 }
 0x75c   :  { %2930 = vpow2.f32 %v1954_v1 }
 0x75d   :  { %v2743_v2 = vpop.f32.mrf.mxu1 }
 0x75e   :  { %v1947_v3 = vmin.f32 %v2743_v2, 0.0  ;;  %vm1939_vm8 = vcmp.gt.f32.partialorder %v2743_v2, 0.0 }
 0x75f   :  { %v2925_v21 = vpop.eup %2924  ;;  %v1915_v23 = vpop.f32.mrf.mxu1 }
 0x760   :  { %v1960_v24 = vmul.f32 1.442695, %v1947_v3  ;;  %v1946_v37 = vmin.f32 %v1915_v23, 0.0  ;;  %v2397_v25 = vadd.f32 -1.0, %v2925_v21  ;;  %vm1938_vm7 = vcmp.gt.f32.partialorder %v1915_v23, 0.0 }
 0x761   :  { %v2927_v12 = vpop.eup %2926 }
 0x762   :  { %2932 = vpow2.f32 %v1960_v24  ;;  %v1958_v26 = vmul.f32 1.442695, %v1946_v37  ;;  %v2396_v28 = vadd.f32 -1.0, %v2927_v12  ;;  %v1975_v35 = vsel %vm1935_vm4, %v2737_v59, %v2397_v25 }
 0x764   :  { %2934 = vpow2.f32 %v1958_v26  ;;  %v2746_v29 = vpop.f32.mrf.mxu1  ;;  %v1974_v34 = vsel %vm1934_vm2, %v1895_v10, %v2396_v28 }
 0x765   :  { %v1949_v36 = vmin.f32 %v2746_v29, 0.0  ;;  %2749 = vmatprep.mubr.msk.f32.mxu0 %vm332_vm1, %v1974_v34  ;;  %vm1941_vm10 = vcmp.gt.f32.partialorder %v2746_v29, 0.0 }
 0x766   :  { %v1925_v11 = vpop.f32.mrf.mxu1  ;;  %2750 = vmatmul.mubr.msk.f32.vlgmr.msra.gmra.mxu0 %vm332_vm1, %v1975_v35 }
 0x767   :  { %v2929_v38 = vpop.eup %2928  ;;  %v1964_v15 = vmul.f32 1.442695, %v1949_v36  ;;  %v1948_v19 = vmin.f32 %v1925_v11, 0.0  ;;  %vm1940_vm9 = vcmp.gt.f32.partialorder %v1925_v11, 0.0 }
 0x768   :  { %v2399_v16 = vadd.f32 -1.0, %v2929_v38  ;;  %v2765_v32 = vpop.f32.mrf.mxu1 }
 0x769   :  { %v2931_v42 = vpop.eup %2930  ;;  %2936 = vpow2.f32 %v1964_v15  ;;  %v1962_v44 = vmul.f32 1.442695, %v1948_v19 }
 0x76a   :  { %v2398_v9 = vadd.f32 -1.0, %v2931_v42  ;;  %v1977_v22 = vsel %vm1937_vm6, %v2740_v17, %v2399_v16  ;;  %v2202_v4 = vpop.f32.mrf.mxu1 }
 0x76b   :  { %2938 = vpow2.f32 %v1962_v44 }
 0x76c   :  { %v1976_v45 = vsel %vm1936_vm5, %v1905_v18, %v2398_v9  ;;  %v2768_v20 = vpop.f32.mrf.mxu1 }
 0x76d   :  { %2752 = vmatprep.mubr.msk.f32.mxu0 %vm332_vm1, %v1976_v45 }
 0x76e   :  { %2753 = vmatmul.mubr.msk.f32.gmra.mxu0 %vm332_vm1, %v1977_v22  ;;  %v2212_v50 = vpop.f32.mrf.mxu1 }
 0x76f   :  { %v2933_v48 = vpop.eup %2932 }
 0x770   :  { %v2401_v27 = vadd.f32 -1.0, %v2933_v48  ;;  %v2771_v59 = vpop.f32.mrf.mxu1 }
 0x771   :  { %v2935_v41 = vpop.eup %2934 }
 0x772   :  { %v2400_v40 = vadd.f32 -1.0, %v2935_v41  ;;  %v1979_v49 = vsel %vm1939_vm8, %v2743_v2, %v2401_v27  ;;  %v2222_v13 = vpop.f32.mrf.mxu1 }
 0x774   :  { %v1978_v51 = vsel %vm1938_vm7, %v1915_v23, %v2400_v40  ;;  %v2774_v18 = vpop.f32.mrf.mxu1 }
 0x775   :  { %2755 = vmatprep.mubr.msk.f32.mxu0 %vm332_vm1, %v1978_v51 }
 0x776   :  { %v2937_v52 = vpop.eup %2936  ;;  %2756 = vmatmul.mubr.msk.f32.gmra.mxu0 %vm332_vm1, %v1979_v49  ;;  %v2232_v2 = vpop.f32.mrf.mxu1 }
 0x777   :  { %v2403_v53 = vadd.f32 -1.0, %v2937_v52 }
 0x778   :  { %v2939_v47 = vpop.eup %2938 }
 0x779   :  { %v2402_v30 = vadd.f32 -1.0, %v2939_v47  ;;  %v1981_v5 = vsel %vm1941_vm10, %v2746_v29, %v2403_v53 }
 0x77b   :  { %v1980_v62 = vsel %vm1940_vm9, %v1925_v11, %v2402_v30 }
 0x77c   :  { %2758 = vmatprep.mubr.msk.f32.mxu0 %vm332_vm1, %v1980_v62 }
 0x77d   :  { %2759 = vmatmul.mubr.msk.f32.gmra.mxu0 %vm332_vm1, %v1981_v5 }
 0x826   :  { %v2751_v31 = vpop.f32.mrf.mxu0 }
 0x827   :  { %v2208_v55 = vadd.f32 %v2765_v32, %v2751_v31 }
 0x828   :  { %v2073_v33 = vpop.f32.mrf.mxu0 }
 0x829   :  { %v2249_v43 = vadd.f32 %v2420_v54, %v2208_v55  ;;  %v2203_v56 = vadd.f32 %v2202_v4, %v2073_v33 }
 0x82b   :  { %2257 = vst.msk [vmem:[%s3555_s8 + $0x8] sm:$0xff] %vm332_vm1, %v2249_v43  ;;  %v2248_v57 = vadd.f32 %v2420_v54, %v2203_v56 }
 0x82d   :  { %2256 = vst.msk [vmem:[%s3555_s8] sm:$0xff] %vm332_vm1, %v2248_v57 }
 0x82e   :  { %v2754_v6 = vpop.f32.mrf.mxu0 }
 0x82f   :  { %v2218_v58 = vadd.f32 %v2768_v20, %v2754_v6 }
 0x830   :  { %v2083_v46 = vpop.f32.mrf.mxu0 }
 0x831   :  { %v2251_v60 = vadd.f32 %v2420_v54, %v2218_v58  ;;  %v2213_v7 = vadd.f32 %v2212_v50, %v2083_v46 }
 0x833   :  { %2259 = vst.msk [vmem:[%s3555_s8 + $0x18] sm:$0xff] %vm332_vm1, %v2251_v60  ;;  %v2250_v8 = vadd.f32 %v2420_v54, %v2213_v7 }
 0x835   :  { %2258 = vst.msk [vmem:[%s3555_s8 + $0x10] sm:$0xff] %vm332_vm1, %v2250_v8 }
 0x836   :  { %v2757_v10 = vpop.f32.mrf.mxu0 }
 0x837   :  { %v2228_v14 = vadd.f32 %v2771_v59, %v2757_v10 }
 0x838   :  { %v2093_v63 = vpop.f32.mrf.mxu0 }
 0x839   :  { %v2253_v17 = vadd.f32 %v2420_v54, %v2228_v14  ;;  %v2223_v39 = vadd.f32 %v2222_v13, %v2093_v63 }
 0x83b   :  { %2261 = vst.msk [vmem:[%s3555_s8 + $0x28] sm:$0xff] %vm332_vm1, %v2253_v17  ;;  %v2252_v61 = vadd.f32 %v2420_v54, %v2223_v39 }
 0x83d   :  { %2260 = vst.msk [vmem:[%s3555_s8 + $0x20] sm:$0xff] %vm332_vm1, %v2252_v61  ;;  %v2760_v0 = vpop.f32.mrf.mxu0 }
 0x83e   :  { %v2238_v1 = vadd.f32 %v2774_v18, %v2760_v0 }
 0x83f   :  { %v2103_v3 = vpop.f32.mrf.mxu0 }
 0x840   :  { %v2255_v21 = vadd.f32 %v2420_v54, %v2238_v1  ;;  %v2233_v23 = vadd.f32 %v2232_v2, %v2103_v3 }
 0x842   :  { %2263 = vst.msk [vmem:[%s3555_s8 + $0x38] sm:$0xff] %vm332_vm1, %v2255_v21  ;;  %v2254_v24 = vadd.f32 %v2420_v54, %v2233_v23 }
 0x844   :  { %2262 = vst.msk [vmem:[%s3555_s8 + $0x30] sm:$0xff] %vm332_vm1, %v2254_v24 }

</bundles_post_ra>
